<compile_context>
chip_gen: v7x
topology: tpu7x:2x2x1
jax: 0.10.0
libtpu: 0.0.40
codegen_flags: <defaults>
</compile_context>

<pallas_src>
import functools

import jax
import jax.numpy as jnp
from jax.experimental import pallas as pl
from jax.experimental.pallas import tpu as pltpu

EPS_BN = 1e-5
EPS_RENORM = 1e-7
VOCAB = 15554
RESULT_DIM = 21121

NUM_RES_BLOCKS = 4  # 1-D grid over the result-head N axis (<=8 per review)


def _round_up(n, m):
    return ((n + m - 1) // m) * m


# Result head lane-padded so it splits into NUM_RES_BLOCKS lane-dense blocks.
RES_PAD = _round_up(RESULT_DIM, 128 * NUM_RES_BLOCKS)   # 21504 = 168 * 128
RES_TN = RES_PAD // NUM_RES_BLOCKS                       # 5376  =  42 * 128

# Per-layer small vectors (biases, BN gamma/beta, int8 per-channel scales)
# packed into ONE lane-aligned (1, P) f32 block -> one input DMA.
_VEC_SEGMENTS_STATIC = (
    ("enc1_b", 512), ("enc1_g", 512), ("enc1_be", 512), ("enc1_s", 512),
    ("enc2_b", 128), ("enc2_g", 128), ("enc2_be", 128),
    ("enc3_b", 32), ("enc3_g", 32), ("enc3_be", 32),
    ("dec1_b", 128), ("dec1_g", 128), ("dec1_be", 128),
    ("dec2_b", 512), ("dec2_g", 512), ("dec2_be", 512),
)


def _vec_layout(D):
    """Returns (segments, offsets, total_width); every offset is 128-aligned."""
    segs = list(_VEC_SEGMENTS_STATIC) + [("dec3_b", D), ("dec3_s", D)]
    offs, cur = {}, 0
    for name, n in segs:
        offs[name] = cur
        cur += _round_up(n, 128)
    return segs, offs, cur


# ----------------------------------------------------------------------------
# Fused forward kernel.  Grid = (NUM_RES_BLOCKS,) over the result-head N axis:
#   step 0      : encoder (3x Linear+BN+ReLU) -> code scratch
#   every step  : result-head block Linear(32 -> RES_TN), int8 weight
#   last step   : decoder (2x Linear+BN+ReLU, Linear+Tanh)
# ----------------------------------------------------------------------------
def _fused_forward_kernel(h_ref, vecs_ref,
                          ew1_ref, ew2_ref, ew3_ref,
                          dw1_ref, dw2_ref, dw3_ref,
                          rw_ref, rs_ref, rb_ref,
                          dec_ref, res_ref,
                          code_ref, *, offs, D):
    step = pl.program_id(0)
    last = pl.num_programs(0) - 1

    def vec(name, n):
        off = offs[name]                       # python int -> static slice
        return vecs_ref[:, off:off + n]        # (1, n) f32

    def layer(x_bf16, w_ref, name, n, *, bn, act, scale=None,
              out_dtype=jnp.bfloat16):
        w = w_ref[...]
        if w.dtype != jnp.bfloat16:            # int8 weight -> bf16 (VPU)
            w = w.astype(jnp.bfloat16)
        y = jnp.dot(x_bf16, w, preferred_element_type=jnp.float32)  # (B,n) f32
        if scale is not None:                  # per-output-channel int8 scale
            y = y * vec(scale, n)
        y = y + vec(name + "_b", n)
        if bn:  # BatchNorm1d with batch statistics (biased var, eps=1e-5)
            mean = jnp.mean(y, axis=0, keepdims=True)
            var = jnp.mean(jnp.square(y - mean), axis=0, keepdims=True)
            y = (vec(name + "_g", n) * (y - mean) * jax.lax.rsqrt(var + EPS_BN)
                 + vec(name + "_be", n))
        if act == "relu":
            y = jnp.maximum(y, 0.0)
        elif act == "tanh":
            y = jnp.tanh(y)
        return y.astype(out_dtype)

    # --- Encoder: runs once; bottleneck `code` cached in VMEM scratch. ------
    @pl.when(step == 0)
    def _():
        h = h_ref[...]                                            # (B, D) bf16
        h = layer(h, ew1_ref, "enc1", 512, bn=True, act="relu", scale="enc1_s")
        h = layer(h, ew2_ref, "enc2", 128, bn=True, act="relu")
        code_ref[...] = layer(h, ew3_ref, "enc3", 32, bn=True, act="relu",
                              out_dtype=jnp.float32)              # (B, 32)

    code = code_ref[...].astype(jnp.bfloat16)                     # (B, 32)

    # --- Result head block: Linear(32 -> RES_TN slice), lane-dense store. ---
    acc = jnp.dot(code, rw_ref[...].astype(jnp.bfloat16),
                  preferred_element_type=jnp.float32)             # (B, RES_TN)
    res_ref[...] = acc * rs_ref[...] + rb_ref[...]

    # --- Decoder: runs once on the last step. --------------------------------
    @pl.when(step == last)
    def _():
        d = layer(code, dw1_ref, "dec1", 128, bn=True, act="relu")
        d = layer(d, dw2_ref, "dec2", 512, bn=True, act="relu")
        dec_ref[...] = layer(d, dw3_ref, "dec3", D, bn=False, act="tanh",
                             scale="dec3_s", out_dtype=jnp.float32)


# ----------------------------------------------------------------------------
# Parameter init (deterministic, synthetic), packed/quantized for the kernel.
# ----------------------------------------------------------------------------
def init_params(key, embedding_dim, length):
    D = 6 * length * embedding_dim
    keys = iter(jax.random.split(key, 32))

    def lin(fan_in, fan_out):
        w = (jax.random.normal(next(keys), (fan_in, fan_out), jnp.float32)
             / jnp.sqrt(jnp.float32(fan_in)))
        b = jax.random.normal(next(keys), (fan_out,), jnp.float32) * 0.01
        return w, b

    def quant_cols(w):
        """Symmetric int8 quantization, per output channel (column)."""
        absmax = jnp.max(jnp.abs(w), axis=0)
        scale = jnp.where(absmax > 0, absmax / 127.0, 1.0).astype(jnp.float32)
        q = jnp.clip(jnp.round(w / scale[None, :]), -127.0, 127.0)
        return q.astype(jnp.int8), scale

    p = {}
    # scale 0.3 -> typical row norm ~0.3*sqrt(E) > 1, so max_norm renorm fires
    p["embedding"] = (jax.random.normal(next(keys), (VOCAB, embedding_dim),
                                        jnp.float32) * 0.3)

    enc_w1, enc_b1 = lin(D, 512)
    enc_w2, enc_b2 = lin(512, 128)
    enc_w3, enc_b3 = lin(128, 32)
    res_w, res_b = lin(32, RESULT_DIM)
    dec_w1, dec_b1 = lin(32, 128)
    dec_w2, dec_b2 = lin(128, 512)
    dec_w3, dec_b3 = lin(512, D)

    # Big three weights -> int8 + per-output-channel f32 scale (halves the
    # dominant HBM DMA).  Result-head weight lane-padded to RES_PAD first so
    # both its DMA blocks and the in-kernel matmul are lane-dense.
    p["enc_w1"], enc1_s = quant_cols(enc_w1)
    p["dec_w3"], dec3_s = quant_cols(dec_w3)
    res_w_pad = jnp.pad(res_w, ((0, 0), (0, RES_PAD - RESULT_DIM)))
    p["res_w"], res_s = quant_cols(res_w_pad)
    p["res_scale"] = res_s.reshape(1, RES_PAD)
    p["res_b"] = jnp.pad(res_b, (0, RES_PAD - RESULT_DIM)).reshape(1, RES_PAD)

    # Remaining (small) weights stay bf16 (MXU-native).
    p["enc_w2"] = enc_w2.astype(jnp.bfloat16)
    p["enc_w3"] = enc_w3.astype(jnp.bfloat16)
    p["dec_w1"] = dec_w1.astype(jnp.bfloat16)
    p["dec_w2"] = dec_w2.astype(jnp.bfloat16)

    ones = lambda n: jnp.ones((n,), jnp.float32)
    zeros = lambda n: jnp.zeros((n,), jnp.float32)
    vals = {
        "enc1_b": enc_b1, "enc1_g": ones(512), "enc1_be": zeros(512),
        "enc1_s": enc1_s,
        "enc2_b": enc_b2, "enc2_g": ones(128), "enc2_be": zeros(128),
        "enc3_b": enc_b3, "enc3_g": ones(32), "enc3_be": zeros(32),
        "dec1_b": dec_b1, "dec1_g": ones(128), "dec1_be": zeros(128),
        "dec2_b": dec_b2, "dec2_g": ones(512), "dec2_be": zeros(512),
        "dec3_b": dec_b3, "dec3_s": dec3_s,
    }
    segs, _, total = _vec_layout(D)
    parts = []
    for name, n in segs:
        a = vals[name].astype(jnp.float32)
        parts.append(jnp.pad(a, (0, _round_up(n, 128) - n)))
    p["vecs"] = jnp.concatenate(parts).reshape(1, total)
    return p


# ----------------------------------------------------------------------------
# Full forward, mirroring Autoencoder.forward(x, length, embedding_dim).
# ----------------------------------------------------------------------------
@functools.partial(jax.jit, static_argnums=(2, 3))
def autoencoder_forward(params, x_stacked, length, embedding_dim):
    # x_stacked: int32 (6, B, L)  == torch.stack(x, dim=0)
    B = x_stacked.shape[1]
    D = 6 * length * embedding_dim
    idx = x_stacked.reshape(B, -1)                # == x.view(batch_size, -1)

    # Embedding gather + max_norm renorm (tiny XLA fusion; `em` is a returned
    # module output so it must hit HBM anyway).
    emb = jnp.take(params["embedding"], idx.reshape(-1), axis=0)   # (B*6L, E)
    nrm = jnp.sqrt(jnp.sum(emb * emb, axis=-1, keepdims=True))
    scale = jnp.where(nrm > 1.0, 1.0 / (nrm + EPS_RENORM), 1.0)
    em_rows = emb * scale
    em = em_rows.reshape(B, 6 * length, embedding_dim)
    h = em_rows.reshape(B, D).astype(jnp.bfloat16)  # encoder input, bf16 once

    _, offs, P = _vec_layout(D)
    kernel = functools.partial(_fused_forward_kernel, offs=offs, D=D)

    const = lambda shape: pl.BlockSpec(shape, lambda i: (0, 0))  # DMA'd once
    grid_spec = pltpu.PrefetchScalarGridSpec(
        num_scalar_prefetch=0,
        grid=(NUM_RES_BLOCKS,),
        in_specs=[
            const((B, D)),                                   # h (bf16)
            const((1, P)),                                   # packed vectors
            const((D, 512)),                                 # enc_w1 (int8)
            const((512, 128)),                               # enc_w2 (bf16)
            const((128, 32)),                                # enc_w3 (bf16)
            const((32, 128)),                                # dec_w1 (bf16)
            const((128, 512)),                               # dec_w2 (bf16)
            const((512, D)),                                 # dec_w3 (int8)
            pl.BlockSpec((32, RES_TN), lambda i: (0, i)),    # res_w (int8)
            pl.BlockSpec((1, RES_TN), lambda i: (0, i)),     # res_scale
            pl.BlockSpec((1, RES_TN), lambda i: (0, i)),     # res_b
        ],
        out_specs=[
            const((B, D)),                                   # decoder out
            pl.BlockSpec((B, RES_TN), lambda i: (0, i)),     # result (padded)
        ],
        scratch_shapes=[pltpu.VMEM((B, 32), jnp.float32)],   # bottleneck code
    )

    dec, result_pad = pl.pallas_call(
        kernel,
        out_shape=(jax.ShapeDtypeStruct((B, D), jnp.float32),
                   jax.ShapeDtypeStruct((B, RES_PAD), jnp.float32)),
        grid_spec=grid_spec,
        compiler_params=pltpu.CompilerParams(
            dimension_semantics=("arbitrary",),   # step 0 / last are special
            vmem_limit_bytes=24 * 1024 * 1024),   # ~6 MB resident + temps
    )(h, params["vecs"],
      params["enc_w1"], params["enc_w2"], params["enc_w3"],
      params["dec_w1"], params["dec_w2"], params["dec_w3"],
      params["res_w"], params["res_scale"], params["res_b"])

    # Exact width via a trivial fused XLA slice (kernel store stays lane-dense)
    result = result_pad[:, :RESULT_DIM]
    return dec.reshape(B, 6 * length, embedding_dim), em, result


if __name__ == "__main__":
    key = jax.random.PRNGKey(0)
    embedding_dim, length, batch = 32, 8, 2

    params = init_params(key, embedding_dim, length)

    kx = jax.random.fold_in(key, 999)
    # Torch forward receives a list of 6 (B, L) index tensors; here the
    # already-stacked equivalent of shape (6, B, L).
    x = jax.random.randint(kx, (6, batch, length), 0, VOCAB, dtype=jnp.int32)

    dec, em, result = autoencoder_forward(params, x, length, embedding_dim)
    jax.block_until_ready((dec, em, result))

    assert dec.shape == (batch, 6 * length, embedding_dim)
    assert em.shape == (batch, 6 * length, embedding_dim)
    assert result.shape == (batch, RESULT_DIM)
    assert bool(jnp.all(jnp.isfinite(dec)))
    assert bool(jnp.all(jnp.isfinite(result)))
    assert bool(jnp.all(jnp.abs(dec) <= 1.0))      # tanh output range
    print("KERNEL_OK")
</pallas_src>

<mosaic_0001>
module attributes {stable_mosaic.version = 11 : i64} {
  func.func @_fused_forward_kernel(%arg0: i32, %arg1: memref<2x1536xbf16, #tpu.memory_space<vmem>>, %arg2: memref<1x7808xf32, #tpu.memory_space<vmem>>, %arg3: memref<1536x512xi8, #tpu.memory_space<vmem>>, %arg4: memref<512x128xbf16, #tpu.memory_space<vmem>>, %arg5: memref<128x32xbf16, #tpu.memory_space<vmem>>, %arg6: memref<32x128xbf16, #tpu.memory_space<vmem>>, %arg7: memref<128x512xbf16, #tpu.memory_space<vmem>>, %arg8: memref<512x1536xi8, #tpu.memory_space<vmem>>, %arg9: memref<32x5376xi8, #tpu.memory_space<vmem>>, %arg10: memref<1x5376xf32, #tpu.memory_space<vmem>>, %arg11: memref<1x5376xf32, #tpu.memory_space<vmem>>, %arg12: memref<2x1536xf32, #tpu.memory_space<vmem>>, %arg13: memref<2x5376xf32, #tpu.memory_space<vmem>>, %arg14: memref<2x32xf32, #tpu.memory_space<vmem>>) attributes {dimension_semantics = [#tpu.dimension_semantics<arbitrary>], iteration_bounds = array<i64: 4>, scalar_prefetch = 0 : i64, scratch_operands = 1 : i64, tpu.core_type = #tpu.core_type<tc>, window_params = [{pipeline_mode = #tpu.pipeline_mode<synchronous>, transform_indices = @transform_0, window_bounds = array<i64: 2, 1536>}, {pipeline_mode = #tpu.pipeline_mode<synchronous>, transform_indices = @transform_1, window_bounds = array<i64: 1, 7808>}, {pipeline_mode = #tpu.pipeline_mode<synchronous>, transform_indices = @transform_2, window_bounds = array<i64: 1536, 512>}, {pipeline_mode = #tpu.pipeline_mode<synchronous>, transform_indices = @transform_3, window_bounds = array<i64: 512, 128>}, {pipeline_mode = #tpu.pipeline_mode<synchronous>, transform_indices = @transform_4, window_bounds = array<i64: 128, 32>}, {pipeline_mode = #tpu.pipeline_mode<synchronous>, transform_indices = @transform_5, window_bounds = array<i64: 32, 128>}, {pipeline_mode = #tpu.pipeline_mode<synchronous>, transform_indices = @transform_6, window_bounds = array<i64: 128, 512>}, {pipeline_mode = #tpu.pipeline_mode<synchronous>, transform_indices = @transform_7, window_bounds = array<i64: 512, 1536>}, {transform_indices = @transform_8, window_bounds = array<i64: 32, 5376>}, {transform_indices = @transform_9, window_bounds = array<i64: 1, 5376>}, {transform_indices = @transform_10, window_bounds = array<i64: 1, 5376>}, {pipeline_mode = #tpu.pipeline_mode<synchronous>, transform_indices = @transform_11, window_bounds = array<i64: 2, 1536>}, {transform_indices = @transform_12, window_bounds = array<i64: 2, 5376>}]} {
    %c0_i32 = arith.constant 0 : i32
    %0 = arith.cmpi eq, %arg0, %c0_i32 : i32
    %1 = arith.extui %0 : i1 to i32
    %c0_i32_0 = arith.constant 0 : i32
    %2 = arith.cmpi ne, %1, %c0_i32_0 : i32
    scf.if %2 {
      %c0_11 = arith.constant 0 : index
      %c0_12 = arith.constant 0 : index
      %18 = vector.load %arg1[%c0_11, %c0_12] : memref<2x1536xbf16, #tpu.memory_space<vmem>>, vector<2x1536xbf16>
      %c0_13 = arith.constant 0 : index
      %c0_14 = arith.constant 0 : index
      %19 = vector.load %arg3[%c0_13, %c0_14] : memref<1536x512xi8, #tpu.memory_space<vmem>>, vector<1536x512xi8>
      %20 = arith.sitofp %19 : vector<1536x512xi8> to vector<1536x512xbf16>
      %cst_15 = arith.constant dense<0.000000e+00> : vector<2x512xf32>
      %21 = tpu.matmul %18, %20, %cst_15 {dimension_numbers = #tpu.dot_dimension_numbers<[1], [0], [0], [1], [0, 0, 1, 1], [], []>} : vector<2x1536xbf16>, vector<1536x512xbf16>, vector<2x512xf32> -> vector<2x512xf32>
      %c0_16 = arith.constant 0 : index
      %c1536 = arith.constant 1536 : index
      %22 = vector.load %arg2[%c0_16, %c1536] : memref<1x7808xf32, #tpu.memory_space<vmem>>, vector<1x512xf32>
      %23 = vector.broadcast %22 : vector<1x512xf32> to vector<2x512xf32>
      %24 = arith.mulf %21, %23 : vector<2x512xf32>
      %c0_17 = arith.constant 0 : index
      %c0_18 = arith.constant 0 : index
      %25 = vector.load %arg2[%c0_17, %c0_18] : memref<1x7808xf32, #tpu.memory_space<vmem>>, vector<1x512xf32>
      %26 = vector.broadcast %25 : vector<1x512xf32> to vector<2x512xf32>
      %27 = arith.addf %24, %26 : vector<2x512xf32>
      %cst_19 = arith.constant dense<0.000000e+00> : vector<512xf32>
      %28 = vector.multi_reduction <add>, %27, %cst_19 [0] : vector<2x512xf32> to vector<512xf32>
      %29 = vector.shape_cast %28 : vector<512xf32> to vector<1x512xf32>
      %cst_20 = arith.constant 2.000000e+00 : f32
      %30 = vector.broadcast %cst_20 : f32 to vector<1x512xf32>
      %31 = arith.divf %29, %30 : vector<1x512xf32>
      %32 = vector.broadcast %31 : vector<1x512xf32> to vector<2x512xf32>
      %33 = arith.subf %27, %32 : vector<2x512xf32>
      %34 = arith.mulf %33, %33 : vector<2x512xf32>
      %cst_21 = arith.constant dense<0.000000e+00> : vector<512xf32>
      %35 = vector.multi_reduction <add>, %34, %cst_21 [0] : vector<2x512xf32> to vector<512xf32>
      %36 = vector.shape_cast %35 : vector<512xf32> to vector<1x512xf32>
      %cst_22 = arith.constant 2.000000e+00 : f32
      %37 = vector.broadcast %cst_22 : f32 to vector<1x512xf32>
      %38 = arith.divf %36, %37 : vector<1x512xf32>
      %c0_23 = arith.constant 0 : index
      %c512 = arith.constant 512 : index
      %39 = vector.load %arg2[%c0_23, %c512] : memref<1x7808xf32, #tpu.memory_space<vmem>>, vector<1x512xf32>
      %40 = vector.broadcast %31 : vector<1x512xf32> to vector<2x512xf32>
      %41 = arith.subf %27, %40 : vector<2x512xf32>
      %42 = vector.broadcast %39 : vector<1x512xf32> to vector<2x512xf32>
      %43 = arith.mulf %42, %41 : vector<2x512xf32>
      %cst_24 = arith.constant 9.99999974E-6 : f32
      %44 = vector.broadcast %cst_24 : f32 to vector<1x512xf32>
      %45 = arith.addf %38, %44 : vector<1x512xf32>
      %46 = math.rsqrt %45 : vector<1x512xf32>
      %47 = vector.broadcast %46 : vector<1x512xf32> to vector<2x512xf32>
      %48 = arith.mulf %43, %47 : vector<2x512xf32>
      %c0_25 = arith.constant 0 : index
      %c1024 = arith.constant 1024 : index
      %49 = vector.load %arg2[%c0_25, %c1024] : memref<1x7808xf32, #tpu.memory_space<vmem>>, vector<1x512xf32>
      %50 = vector.broadcast %49 : vector<1x512xf32> to vector<2x512xf32>
      %51 = arith.addf %48, %50 : vector<2x512xf32>
      %cst_26 = arith.constant 0.000000e+00 : f32
      %52 = vector.broadcast %cst_26 : f32 to vector<2x512xf32>
      %53 = arith.maximumf %51, %52 : vector<2x512xf32>
      %54 = arith.truncf %53 : vector<2x512xf32> to vector<2x512xbf16>
      %c0_27 = arith.constant 0 : index
      %c0_28 = arith.constant 0 : index
      %55 = vector.load %arg4[%c0_27, %c0_28] : memref<512x128xbf16, #tpu.memory_space<vmem>>, vector<512x128xbf16>
      %cst_29 = arith.constant dense<0.000000e+00> : vector<2x128xf32>
      %56 = tpu.matmul %54, %55, %cst_29 {dimension_numbers = #tpu.dot_dimension_numbers<[1], [0], [0], [1], [0, 0, 1, 1], [], []>} : vector<2x512xbf16>, vector<512x128xbf16>, vector<2x128xf32> -> vector<2x128xf32>
      %c0_30 = arith.constant 0 : index
      %c2048 = arith.constant 2048 : index
      %57 = vector.load %arg2[%c0_30, %c2048] : memref<1x7808xf32, #tpu.memory_space<vmem>>, vector<1x128xf32>
      %58 = vector.broadcast %57 : vector<1x128xf32> to vector<2x128xf32>
      %59 = arith.addf %56, %58 : vector<2x128xf32>
      %cst_31 = arith.constant dense<0.000000e+00> : vector<128xf32>
      %60 = vector.multi_reduction <add>, %59, %cst_31 [0] : vector<2x128xf32> to vector<128xf32>
      %61 = vector.shape_cast %60 : vector<128xf32> to vector<1x128xf32>
      %cst_32 = arith.constant 2.000000e+00 : f32
      %62 = vector.broadcast %cst_32 : f32 to vector<1x128xf32>
      %63 = arith.divf %61, %62 : vector<1x128xf32>
      %64 = vector.broadcast %63 : vector<1x128xf32> to vector<2x128xf32>
      %65 = arith.subf %59, %64 : vector<2x128xf32>
      %66 = arith.mulf %65, %65 : vector<2x128xf32>
      %cst_33 = arith.constant dense<0.000000e+00> : vector<128xf32>
      %67 = vector.multi_reduction <add>, %66, %cst_33 [0] : vector<2x128xf32> to vector<128xf32>
      %68 = vector.shape_cast %67 : vector<128xf32> to vector<1x128xf32>
      %cst_34 = arith.constant 2.000000e+00 : f32
      %69 = vector.broadcast %cst_34 : f32 to vector<1x128xf32>
      %70 = arith.divf %68, %69 : vector<1x128xf32>
      %c0_35 = arith.constant 0 : index
      %c2176 = arith.constant 2176 : index
      %71 = vector.load %arg2[%c0_35, %c2176] : memref<1x7808xf32, #tpu.memory_space<vmem>>, vector<1x128xf32>
      %72 = vector.broadcast %63 : vector<1x128xf32> to vector<2x128xf32>
      %73 = arith.subf %59, %72 : vector<2x128xf32>
      %74 = vector.broadcast %71 : vector<1x128xf32> to vector<2x128xf32>
      %75 = arith.mulf %74, %73 : vector<2x128xf32>
      %cst_36 = arith.constant 9.99999974E-6 : f32
      %76 = vector.broadcast %cst_36 : f32 to vector<1x128xf32>
      %77 = arith.addf %70, %76 : vector<1x128xf32>
      %78 = math.rsqrt %77 : vector<1x128xf32>
      %79 = vector.broadcast %78 : vector<1x128xf32> to vector<2x128xf32>
      %80 = arith.mulf %75, %79 : vector<2x128xf32>
      %c0_37 = arith.constant 0 : index
      %c2304 = arith.constant 2304 : index
      %81 = vector.load %arg2[%c0_37, %c2304] : memref<1x7808xf32, #tpu.memory_space<vmem>>, vector<1x128xf32>
      %82 = vector.broadcast %81 : vector<1x128xf32> to vector<2x128xf32>
      %83 = arith.addf %80, %82 : vector<2x128xf32>
      %cst_38 = arith.constant 0.000000e+00 : f32
      %84 = vector.broadcast %cst_38 : f32 to vector<2x128xf32>
      %85 = arith.maximumf %83, %84 : vector<2x128xf32>
      %86 = arith.truncf %85 : vector<2x128xf32> to vector<2x128xbf16>
      %c0_39 = arith.constant 0 : index
      %c0_40 = arith.constant 0 : index
      %87 = vector.load %arg5[%c0_39, %c0_40] : memref<128x32xbf16, #tpu.memory_space<vmem>>, vector<128x32xbf16>
      %cst_41 = arith.constant dense<0.000000e+00> : vector<2x32xf32>
      %88 = tpu.matmul %86, %87, %cst_41 {dimension_numbers = #tpu.dot_dimension_numbers<[1], [0], [0], [1], [0, 0, 1, 1], [], []>} : vector<2x128xbf16>, vector<128x32xbf16>, vector<2x32xf32> -> vector<2x32xf32>
      %c0_42 = arith.constant 0 : index
      %c2432 = arith.constant 2432 : index
      %89 = vector.load %arg2[%c0_42, %c2432] : memref<1x7808xf32, #tpu.memory_space<vmem>>, vector<1x32xf32>
      %90 = vector.broadcast %89 : vector<1x32xf32> to vector<2x32xf32>
      %91 = arith.addf %88, %90 : vector<2x32xf32>
      %cst_43 = arith.constant dense<0.000000e+00> : vector<32xf32>
      %92 = vector.multi_reduction <add>, %91, %cst_43 [0] : vector<2x32xf32> to vector<32xf32>
      %93 = vector.shape_cast %92 : vector<32xf32> to vector<1x32xf32>
      %cst_44 = arith.constant 2.000000e+00 : f32
      %94 = vector.broadcast %cst_44 : f32 to vector<1x32xf32>
      %95 = arith.divf %93, %94 : vector<1x32xf32>
      %96 = vector.broadcast %95 : vector<1x32xf32> to vector<2x32xf32>
      %97 = arith.subf %91, %96 : vector<2x32xf32>
      %98 = arith.mulf %97, %97 : vector<2x32xf32>
      %cst_45 = arith.constant dense<0.000000e+00> : vector<32xf32>
      %99 = vector.multi_reduction <add>, %98, %cst_45 [0] : vector<2x32xf32> to vector<32xf32>
      %100 = vector.shape_cast %99 : vector<32xf32> to vector<1x32xf32>
      %cst_46 = arith.constant 2.000000e+00 : f32
      %101 = vector.broadcast %cst_46 : f32 to vector<1x32xf32>
      %102 = arith.divf %100, %101 : vector<1x32xf32>
      %c0_47 = arith.constant 0 : index
      %c2560 = arith.constant 2560 : index
      %103 = vector.load %arg2[%c0_47, %c2560] : memref<1x7808xf32, #tpu.memory_space<vmem>>, vector<1x32xf32>
      %104 = vector.broadcast %95 : vector<1x32xf32> to vector<2x32xf32>
      %105 = arith.subf %91, %104 : vector<2x32xf32>
      %106 = vector.broadcast %103 : vector<1x32xf32> to vector<2x32xf32>
      %107 = arith.mulf %106, %105 : vector<2x32xf32>
      %cst_48 = arith.constant 9.99999974E-6 : f32
      %108 = vector.broadcast %cst_48 : f32 to vector<1x32xf32>
      %109 = arith.addf %102, %108 : vector<1x32xf32>
      %110 = math.rsqrt %109 : vector<1x32xf32>
      %111 = vector.broadcast %110 : vector<1x32xf32> to vector<2x32xf32>
      %112 = arith.mulf %107, %111 : vector<2x32xf32>
      %c0_49 = arith.constant 0 : index
      %c2688 = arith.constant 2688 : index
      %113 = vector.load %arg2[%c0_49, %c2688] : memref<1x7808xf32, #tpu.memory_space<vmem>>, vector<1x32xf32>
      %114 = vector.broadcast %113 : vector<1x32xf32> to vector<2x32xf32>
      %115 = arith.addf %112, %114 : vector<2x32xf32>
      %cst_50 = arith.constant 0.000000e+00 : f32
      %116 = vector.broadcast %cst_50 : f32 to vector<2x32xf32>
      %117 = arith.maximumf %115, %116 : vector<2x32xf32>
      %c0_51 = arith.constant 0 : index
      %c0_52 = arith.constant 0 : index
      %118 = vector.load %arg14[%c0_51, %c0_52] : memref<2x32xf32, #tpu.memory_space<vmem>>, vector<2x32xf32>
      tpu.vector_store %arg14[%c0_51, %c0_52], %117 {strides = array<i32>} : memref<2x32xf32, #tpu.memory_space<vmem>>, vector<2x32xf32>,
    } else {
    }
    %c0 = arith.constant 0 : index
    %c0_1 = arith.constant 0 : index
    %3 = vector.load %arg14[%c0, %c0_1] : memref<2x32xf32, #tpu.memory_space<vmem>>, vector<2x32xf32>
    %4 = arith.truncf %3 : vector<2x32xf32> to vector<2x32xbf16>
    %c0_2 = arith.constant 0 : index
    %c0_3 = arith.constant 0 : index
    %5 = vector.load %arg9[%c0_2, %c0_3] : memref<32x5376xi8, #tpu.memory_space<vmem>>, vector<32x5376xi8>
    %6 = arith.sitofp %5 : vector<32x5376xi8> to vector<32x5376xbf16>
    %cst = arith.constant dense<0.000000e+00> : vector<2x5376xf32>
    %7 = tpu.matmul %4, %6, %cst {dimension_numbers = #tpu.dot_dimension_numbers<[1], [0], [0], [1], [0, 0, 1, 1], [], []>} : vector<2x32xbf16>, vector<32x5376xbf16>, vector<2x5376xf32> -> vector<2x5376xf32>
    %c0_4 = arith.constant 0 : index
    %c0_5 = arith.constant 0 : index
    %8 = vector.load %arg10[%c0_4, %c0_5] : memref<1x5376xf32, #tpu.memory_space<vmem>>, vector<1x5376xf32>
    %9 = vector.broadcast %8 : vector<1x5376xf32> to vector<2x5376xf32>
    %10 = arith.mulf %7, %9 : vector<2x5376xf32>
    %c0_6 = arith.constant 0 : index
    %c0_7 = arith.constant 0 : index
    %11 = vector.load %arg11[%c0_6, %c0_7] : memref<1x5376xf32, #tpu.memory_space<vmem>>, vector<1x5376xf32>
    %12 = vector.broadcast %11 : vector<1x5376xf32> to vector<2x5376xf32>
    %13 = arith.addf %10, %12 : vector<2x5376xf32>
    %c0_8 = arith.constant 0 : index
    %c0_9 = arith.constant 0 : index
    %14 = vector.load %arg13[%c0_8, %c0_9] : memref<2x5376xf32, #tpu.memory_space<vmem>>, vector<2x5376xf32>
    tpu.vector_store %arg13[%c0_8, %c0_9], %13 {strides = array<i32>} : memref<2x5376xf32, #tpu.memory_space<vmem>>, vector<2x5376xf32>,
    %c3_i32 = arith.constant 3 : i32
    %15 = arith.cmpi eq, %arg0, %c3_i32 : i32
    %16 = arith.extui %15 : i1 to i32
    %c0_i32_10 = arith.constant 0 : i32
    %17 = arith.cmpi ne, %16, %c0_i32_10 : i32
    scf.if %17 {
      %c0_11 = arith.constant 0 : index
      %c0_12 = arith.constant 0 : index
      %18 = vector.load %arg6[%c0_11, %c0_12] : memref<32x128xbf16, #tpu.memory_space<vmem>>, vector<32x128xbf16>
      %cst_13 = arith.constant dense<0.000000e+00> : vector<2x128xf32>
      %19 = tpu.matmul %4, %18, %cst_13 {dimension_numbers = #tpu.dot_dimension_numbers<[1], [0], [0], [1], [0, 0, 1, 1], [], []>} : vector<2x32xbf16>, vector<32x128xbf16>, vector<2x128xf32> -> vector<2x128xf32>
      %c0_14 = arith.constant 0 : index
      %c2816 = arith.constant 2816 : index
      %20 = vector.load %arg2[%c0_14, %c2816] : memref<1x7808xf32, #tpu.memory_space<vmem>>, vector<1x128xf32>
      %21 = vector.broadcast %20 : vector<1x128xf32> to vector<2x128xf32>
      %22 = arith.addf %19, %21 : vector<2x128xf32>
      %cst_15 = arith.constant dense<0.000000e+00> : vector<128xf32>
      %23 = vector.multi_reduction <add>, %22, %cst_15 [0] : vector<2x128xf32> to vector<128xf32>
      %24 = vector.shape_cast %23 : vector<128xf32> to vector<1x128xf32>
      %cst_16 = arith.constant 2.000000e+00 : f32
      %25 = vector.broadcast %cst_16 : f32 to vector<1x128xf32>
      %26 = arith.divf %24, %25 : vector<1x128xf32>
      %27 = vector.broadcast %26 : vector<1x128xf32> to vector<2x128xf32>
      %28 = arith.subf %22, %27 : vector<2x128xf32>
      %29 = arith.mulf %28, %28 : vector<2x128xf32>
      %cst_17 = arith.constant dense<0.000000e+00> : vector<128xf32>
      %30 = vector.multi_reduction <add>, %29, %cst_17 [0] : vector<2x128xf32> to vector<128xf32>
      %31 = vector.shape_cast %30 : vector<128xf32> to vector<1x128xf32>
      %cst_18 = arith.constant 2.000000e+00 : f32
      %32 = vector.broadcast %cst_18 : f32 to vector<1x128xf32>
      %33 = arith.divf %31, %32 : vector<1x128xf32>
      %c0_19 = arith.constant 0 : index
      %c2944 = arith.constant 2944 : index
      %34 = vector.load %arg2[%c0_19, %c2944] : memref<1x7808xf32, #tpu.memory_space<vmem>>, vector<1x128xf32>
      %35 = vector.broadcast %26 : vector<1x128xf32> to vector<2x128xf32>
      %36 = arith.subf %22, %35 : vector<2x128xf32>
      %37 = vector.broadcast %34 : vector<1x128xf32> to vector<2x128xf32>
      %38 = arith.mulf %37, %36 : vector<2x128xf32>
      %cst_20 = arith.constant 9.99999974E-6 : f32
      %39 = vector.broadcast %cst_20 : f32 to vector<1x128xf32>
      %40 = arith.addf %33, %39 : vector<1x128xf32>
      %41 = math.rsqrt %40 : vector<1x128xf32>
      %42 = vector.broadcast %41 : vector<1x128xf32> to vector<2x128xf32>
      %43 = arith.mulf %38, %42 : vector<2x128xf32>
      %c0_21 = arith.constant 0 : index
      %c3072 = arith.constant 3072 : index
      %44 = vector.load %arg2[%c0_21, %c3072] : memref<1x7808xf32, #tpu.memory_space<vmem>>, vector<1x128xf32>
      %45 = vector.broadcast %44 : vector<1x128xf32> to vector<2x128xf32>
      %46 = arith.addf %43, %45 : vector<2x128xf32>
      %cst_22 = arith.constant 0.000000e+00 : f32
      %47 = vector.broadcast %cst_22 : f32 to vector<2x128xf32>
      %48 = arith.maximumf %46, %47 : vector<2x128xf32>
      %49 = arith.truncf %48 : vector<2x128xf32> to vector<2x128xbf16>
      %c0_23 = arith.constant 0 : index
      %c0_24 = arith.constant 0 : index
      %50 = vector.load %arg7[%c0_23, %c0_24] : memref<128x512xbf16, #tpu.memory_space<vmem>>, vector<128x512xbf16>
      %cst_25 = arith.constant dense<0.000000e+00> : vector<2x512xf32>
      %51 = tpu.matmul %49, %50, %cst_25 {dimension_numbers = #tpu.dot_dimension_numbers<[1], [0], [0], [1], [0, 0, 1, 1], [], []>} : vector<2x128xbf16>, vector<128x512xbf16>, vector<2x512xf32> -> vector<2x512xf32>
      %c0_26 = arith.constant 0 : index
      %c3200 = arith.constant 3200 : index
      %52 = vector.load %arg2[%c0_26, %c3200] : memref<1x7808xf32, #tpu.memory_space<vmem>>, vector<1x512xf32>
      %53 = vector.broadcast %52 : vector<1x512xf32> to vector<2x512xf32>
      %54 = arith.addf %51, %53 : vector<2x512xf32>
      %cst_27 = arith.constant dense<0.000000e+00> : vector<512xf32>
      %55 = vector.multi_reduction <add>, %54, %cst_27 [0] : vector<2x512xf32> to vector<512xf32>
      %56 = vector.shape_cast %55 : vector<512xf32> to vector<1x512xf32>
      %cst_28 = arith.constant 2.000000e+00 : f32
      %57 = vector.broadcast %cst_28 : f32 to vector<1x512xf32>
      %58 = arith.divf %56, %57 : vector<1x512xf32>
      %59 = vector.broadcast %58 : vector<1x512xf32> to vector<2x512xf32>
      %60 = arith.subf %54, %59 : vector<2x512xf32>
      %61 = arith.mulf %60, %60 : vector<2x512xf32>
      %cst_29 = arith.constant dense<0.000000e+00> : vector<512xf32>
      %62 = vector.multi_reduction <add>, %61, %cst_29 [0] : vector<2x512xf32> to vector<512xf32>
      %63 = vector.shape_cast %62 : vector<512xf32> to vector<1x512xf32>
      %cst_30 = arith.constant 2.000000e+00 : f32
      %64 = vector.broadcast %cst_30 : f32 to vector<1x512xf32>
      %65 = arith.divf %63, %64 : vector<1x512xf32>
      %c0_31 = arith.constant 0 : index
      %c3712 = arith.constant 3712 : index
      %66 = vector.load %arg2[%c0_31, %c3712] : memref<1x7808xf32, #tpu.memory_space<vmem>>, vector<1x512xf32>
      %67 = vector.broadcast %58 : vector<1x512xf32> to vector<2x512xf32>
      %68 = arith.subf %54, %67 : vector<2x512xf32>
      %69 = vector.broadcast %66 : vector<1x512xf32> to vector<2x512xf32>
      %70 = arith.mulf %69, %68 : vector<2x512xf32>
      %cst_32 = arith.constant 9.99999974E-6 : f32
      %71 = vector.broadcast %cst_32 : f32 to vector<1x512xf32>
      %72 = arith.addf %65, %71 : vector<1x512xf32>
      %73 = math.rsqrt %72 : vector<1x512xf32>
      %74 = vector.broadcast %73 : vector<1x512xf32> to vector<2x512xf32>
      %75 = arith.mulf %70, %74 : vector<2x512xf32>
      %c0_33 = arith.constant 0 : index
      %c4224 = arith.constant 4224 : index
      %76 = vector.load %arg2[%c0_33, %c4224] : memref<1x7808xf32, #tpu.memory_space<vmem>>, vector<1x512xf32>
      %77 = vector.broadcast %76 : vector<1x512xf32> to vector<2x512xf32>
      %78 = arith.addf %75, %77 : vector<2x512xf32>
      %cst_34 = arith.constant 0.000000e+00 : f32
      %79 = vector.broadcast %cst_34 : f32 to vector<2x512xf32>
      %80 = arith.maximumf %78, %79 : vector<2x512xf32>
      %81 = arith.truncf %80 : vector<2x512xf32> to vector<2x512xbf16>
      %c0_35 = arith.constant 0 : index
      %c0_36 = arith.constant 0 : index
      %82 = vector.load %arg8[%c0_35, %c0_36] : memref<512x1536xi8, #tpu.memory_space<vmem>>, vector<512x1536xi8>
      %83 = arith.sitofp %82 : vector<512x1536xi8> to vector<512x1536xbf16>
      %cst_37 = arith.constant dense<0.000000e+00> : vector<2x1536xf32>
      %84 = tpu.matmul %81, %83, %cst_37 {dimension_numbers = #tpu.dot_dimension_numbers<[1], [0], [0], [1], [0, 0, 1, 1], [], []>} : vector<2x512xbf16>, vector<512x1536xbf16>, vector<2x1536xf32> -> vector<2x1536xf32>
      %c0_38 = arith.constant 0 : index
      %c6272 = arith.constant 6272 : index
      %85 = vector.load %arg2[%c0_38, %c6272] : memref<1x7808xf32, #tpu.memory_space<vmem>>, vector<1x1536xf32>
      %86 = vector.broadcast %85 : vector<1x1536xf32> to vector<2x1536xf32>
      %87 = arith.mulf %84, %86 : vector<2x1536xf32>
      %c0_39 = arith.constant 0 : index
      %c4736 = arith.constant 4736 : index
      %88 = vector.load %arg2[%c0_39, %c4736] : memref<1x7808xf32, #tpu.memory_space<vmem>>, vector<1x1536xf32>
      %89 = vector.broadcast %88 : vector<1x1536xf32> to vector<2x1536xf32>
      %90 = arith.addf %87, %89 : vector<2x1536xf32>
      %91 = math.tanh %90 : vector<2x1536xf32>
      %c0_40 = arith.constant 0 : index
      %c0_41 = arith.constant 0 : index
      %92 = vector.load %arg12[%c0_40, %c0_41] : memref<2x1536xf32, #tpu.memory_space<vmem>>, vector<2x1536xf32>
      tpu.vector_store %arg12[%c0_40, %c0_41], %91 {strides = array<i32>} : memref<2x1536xf32, #tpu.memory_space<vmem>>, vector<2x1536xf32>,
    } else {
    }
    return
  }
  func.func @transform_0(%arg0: i32) -> (i32, i32) {
    %c0_i32 = arith.constant 0 : i32
    %c0_i32_0 = arith.constant 0 : i32
    %c0_i32_1 = arith.constant 0 : i32
    return %c0_i32, %c0_i32_0 : i32, i32
  }
  func.func @transform_1(%arg0: i32) -> (i32, i32) {
    %c0_i32 = arith.constant 0 : i32
    %c0_i32_0 = arith.constant 0 : i32
    %c0_i32_1 = arith.constant 0 : i32
    return %c0_i32, %c0_i32_0 : i32, i32
  }
  func.func @transform_2(%arg0: i32) -> (i32, i32) {
    %c0_i32 = arith.constant 0 : i32
    %c0_i32_0 = arith.constant 0 : i32
    %c0_i32_1 = arith.constant 0 : i32
    return %c0_i32, %c0_i32_0 : i32, i32
  }
  func.func @transform_3(%arg0: i32) -> (i32, i32) {
    %c0_i32 = arith.constant 0 : i32
    %c0_i32_0 = arith.constant 0 : i32
    %c0_i32_1 = arith.constant 0 : i32
    return %c0_i32, %c0_i32_0 : i32, i32
  }
  func.func @transform_4(%arg0: i32) -> (i32, i32) {
    %c0_i32 = arith.constant 0 : i32
    %c0_i32_0 = arith.constant 0 : i32
    %c0_i32_1 = arith.constant 0 : i32
    return %c0_i32, %c0_i32_0 : i32, i32
  }
  func.func @transform_5(%arg0: i32) -> (i32, i32) {
    %c0_i32 = arith.constant 0 : i32
    %c0_i32_0 = arith.constant 0 : i32
    %c0_i32_1 = arith.constant 0 : i32
    return %c0_i32, %c0_i32_0 : i32, i32
  }
  func.func @transform_6(%arg0: i32) -> (i32, i32) {
    %c0_i32 = arith.constant 0 : i32
    %c0_i32_0 = arith.constant 0 : i32
    %c0_i32_1 = arith.constant 0 : i32
    return %c0_i32, %c0_i32_0 : i32, i32
  }
  func.func @transform_7(%arg0: i32) -> (i32, i32) {
    %c0_i32 = arith.constant 0 : i32
    %c0_i32_0 = arith.constant 0 : i32
    %c0_i32_1 = arith.constant 0 : i32
    return %c0_i32, %c0_i32_0 : i32, i32
  }
  func.func @transform_8(%arg0: i32) -> (i32, i32) {
    %c0_i32 = arith.constant 0 : i32
    %c0_i32_0 = arith.constant 0 : i32
    return %c0_i32, %arg0 : i32, i32
  }
  func.func @transform_9(%arg0: i32) -> (i32, i32) {
    %c0_i32 = arith.constant 0 : i32
    %c0_i32_0 = arith.constant 0 : i32
    return %c0_i32, %arg0 : i32, i32
  }
  func.func @transform_10(%arg0: i32) -> (i32, i32) {
    %c0_i32 = arith.constant 0 : i32
    %c0_i32_0 = arith.constant 0 : i32
    return %c0_i32, %arg0 : i32, i32
  }
  func.func @transform_11(%arg0: i32) -> (i32, i32) {
    %c0_i32 = arith.constant 0 : i32
    %c0_i32_0 = arith.constant 0 : i32
    %c0_i32_1 = arith.constant 0 : i32
    return %c0_i32, %c0_i32_0 : i32, i32
  }
  func.func @transform_12(%arg0: i32) -> (i32, i32) {
    %c0_i32 = arith.constant 0 : i32
    %c0_i32_0 = arith.constant 0 : i32
    return %c0_i32, %arg0 : i32, i32
  }
}

</mosaic_0001>

<bundles_post_ra>
// kernel: autoencoder_forward.1
= control target key start
LH: loop header
LB: loop body
LE: loop exit
PB: predicated region body
PF: predicated region fallthrough
CT: control target
= control target key end

     0   :  { %s6538_s21 = smov 0   ;;  %s8518_s0 = inlined_call_operand.vmem [shape: bf16[2,1536], index: 0, kind: input, shape index: {}]   ;;  %s8519_s1 = inlined_call_operand.vmem [shape: f32[1,7808], index: 1, kind: input, shape index: {}]   ;;  %s8520_s2 = inlined_call_operand.vmem [shape: s8[1536,512], index: 2, kind: input, shape index: {}]   ;;  %s8521_s3 = inlined_call_operand.vmem [shape: bf16[512,128], index: 3, kind: input, shape index: {}]   ;;  %s8522_s4 = inlined_call_operand.vmem [shape: bf16[128,32], index: 4, kind: input, shape index: {}]   ;;  %s8523_s5 = inlined_call_operand.vmem [shape: bf16[32,128], index: 5, kind: input, shape index: {}]   ;;  %s8524_s6 = inlined_call_operand.vmem [shape: bf16[128,512], index: 6, kind: input, shape index: {}]   ;;  %s8525_s7 = inlined_call_operand.vmem [shape: s8[512,1536], index: 7, kind: input, shape index: {}]   ;;  %s8526_s8 = inlined_call_operand.vmem [shape: s8[32,21504], index: 8, kind: input, shape index: {}]   ;;  %s8527_s9 = inlined_call_operand.vmem [shape: f32[1,21504], index: 9, kind: input, shape index: {}]   ;;  %s8528_s10 = inlined_call_operand.vmem [shape: f32[1,21504], index: 10, kind: input, shape index: {}]   ;;  %s8529_s11 = inlined_call_operand.vmem [shape: f32[2,1536], index: 11, kind: output, shape index: {0}]   ;;  %s8530_s12 = inlined_call_operand.vmem [shape: f32[2,21504], index: 12, kind: output, shape index: {1}]  }
   0x1 LB: > { %s6544_s22 = sadd.s32 4294967295, %s6463_s21   ;;  %p6042_p0 = scmp.ge.s32.totalorder %s6463_s21, 1  ;;  %s6463_s21 = sphi %s6538_s21, %s23_s21  }
   0x2   : > { %p381_p1 = scmp.lt.s32.totalorder %s6463_s21, 5 }
   0x4   : > { %p382_p2 = pnand %p6042_p0, %p381_p1 }
   0x5   : > { %s431_s23 = smul.u32 (!%p382_p2), 42, %s6544_s22  ;;  %p6045_p4 = scmp.ne.s32.totalorder (!%p382_p2), %s6544_s22, 0 }
   0x6   : > { %385 = sbr.rel (%p382_p2) target bundleno = 2615 (0xa37), region = 64 }
   0x7   : > { %p432_p3 = scmp.lt.s32.totalorder (!%p382_p2), %s431_s23, 167 }
   0xd   : > { %s8532_s23 = smov (!%p432_p3, %s431_s23), 167  ;;  %457 = sbr.rel (%p6045_p4) target bundleno = 1217 (0x4c1), region = 68 }
   0xe   : > { %s6043_s24 = sshll.u32 %s8532_s23, 3  ;;  %s6552_s27 = scalar_lea.vmem %s8527_s9, %s8532_s23  ;;  %v461_v0 = vld [vmem:[%s8520_s2 + $0x8] sm:$0xff] (!%p6045_p4)  ;;  %v463_v1 = vld [vmem:[%s8520_s2 + $0x18] sm:$0xff] (!%p6045_p4)  ;;  %v460_v2 = vld [vmem:[%s8520_s2] sm:$0xff] (!%p6045_p4)  ;;  %v1042_v30 = vlaneseq (!%p6045_p4)  ;;  %v6465_v35 = vmov (!%p6045_p4), 1966171168  }
   0xf   : > { %s6557_s30 = scalar_lea.vmem %s8526_s8, %s6043_s24  ;;  %s6562_s15 = scalar_lea.vmem %s8528_s10, %s8532_s23  ;;  %v653_v3 = vunpack.c.l.s8.bf16 (!%p6045_p4), %v461_v0  ;;  %v657_v4 = vunpack.c.h.s8.bf16 (!%p6045_p4), %v461_v0  ;;  %v655_v5 = vunpack.c.l.s8.bf16 (!%p6045_p4), %v463_v1  ;;  %v659_v6 = vunpack.c.h.s8.bf16 (!%p6045_p4), %v463_v1  ;;  %v462_v7 = vld [vmem:[%s8520_s2 + $0x10] sm:$0xff] (!%p6045_p4)  ;;  %v465_v10 = vld [vmem:[%s8520_s2 + $0x28] sm:$0xff] (!%p6045_p4)  ;;  %v467_v11 = vld [vmem:[%s8520_s2 + $0x38] sm:$0xff] (!%p6045_p4) }
  0x10   : > { %s6044_s16 = sshll.u32 %s8532_s23, 1  ;;  %v652_v8 = vunpack.c.l.s8.bf16 (!%p6045_p4), %v460_v2  ;;  %v654_v9 = vunpack.c.l.s8.bf16 (!%p6045_p4), %v462_v7  ;;  %v656_v12 = vunpack.c.h.s8.bf16 (!%p6045_p4), %v460_v2  ;;  %v658_v13 = vunpack.c.h.s8.bf16 (!%p6045_p4), %v462_v7  ;;  %v464_v16 = vld [vmem:[%s8520_s2 + $0x20] sm:$0xff] (!%p6045_p4)  ;;  %v466_v17 = vld [vmem:[%s8520_s2 + $0x30] sm:$0xff] (!%p6045_p4)  ;;  %v469_v22 = vld [vmem:[%s8520_s2 + $0x48] sm:$0xff] (!%p6045_p4) }
  0x11   : > { %s6567_s19 = scalar_lea.vmem %s8530_s12, %s6044_s16  ;;  %1123 = vmatprep.subr.bf16.mxu0 (!%p6045_p4), %v653_v3  ;;  %1369 = vmatprep.subr.bf16.mxu1 (!%p6045_p4), %v655_v5  ;;  %v661_v14 = vunpack.c.l.s8.bf16 (!%p6045_p4), %v465_v10  ;;  %v663_v15 = vunpack.c.l.s8.bf16 (!%p6045_p4), %v467_v11  ;;  %v660_v18 = vunpack.c.l.s8.bf16 (!%p6045_p4), %v464_v16  ;;  %v662_v19 = vunpack.c.l.s8.bf16 (!%p6045_p4), %v466_v17  ;;  %v471_v23 = vld [vmem:[%s8520_s2 + $0x58] sm:$0xff] (!%p6045_p4)  ;;  %v468_v28 = vld [vmem:[%s8520_s2 + $0x40] sm:$0xff] (!%p6045_p4)  ;;  %v470_v29 = vld [vmem:[%s8520_s2 + $0x50] sm:$0xff] (!%p6045_p4) }
  0x12   : > { %1124 = vmatpush1.bf16.msra.mxu0 (!%p6045_p4), %v652_v8  ;;  %1370 = vmatpush1.bf16.msra.mxu1 (!%p6045_p4), %v654_v9  ;;  %v665_v20 = vunpack.c.h.s8.bf16 (!%p6045_p4), %v465_v10  ;;  %v667_v21 = vunpack.c.h.s8.bf16 (!%p6045_p4), %v467_v11  ;;  %v664_v24 = vunpack.c.h.s8.bf16 (!%p6045_p4), %v464_v16  ;;  %v666_v25 = vunpack.c.h.s8.bf16 (!%p6045_p4), %v466_v17  ;;  %v473_v38 = vld [vmem:[%s8520_s2 + $0x68] sm:$0xff] (!%p6045_p4)  ;;  %v475_v39 = vld [vmem:[%s8520_s2 + $0x78] sm:$0xff] (!%p6045_p4)  ;;  %v6617_v43 = vld [vmem:[%s8518_s0] sm:$0xff] (!%p6045_p4) }
  0x13   : > { %1125 = vmatprep.subr.bf16.mxu0 (!%p6045_p4), %v657_v4  ;;  %1371 = vmatprep.subr.bf16.mxu1 (!%p6045_p4), %v659_v6  ;;  %v669_v26 = vunpack.c.l.s8.bf16 (!%p6045_p4), %v469_v22  ;;  %v671_v27 = vunpack.c.l.s8.bf16 (!%p6045_p4), %v471_v23  ;;  %v668_v31 = vunpack.c.l.s8.bf16 (!%p6045_p4), %v468_v28  ;;  %v670_v32 = vunpack.c.l.s8.bf16 (!%p6045_p4), %v470_v29  ;;  %v472_v46 = vld [vmem:[%s8520_s2 + $0x60] sm:$0xff] (!%p6045_p4)  ;;  %v474_v47 = vld [vmem:[%s8520_s2 + $0x70] sm:$0xff] (!%p6045_p4)  ;;  %v477_v55 = vld [vmem:[%s8520_s2 + $0x88] sm:$0xff] (!%p6045_p4) }
  0x14   : > { %v673_v33 = vunpack.c.h.s8.bf16 %v469_v22  ;;  %v675_v34 = vunpack.c.h.s8.bf16 %v471_v23  ;;  %v1040_v36 = vunpack.c.l.s4 %v6465_v35  ;;  %v6606_v37 = vshrl.u32 %v1042_v30, 7  ;;  %v479_v56 = vld [vmem:[%s8520_s2 + $0x98] sm:$0xff]  ;;  %v476_v57 = vld [vmem:[%s8520_s2 + $0x80] sm:$0xff]  ;;  %v478_v58 = vld [vmem:[%s8520_s2 + $0x90] sm:$0xff] }
  0x15   : > { %v672_v41 = vunpack.c.h.s8.bf16 %v468_v28  ;;  %v674_v42 = vunpack.c.h.s8.bf16 %v470_v29  ;;  %v677_v44 = vunpack.c.l.s8.bf16 %v473_v38  ;;  %v679_v45 = vunpack.c.l.s8.bf16 %v475_v39  ;;  %v481_v4 = vld [vmem:[%s8520_s2 + $0xa8] sm:$0xff]  ;;  %v483_v5 = vld [vmem:[%s8520_s2 + $0xb8] sm:$0xff]  ;;  %v480_v6 = vld [vmem:[%s8520_s2 + $0xa0] sm:$0xff] }
  0x16   : > { %1126 = vmatpush1.bf16.msra.mxu0 %v656_v12  ;;  %1372 = vmatpush1.bf16.msra.mxu1 %v658_v13  ;;  %v1041_v40 = vunpack.c.0.s8 %v1040_v36  ;;  %v676_v50 = vunpack.c.l.s8.bf16 %v472_v46  ;;  %v678_v51 = vunpack.c.l.s8.bf16 %v474_v47  ;;  %v681_v52 = vunpack.c.h.s8.bf16 %v473_v38  ;;  %v482_v7 = vld [vmem:[%s8520_s2 + $0xb0] sm:$0xff]  ;;  %v485_v16 = vld [vmem:[%s8520_s2 + $0xc8] sm:$0xff]  ;;  %v487_v17 = vld [vmem:[%s8520_s2 + $0xd8] sm:$0xff] }
  0x17   : > { %1127 = vmatprep.subr.bf16.mxu0 %v661_v14  ;;  %1373 = vmatprep.subr.bf16.mxu1 %v663_v15  ;;  %v683_v53 = vunpack.c.h.s8.bf16 %v475_v39  ;;  %v680_v60 = vunpack.c.h.s8.bf16 %v472_v46  ;;  %v682_v61 = vunpack.c.h.s8.bf16 %v474_v47  ;;  %v685_v62 = vunpack.c.l.s8.bf16 %v477_v55  ;;  %v489_v28 = vld [vmem:[%s8520_s2 + $0xe8] sm:$0xff]  ;;  %v491_v29 = vld [vmem:[%s8520_s2 + $0xf8] sm:$0xff]  ;;  %v488_v30 = vld [vmem:[%s8520_s2 + $0xe0] sm:$0xff] }
  0x18   : > { %v6626_v48 = vsub.s32 %v1041_v40, %v6606_v37  ;;  %v687_v63 = vunpack.c.l.s8.bf16 %v479_v56  ;;  %v684_v0 = vunpack.c.l.s8.bf16 %v476_v57  ;;  %v686_v1 = vunpack.c.l.s8.bf16 %v478_v58 }
  0x19   : > { %v689_v2 = vunpack.c.h.s8.bf16 %v477_v55  ;;  %v691_v3 = vunpack.c.h.s8.bf16 %v479_v56  ;;  %v688_v8 = vunpack.c.h.s8.bf16 %v476_v57  ;;  %v690_v9 = vunpack.c.h.s8.bf16 %v478_v58  ;;  %v497_v57 = vld [vmem:[%s8520_s2 + $0x128] sm:$0xff]  ;;  %v499_v58 = vld [vmem:[%s8520_s2 + $0x138] sm:$0xff] }
  0x1a   : > { %1128 = vmatpush1.bf16.msra.mxu0 %v660_v18  ;;  %1374 = vmatpush1.bf16.msra.mxu1 %v662_v19  ;;  %v6630_v49 = vrot.slane %v6617_v43, %v6626_v48  ;;  %v693_v10 = vunpack.c.l.s8.bf16 %v481_v4  ;;  %v695_v11 = vunpack.c.l.s8.bf16 %v483_v5  ;;  %v692_v12 = vunpack.c.l.s8.bf16 %v480_v6  ;;  %v484_v18 = vld [vmem:[%s8520_s2 + $0xc0] sm:$0xff]  ;;  %v486_v19 = vld [vmem:[%s8520_s2 + $0xd0] sm:$0xff] }
  0x1b   : > { %1129 = vmatprep.subr.bf16.mxu0 %v665_v20  ;;  %1375 = vmatprep.subr.bf16.mxu1 %v667_v21  ;;  %v694_v13 = vunpack.c.l.s8.bf16 %v482_v7  ;;  %v697_v14 = vunpack.c.h.s8.bf16 %v481_v4  ;;  %v699_v15 = vunpack.c.h.s8.bf16 %v483_v5  ;;  %v696_v20 = vunpack.c.h.s8.bf16 %v480_v6  ;;  %v501_v5 = vld [vmem:[%s8520_s2 + $0x148] sm:$0xff]  ;;  %v503_v6 = vld [vmem:[%s8520_s2 + $0x158] sm:$0xff] }
  0x1c   : > { %v1053_v54 = vcombine.high %v6630_v49, %v6630_v49  ;;  %v698_v21 = vunpack.c.h.s8.bf16 %v482_v7  ;;  %v701_v22 = vunpack.c.l.s8.bf16 %v485_v16  ;;  %v703_v23 = vunpack.c.l.s8.bf16 %v487_v17 }
  0x1d   : > { %v711_v35 = vunpack.c.l.s8.bf16 %v491_v29  ;;  %v708_v36 = vunpack.c.l.s8.bf16 %v488_v30  ;;  %v713_v39 = vunpack.c.h.s8.bf16 %v489_v28  ;;  %v715_v40 = vunpack.c.h.s8.bf16 %v491_v29  ;;  %v509_v29 = vld [vmem:[%s8520_s2 + $0x188] sm:$0xff] }
  0x1e   : > { %1130 = vmatpush1.bf16.msra.mxu0 %v664_v24  ;;  %1376 = vmatpush1.bf16.msra.mxu1 %v666_v25  ;;  %v6647_v59 = vrot.slane %v1053_v54, %v6626_v48  ;;  %v700_v24 = vunpack.c.l.s8.bf16 %v484_v18  ;;  %v702_v25 = vunpack.c.l.s8.bf16 %v486_v19  ;;  %v731_v4 = vunpack.c.h.s8.bf16 %v499_v58 }
  0x1f   : > { %1131 = vmatprep.subr.bf16.mxu0 %v669_v26  ;;  %1377 = vmatprep.subr.bf16.mxu1 %v671_v27  ;;  %v705_v26 = vunpack.c.h.s8.bf16 %v485_v16  ;;  %v707_v27 = vunpack.c.h.s8.bf16 %v487_v17  ;;  %v739_v16 = vunpack.c.h.s8.bf16 %v503_v6  ;;  %v505_v17 = vld [vmem:[%s8520_s2 + $0x168] sm:$0xff]  ;;  %vm1667_vm0 = vcmask 1041408  }
  0x20   : > { %1155 = vmatprep.mubr.bf16.mxu0 %v6647_v59  ;;  %1401 = vmatprep.mubr.bf16.mxu1 %v6647_v59  ;;  %vm6467_vm1 = vmmov 0   ;;  %vm2306_vm2 = vcmask 254976  }
  0x22   : > { %1132 = vmatpush1.bf16.msra.mxu0 %v668_v31  ;;  %1378 = vmatpush1.bf16.msra.mxu1 %v670_v32  ;;  %v490_v31 = vld [vmem:[%s8520_s2 + $0xf0] sm:$0xff]  ;;  %v704_v32 = vunpack.c.h.s8.bf16 %v484_v18  ;;  %v507_v18 = vld [vmem:[%s8520_s2 + $0x178] sm:$0xff] }
  0x23   : > { %1133 = vmatprep.subr.bf16.mxu0 %v673_v33  ;;  %1379 = vmatprep.subr.bf16.mxu1 %v675_v34  ;;  %v706_v33 = vunpack.c.h.s8.bf16 %v486_v19  ;;  %v709_v34 = vunpack.c.l.s8.bf16 %v489_v28  ;;  %v710_v38 = vunpack.c.l.s8.bf16 %v490_v31  ;;  %v747_v28 = vunpack.c.h.s8.bf16 %v507_v18 }
  0x26   : > { %1134 = vmatpush1.bf16.msra.mxu0 %v672_v41  ;;  %1380 = vmatpush1.bf16.msra.mxu1 %v674_v42  ;;  %v493_v41 = vld [vmem:[%s8520_s2 + $0x108] sm:$0xff]  ;;  %v495_v42 = vld [vmem:[%s8520_s2 + $0x118] sm:$0xff] }
  0x27   : > { %1135 = vmatprep.subr.bf16.mxu0 %v677_v44  ;;  %1381 = vmatprep.subr.bf16.mxu1 %v679_v45  ;;  %v712_v44 = vunpack.c.h.s8.bf16 %v488_v30  ;;  %v714_v45 = vunpack.c.h.s8.bf16 %v490_v31  ;;  %v717_v46 = vunpack.c.l.s8.bf16 %v493_v41  ;;  %v719_v47 = vunpack.c.l.s8.bf16 %v495_v42  ;;  %v511_v30 = vld [vmem:[%s8520_s2 + $0x198] sm:$0xff] }
  0x28   : > { %v721_v55 = vunpack.c.h.s8.bf16 %v493_v41  ;;  %v723_v56 = vunpack.c.h.s8.bf16 %v495_v42  ;;  %v755_v41 = vunpack.c.h.s8.bf16 %v511_v30  ;;  %v513_v42 = vld [vmem:[%s8520_s2 + $0x1a8] sm:$0xff] }
  0x2a   : > { %1136 = vmatpush1.bf16.msra.mxu0 %v676_v50  ;;  %1382 = vmatpush1.bf16.msra.mxu1 %v678_v51  ;;  %v492_v50 = vld [vmem:[%s8520_s2 + $0x100] sm:$0xff]  ;;  %v494_v51 = vld [vmem:[%s8520_s2 + $0x110] sm:$0xff] }
  0x2b   : > { %1137 = vmatprep.subr.bf16.mxu0 %v681_v52  ;;  %1383 = vmatprep.subr.bf16.mxu1 %v683_v53  ;;  %v6701_v52 = vrot.slane %v6630_v49, %v6626_v48  ;;  %v716_v53 = vunpack.c.l.s8.bf16 %v492_v50  ;;  %v718_v54 = vunpack.c.l.s8.bf16 %v494_v51  ;;  %v1085_v49 = vcombine.high %v6647_v59, %v6647_v59  ;;  %v498_v59 = vld [vmem:[%s8520_s2 + $0x130] sm:$0xff] }
  0x2e   : > { %1138 = vmatpush1.bf16.msra.mxu0 %v680_v60  ;;  %1384 = vmatpush1.bf16.msra.mxu1 %v682_v61  ;;  %v720_v60 = vunpack.c.h.s8.bf16 %v492_v50  ;;  %v722_v61 = vunpack.c.h.s8.bf16 %v494_v51  ;;  %v512_v51 = vld [vmem:[%s8520_s2 + $0x1a0] sm:$0xff] }
  0x2f   : > { %1139 = vmatprep.subr.bf16.mxu0 %v685_v62  ;;  %1385 = vmatprep.subr.bf16.mxu1 %v687_v63  ;;  %v725_v62 = vunpack.c.l.s8.bf16 %v497_v57  ;;  %v727_v63 = vunpack.c.l.s8.bf16 %v499_v58  ;;  %v517_v58 = vld [vmem:[%s8520_s2 + $0x1c8] sm:$0xff] }
  0x32   : > { %1140 = vmatpush1.bf16.msra.mxu0 %v684_v0  ;;  %1386 = vmatpush1.bf16.msra.mxu1 %v686_v1  ;;  %v496_v0 = vld [vmem:[%s8520_s2 + $0x120] sm:$0xff] }
  0x33   : > { %1141 = vmatprep.subr.bf16.mxu0 %v689_v2  ;;  %1387 = vmatprep.subr.bf16.mxu1 %v691_v3  ;;  %v724_v1 = vunpack.c.l.s8.bf16 %v496_v0  ;;  %v726_v2 = vunpack.c.l.s8.bf16 %v498_v59  ;;  %v729_v3 = vunpack.c.h.s8.bf16 %v497_v57  ;;  %v728_v7 = vunpack.c.h.s8.bf16 %v496_v0  ;;  %v516_v0 = vld [vmem:[%s8520_s2 + $0x1c0] sm:$0xff] }
  0x36   : > { %1142 = vmatpush1.bf16.msra.mxu0 %v688_v8  ;;  %1388 = vmatpush1.bf16.msra.mxu1 %v690_v9  ;;  %v730_v8 = vunpack.c.h.s8.bf16 %v498_v59  ;;  %v733_v9 = vunpack.c.l.s8.bf16 %v501_v5  ;;  %v518_v59 = vld [vmem:[%s8520_s2 + $0x1d0] sm:$0xff] }
  0x37   : > { %1143 = vmatprep.subr.bf16.mxu0 %v693_v10  ;;  %1389 = vmatprep.subr.bf16.mxu1 %v695_v11  ;;  %v735_v10 = vunpack.c.l.s8.bf16 %v503_v6  ;;  %v500_v11 = vld [vmem:[%s8520_s2 + $0x140] sm:$0xff]  ;;  %v523_v6 = vld [vmem:[%s8520_s2 + $0x1f8] sm:$0xff] }
  0x38   : > { %v736_v19 = vunpack.c.h.s8.bf16 %v500_v11 }
  0x3a   : > { %1144 = vmatpush1.bf16.msra.mxu0 %v692_v12  ;;  %1390 = vmatpush1.bf16.msra.mxu1 %v694_v13  ;;  %v502_v12 = vld [vmem:[%s8520_s2 + $0x150] sm:$0xff]  ;;  %v732_v13 = vunpack.c.l.s8.bf16 %v500_v11  ;;  %v520_v11 = vld [vmem:[%s8520_s2 + $0x1e0] sm:$0xff] }
  0x3b   : > { %1145 = vmatprep.subr.bf16.mxu0 %v697_v14  ;;  %1391 = vmatprep.subr.bf16.mxu1 %v699_v15  ;;  %v734_v14 = vunpack.c.l.s8.bf16 %v502_v12  ;;  %v737_v15 = vunpack.c.h.s8.bf16 %v501_v5  ;;  %v521_v5 = vld [vmem:[%s8520_s2 + $0x1e8] sm:$0xff] }
  0x3e   : > { %1146 = vmatpush1.bf16.msra.mxu0 %v696_v20  ;;  %1392 = vmatpush1.bf16.msra.mxu1 %v698_v21  ;;  %v738_v20 = vunpack.c.h.s8.bf16 %v502_v12  ;;  %v741_v21 = vunpack.c.l.s8.bf16 %v505_v17  ;;  %v522_v12 = vld [vmem:[%s8520_s2 + $0x1f0] sm:$0xff] }
  0x3f   : > { %1147 = vmatprep.subr.bf16.mxu0 %v701_v22  ;;  %1393 = vmatprep.subr.bf16.mxu1 %v703_v23  ;;  %v743_v22 = vunpack.c.l.s8.bf16 %v507_v18  ;;  %v504_v23 = vld [vmem:[%s8520_s2 + $0x160] sm:$0xff]  ;;  %v525_v18 = vld [vmem:[%s8520_s2 + $0x208] sm:$0xff] }
  0x40   : > { %v744_v31 = vunpack.c.h.s8.bf16 %v504_v23 }
  0x42   : > { %1148 = vmatpush1.bf16.msra.mxu0 %v700_v24  ;;  %1394 = vmatpush1.bf16.msra.mxu1 %v702_v25  ;;  %v506_v24 = vld [vmem:[%s8520_s2 + $0x170] sm:$0xff]  ;;  %v740_v25 = vunpack.c.l.s8.bf16 %v504_v23 }
  0x43   : > { %1149 = vmatprep.subr.bf16.mxu0 %v705_v26  ;;  %1395 = vmatprep.subr.bf16.mxu1 %v707_v27  ;;  %v742_v26 = vunpack.c.l.s8.bf16 %v506_v24  ;;  %v745_v27 = vunpack.c.h.s8.bf16 %v505_v17  ;;  %v779_v17 = vunpack.c.h.s8.bf16 %v523_v6 }
  0x46   : > { %1150 = vmatpush1.bf16.msra.mxu0 %v704_v32  ;;  %1396 = vmatpush1.bf16.msra.mxu1 %v706_v33  ;;  %v746_v32 = vunpack.c.h.s8.bf16 %v506_v24  ;;  %v749_v33 = vunpack.c.l.s8.bf16 %v509_v29  ;;  %v524_v24 = vld [vmem:[%s8520_s2 + $0x200] sm:$0xff] }
  0x47   : > { %1151 = vmatprep.subr.bf16.mxu0 %v709_v34  ;;  %1397 = vmatprep.subr.bf16.mxu1 %v711_v35  ;;  %v751_v34 = vunpack.c.l.s8.bf16 %v511_v30  ;;  %v508_v35 = vld [vmem:[%s8520_s2 + $0x180] sm:$0xff]  ;;  %v785_v30 = vunpack.c.h.s8.bf16 %v525_v18 }
  0x4a   : > { %1152 = vmatpush1.bf16.msra.mxu0 %v708_v36  ;;  %1398 = vmatpush1.bf16.msra.mxu1 %v710_v38  ;;  %v510_v36 = vld [vmem:[%s8520_s2 + $0x190] sm:$0xff]  ;;  %v748_v38 = vunpack.c.l.s8.bf16 %v508_v35 }
  0x4b   : > { %1153 = vmatprep.subr.bf16.mxu0 %v713_v39  ;;  %1399 = vmatprep.subr.bf16.mxu1 %v715_v40  ;;  %v750_v39 = vunpack.c.l.s8.bf16 %v510_v36  ;;  %v753_v40 = vunpack.c.h.s8.bf16 %v509_v29 }
  0x4e   : > { %1154 = vmatpush1.bf16.msra.mxu0 %v712_v44  ;;  %1400 = vmatpush1.bf16.msra.mxu1 %v714_v45  ;;  %v515_v44 = vld [vmem:[%s8520_s2 + $0x1b8] sm:$0xff]  ;;  %v752_v45 = vunpack.c.h.s8.bf16 %v508_v35 }
  0x4f   : > { %1164 = vmatprep.subr.bf16.mxu0 %v717_v46  ;;  %1410 = vmatprep.subr.bf16.mxu1 %v719_v47  ;;  %v754_v46 = vunpack.c.h.s8.bf16 %v510_v36  ;;  %v757_v47 = vunpack.c.l.s8.bf16 %v513_v42  ;;  %v759_v50 = vunpack.c.l.s8.bf16 %v515_v44  ;;  %v763_v57 = vunpack.c.h.s8.bf16 %v515_v44 }
  0x51   : > { %1156 = vmatmul.mubr.bf16.vlgmr.msra.gmra.mrb[0].mxu0 %v6701_v52  ;;  %1402 = vmatmul.mubr.bf16.vlgmr.msra.gmra.mrb[0].mxu1 %v6701_v52 }
  0x52   : > { %1165 = vmatpush1.bf16.msra.mxu0 %v716_v53  ;;  %1411 = vmatpush1.bf16.msra.mxu1 %v718_v54  ;;  %v514_v53 = vld [vmem:[%s8520_s2 + $0x1b0] sm:$0xff]  ;;  %v756_v54 = vunpack.c.l.s8.bf16 %v512_v51 }
  0x53   : > { %1166 = vmatprep.subr.bf16.mxu0 %v721_v55  ;;  %1412 = vmatprep.subr.bf16.mxu1 %v723_v56  ;;  %v758_v55 = vunpack.c.l.s8.bf16 %v514_v53  ;;  %v761_v56 = vunpack.c.h.s8.bf16 %v513_v42 }
  0x54   : > { %1196 = vmatprep.mubr.bf16.mxu0 %v1085_v49  ;;  %1442 = vmatprep.mubr.bf16.mxu1 %v1085_v49  ;;  %v519_v49 = vld [vmem:[%s8520_s2 + $0x1d8] sm:$0xff] }
  0x56   : > { %1167 = vmatpush1.bf16.msra.mxu0 %v720_v60  ;;  %1413 = vmatpush1.bf16.msra.mxu1 %v722_v61  ;;  %v760_v60 = vunpack.c.h.s8.bf16 %v512_v51  ;;  %v762_v61 = vunpack.c.h.s8.bf16 %v514_v53 }
  0x57   : > { %1168 = vmatprep.subr.bf16.mxu0 %v725_v62  ;;  %1414 = vmatprep.subr.bf16.mxu1 %v727_v63  ;;  %v765_v62 = vunpack.c.l.s8.bf16 %v517_v58  ;;  %v767_v63 = vunpack.c.l.s8.bf16 %v519_v49 }
  0x5a   : > { %1169 = vmatpush1.bf16.msra.mxu0 %v724_v1  ;;  %1415 = vmatpush1.bf16.msra.mxu1 %v726_v2  ;;  %v764_v1 = vunpack.c.l.s8.bf16 %v516_v0  ;;  %v766_v2 = vunpack.c.l.s8.bf16 %v518_v59 }
  0x5b   : > { %1170 = vmatprep.subr.bf16.mxu0 %v729_v3  ;;  %1416 = vmatprep.subr.bf16.mxu1 %v731_v4  ;;  %v769_v3 = vunpack.c.h.s8.bf16 %v517_v58  ;;  %v771_v4 = vunpack.c.h.s8.bf16 %v519_v49 }
  0x5e   : > { %1171 = vmatpush1.bf16.msra.mxu0 %v728_v7  ;;  %1417 = vmatpush1.bf16.msra.mxu1 %v730_v8  ;;  %v768_v7 = vunpack.c.h.s8.bf16 %v516_v0  ;;  %v770_v8 = vunpack.c.h.s8.bf16 %v518_v59 }
  0x5f   : > { %1172 = vmatprep.subr.bf16.mxu0 %v733_v9  ;;  %1418 = vmatprep.subr.bf16.mxu1 %v735_v10  ;;  %v773_v9 = vunpack.c.l.s8.bf16 %v521_v5  ;;  %v775_v10 = vunpack.c.l.s8.bf16 %v523_v6 }
  0x62   : > { %1173 = vmatpush1.bf16.msra.mxu0 %v732_v13  ;;  %1419 = vmatpush1.bf16.msra.mxu1 %v734_v14  ;;  %v1038_v13 = vcombine.high %v6617_v43, %v6617_v43  ;;  %v772_v14 = vunpack.c.l.s8.bf16 %v520_v11  ;;  %v776_v43 = vunpack.c.h.s8.bf16 %v520_v11 }
  0x63   : > { %1174 = vmatprep.subr.bf16.mxu0 %v737_v15  ;;  %1420 = vmatprep.subr.bf16.mxu1 %v739_v16  ;;  %v774_v15 = vunpack.c.l.s8.bf16 %v522_v12  ;;  %v777_v16 = vunpack.c.h.s8.bf16 %v521_v5 }
  0x66   : > { %1175 = vmatpush1.bf16.msra.mxu0 %v736_v19  ;;  %1421 = vmatpush1.bf16.msra.mxu1 %v738_v20  ;;  %v527_v19 = vld [vmem:[%s8520_s2 + $0x218] sm:$0xff]  ;;  %v6800_v20 = vrot.slane %v1038_v13, %v6626_v48 }
  0x67   : > { %1176 = vmatprep.subr.bf16.mxu0 %v741_v21  ;;  %1422 = vmatprep.subr.bf16.mxu1 %v743_v22  ;;  %v778_v21 = vunpack.c.h.s8.bf16 %v522_v12  ;;  %v781_v22 = vunpack.c.l.s8.bf16 %v525_v18  ;;  %v783_v23 = vunpack.c.l.s8.bf16 %v527_v19 }
  0x6a   : > { %1177 = vmatpush1.bf16.msra.mxu0 %v740_v25  ;;  %1423 = vmatpush1.bf16.msra.mxu1 %v742_v26  ;;  %v526_v25 = vld [vmem:[%s8520_s2 + $0x210] sm:$0xff]  ;;  %v1054_v26 = vcombine.high %v6800_v20, %v6800_v20 }
  0x6b   : > { %1178 = vmatprep.subr.bf16.mxu0 %v745_v27  ;;  %1424 = vmatprep.subr.bf16.mxu1 %v747_v28  ;;  %v1083_v27 = vcombine.high %v6701_v52, %v6701_v52  ;;  %v780_v28 = vunpack.c.l.s8.bf16 %v524_v24  ;;  %v782_v29 = vunpack.c.l.s8.bf16 %v526_v25  ;;  %v784_v52 = vunpack.c.h.s8.bf16 %v524_v24 }
  0x6c   : > { %v786_v35 = vunpack.c.h.s8.bf16 %v526_v25 }
  0x6e   : > { %1179 = vmatpush1.bf16.msra.mxu0 %v744_v31  ;;  %1425 = vmatpush1.bf16.msra.mxu1 %v746_v32  ;;  %v787_v31 = vunpack.c.h.s8.bf16 %v527_v19  ;;  %v529_v32 = vld [vmem:[%s8520_s2 + $0x228] sm:$0xff] }
  0x6f   : > { %1180 = vmatprep.subr.bf16.mxu0 %v749_v33  ;;  %1426 = vmatprep.subr.bf16.mxu1 %v751_v34  ;;  %v531_v33 = vld [vmem:[%s8520_s2 + $0x238] sm:$0xff]  ;;  %v6819_v34 = vrot.slane %v1054_v26, %v6626_v48  ;;  %v789_v36 = vunpack.c.l.s8.bf16 %v529_v32  ;;  %v793_v44 = vunpack.c.h.s8.bf16 %v529_v32  ;;  %v544_v26 = vld [vmem:[%s8520_s2 + $0x2a0] sm:$0xff]  ;;  %v549_v32 = vld [vmem:[%s8520_s2 + $0x2c8] sm:$0xff] }
  0x72   : > { %1181 = vmatpush1.bf16.msra.mxu0 %v748_v38  ;;  %1427 = vmatpush1.bf16.msra.mxu1 %v750_v39  ;;  %v791_v38 = vunpack.c.l.s8.bf16 %v531_v33  ;;  %v528_v39 = vld [vmem:[%s8520_s2 + $0x220] sm:$0xff] }
  0x73   : > { %1182 = vmatprep.subr.bf16.mxu0 %v753_v40  ;;  %1428 = vmatprep.subr.bf16.mxu1 %v755_v41  ;;  %v530_v40 = vld [vmem:[%s8520_s2 + $0x230] sm:$0xff]  ;;  %v788_v41 = vunpack.c.l.s8.bf16 %v528_v39 }
  0x74   : > { %v790_v42 = vunpack.c.l.s8.bf16 %v530_v40  ;;  %v794_v51 = vunpack.c.h.s8.bf16 %v530_v40  ;;  %v550_v40 = vld [vmem:[%s8520_s2 + $0x2d0] sm:$0xff] }
  0x76   : > { %1183 = vmatpush1.bf16.msra.mxu0 %v752_v45  ;;  %1429 = vmatpush1.bf16.msra.mxu1 %v754_v46  ;;  %v795_v45 = vunpack.c.h.s8.bf16 %v531_v33  ;;  %v533_v46 = vld [vmem:[%s8520_s2 + $0x248] sm:$0xff]  ;;  %v551_v33 = vld [vmem:[%s8520_s2 + $0x2d8] sm:$0xff] }
  0x77   : > { %1184 = vmatprep.subr.bf16.mxu0 %v757_v47  ;;  %1430 = vmatprep.subr.bf16.mxu1 %v759_v50  ;;  %v535_v47 = vld [vmem:[%s8520_s2 + $0x258] sm:$0xff]  ;;  %v792_v50 = vunpack.c.h.s8.bf16 %v528_v39  ;;  %v797_v53 = vunpack.c.l.s8.bf16 %v533_v46  ;;  %v801_v49 = vunpack.c.h.s8.bf16 %v533_v46  ;;  %v548_v39 = vld [vmem:[%s8520_s2 + $0x2c0] sm:$0xff]  ;;  %v553_v46 = vld [vmem:[%s8520_s2 + $0x2e8] sm:$0xff] }
  0x7a   : > { %1185 = vmatpush1.bf16.msra.mxu0 %v756_v54  ;;  %1431 = vmatpush1.bf16.msra.mxu1 %v758_v55  ;;  %v799_v54 = vunpack.c.l.s8.bf16 %v535_v47  ;;  %v532_v55 = vld [vmem:[%s8520_s2 + $0x240] sm:$0xff] }
  0x7b   : > { %1186 = vmatprep.subr.bf16.mxu0 %v761_v56  ;;  %1432 = vmatprep.subr.bf16.mxu1 %v763_v57  ;;  %v534_v56 = vld [vmem:[%s8520_s2 + $0x250] sm:$0xff]  ;;  %v796_v57 = vunpack.c.l.s8.bf16 %v532_v55 }
  0x7c   : > { %v798_v58 = vunpack.c.l.s8.bf16 %v534_v56  ;;  %v802_v0 = vunpack.c.h.s8.bf16 %v534_v56  ;;  %v554_v56 = vld [vmem:[%s8520_s2 + $0x2f0] sm:$0xff] }
  0x7e   : > { %1187 = vmatpush1.bf16.msra.mxu0 %v760_v60  ;;  %1433 = vmatpush1.bf16.msra.mxu1 %v762_v61  ;;  %v803_v60 = vunpack.c.h.s8.bf16 %v535_v47  ;;  %v537_v61 = vld [vmem:[%s8520_s2 + $0x268] sm:$0xff]  ;;  %v555_v47 = vld [vmem:[%s8520_s2 + $0x2f8] sm:$0xff] }
  0x7f   : > { %1188 = vmatprep.subr.bf16.mxu0 %v765_v62  ;;  %1434 = vmatprep.subr.bf16.mxu1 %v767_v63  ;;  %v539_v62 = vld [vmem:[%s8520_s2 + $0x278] sm:$0xff]  ;;  %v800_v63 = vunpack.c.h.s8.bf16 %v532_v55  ;;  %v805_v59 = vunpack.c.l.s8.bf16 %v537_v61  ;;  %v809_v6 = vunpack.c.h.s8.bf16 %v537_v61  ;;  %v552_v55 = vld [vmem:[%s8520_s2 + $0x2e0] sm:$0xff]  ;;  %v557_v61 = vld [vmem:[%s8520_s2 + $0x308] sm:$0xff] }
  0x82   : > { %1189 = vmatpush1.bf16.msra.mxu0 %v764_v1  ;;  %1435 = vmatpush1.bf16.msra.mxu1 %v766_v2  ;;  %v807_v1 = vunpack.c.l.s8.bf16 %v539_v62  ;;  %v536_v2 = vld [vmem:[%s8520_s2 + $0x260] sm:$0xff] }
  0x83   : > { %1190 = vmatprep.subr.bf16.mxu0 %v769_v3  ;;  %1436 = vmatprep.subr.bf16.mxu1 %v771_v4  ;;  %v538_v3 = vld [vmem:[%s8520_s2 + $0x270] sm:$0xff]  ;;  %v804_v4 = vunpack.c.l.s8.bf16 %v536_v2 }
  0x84   : > { %v806_v5 = vunpack.c.l.s8.bf16 %v538_v3  ;;  %v810_v11 = vunpack.c.h.s8.bf16 %v538_v3  ;;  %v558_v3 = vld [vmem:[%s8520_s2 + $0x310] sm:$0xff] }
  0x86   : > { %1191 = vmatpush1.bf16.msra.mxu0 %v768_v7  ;;  %1437 = vmatpush1.bf16.msra.mxu1 %v770_v8  ;;  %v811_v7 = vunpack.c.h.s8.bf16 %v539_v62  ;;  %v541_v8 = vld [vmem:[%s8520_s2 + $0x288] sm:$0xff]  ;;  %v559_v62 = vld [vmem:[%s8520_s2 + $0x318] sm:$0xff] }
  0x87   : > { %1192 = vmatprep.subr.bf16.mxu0 %v773_v9  ;;  %1438 = vmatprep.subr.bf16.mxu1 %v775_v10  ;;  %v543_v9 = vld [vmem:[%s8520_s2 + $0x298] sm:$0xff]  ;;  %v808_v10 = vunpack.c.h.s8.bf16 %v536_v2  ;;  %v813_v12 = vunpack.c.l.s8.bf16 %v541_v8  ;;  %v817_v18 = vunpack.c.h.s8.bf16 %v541_v8  ;;  %v556_v2 = vld [vmem:[%s8520_s2 + $0x300] sm:$0xff]  ;;  %v851_v8 = vunpack.c.h.s8.bf16 %v559_v62 }
  0x88   : > { %v815_v13 = vunpack.c.l.s8.bf16 %v543_v9  ;;  %v819_v19 = vunpack.c.h.s8.bf16 %v543_v9  ;;  %v561_v9 = vld [vmem:[%s8520_s2 + $0x328] sm:$0xff] }
  0x8a   : > { %1193 = vmatpush1.bf16.msra.mxu0 %v772_v14  ;;  %1439 = vmatpush1.bf16.msra.mxu1 %v774_v15  ;;  %v540_v14 = vld [vmem:[%s8520_s2 + $0x280] sm:$0xff]  ;;  %v542_v15 = vld [vmem:[%s8520_s2 + $0x290] sm:$0xff] }
  0x8b   : > { %1194 = vmatprep.subr.bf16.mxu0 %v777_v16  ;;  %1440 = vmatprep.subr.bf16.mxu1 %v779_v17  ;;  %v812_v16 = vunpack.c.l.s8.bf16 %v540_v14  ;;  %v814_v17 = vunpack.c.l.s8.bf16 %v542_v15 }
  0x8e   : > { %1195 = vmatpush1.bf16.msra.mxu0 %v776_v43  ;;  %1441 = vmatpush1.bf16.msra.mxu1 %v778_v21  ;;  %v545_v43 = vld [vmem:[%s8520_s2 + $0x2a8] sm:$0xff]  ;;  %v547_v21 = vld [vmem:[%s8520_s2 + $0x2b8] sm:$0xff] }
  0x8f   : > { %1205 = vmatprep.subr.bf16.mxu0 %v781_v22  ;;  %1451 = vmatprep.subr.bf16.mxu1 %v783_v23  ;;  %v816_v22 = vunpack.c.h.s8.bf16 %v540_v14  ;;  %v818_v23 = vunpack.c.h.s8.bf16 %v542_v15  ;;  %v821_v24 = vunpack.c.l.s8.bf16 %v545_v43  ;;  %v823_v25 = vunpack.c.l.s8.bf16 %v547_v21  ;;  %v560_v15 = vld [vmem:[%s8520_s2 + $0x320] sm:$0xff] }
  0x91   : > { %1197 = vmatmul.mubr.bf16.vlgmr.msra.gmra.mrb[0].mxu0 %v1083_v27  ;;  %1443 = vmatmul.mubr.bf16.vlgmr.msra.gmra.mrb[0].mxu1 %v1083_v27  ;;  %v546_v27 = vld [vmem:[%s8520_s2 + $0x2b0] sm:$0xff] }
  0x92   : > { %1206 = vmatpush1.bf16.msra.mxu0 %v780_v28  ;;  %1452 = vmatpush1.bf16.msra.mxu1 %v782_v29  ;;  %v820_v28 = vunpack.c.l.s8.bf16 %v544_v26  ;;  %v822_v29 = vunpack.c.l.s8.bf16 %v546_v27 }
  0x93   : > { %1207 = vmatprep.subr.bf16.mxu0 %v785_v30  ;;  %1453 = vmatprep.subr.bf16.mxu1 %v787_v31  ;;  %v825_v30 = vunpack.c.h.s8.bf16 %v545_v43  ;;  %v827_v31 = vunpack.c.h.s8.bf16 %v547_v21  ;;  %v565_v43 = vld [vmem:[%s8520_s2 + $0x348] sm:$0xff]  ;;  %v567_v21 = vld [vmem:[%s8520_s2 + $0x358] sm:$0xff] }
  0x94   : > { %1237 = vmatprep.mubr.bf16.mxu0 %v6819_v34  ;;  %1483 = vmatprep.mubr.bf16.mxu1 %v6819_v34 }
  0x96   : > { %1208 = vmatpush1.bf16.msra.mxu0 %v784_v52  ;;  %1454 = vmatpush1.bf16.msra.mxu1 %v786_v35  ;;  %v824_v52 = vunpack.c.h.s8.bf16 %v544_v26  ;;  %v826_v35 = vunpack.c.h.s8.bf16 %v546_v27  ;;  %v564_v26 = vld [vmem:[%s8520_s2 + $0x340] sm:$0xff]  ;;  %v566_v27 = vld [vmem:[%s8520_s2 + $0x350] sm:$0xff] }
  0x97   : > { %1209 = vmatprep.subr.bf16.mxu0 %v789_v36  ;;  %1455 = vmatprep.subr.bf16.mxu1 %v791_v38  ;;  %v829_v36 = vunpack.c.l.s8.bf16 %v549_v32  ;;  %v831_v38 = vunpack.c.l.s8.bf16 %v551_v33 }
  0x9a   : > { %1210 = vmatpush1.bf16.msra.mxu0 %v788_v41  ;;  %1456 = vmatpush1.bf16.msra.mxu1 %v790_v42  ;;  %v828_v41 = vunpack.c.l.s8.bf16 %v548_v39  ;;  %v830_v42 = vunpack.c.l.s8.bf16 %v550_v40 }
  0x9b   : > { %1211 = vmatprep.subr.bf16.mxu0 %v793_v44  ;;  %1457 = vmatprep.subr.bf16.mxu1 %v795_v45  ;;  %v833_v44 = vunpack.c.h.s8.bf16 %v549_v32  ;;  %v835_v45 = vunpack.c.h.s8.bf16 %v551_v33  ;;  %v569_v32 = vld [vmem:[%s8520_s2 + $0x368] sm:$0xff]  ;;  %v571_v33 = vld [vmem:[%s8520_s2 + $0x378] sm:$0xff] }
  0x9e   : > { %1212 = vmatpush1.bf16.msra.mxu0 %v792_v50  ;;  %1458 = vmatpush1.bf16.msra.mxu1 %v794_v51  ;;  %v832_v50 = vunpack.c.h.s8.bf16 %v548_v39  ;;  %v834_v51 = vunpack.c.h.s8.bf16 %v550_v40  ;;  %v568_v39 = vld [vmem:[%s8520_s2 + $0x360] sm:$0xff]  ;;  %v570_v40 = vld [vmem:[%s8520_s2 + $0x370] sm:$0xff] }
  0x9f   : > { %1213 = vmatprep.subr.bf16.mxu0 %v797_v53  ;;  %1459 = vmatprep.subr.bf16.mxu1 %v799_v54  ;;  %v837_v53 = vunpack.c.l.s8.bf16 %v553_v46  ;;  %v839_v54 = vunpack.c.l.s8.bf16 %v555_v47 }
  0xa2   : > { %1214 = vmatpush1.bf16.msra.mxu0 %v796_v57  ;;  %1460 = vmatpush1.bf16.msra.mxu1 %v798_v58  ;;  %v836_v57 = vunpack.c.l.s8.bf16 %v552_v55  ;;  %v838_v58 = vunpack.c.l.s8.bf16 %v554_v56 }
  0xa3   : > { %1215 = vmatprep.subr.bf16.mxu0 %v801_v49  ;;  %1461 = vmatprep.subr.bf16.mxu1 %v803_v60  ;;  %v841_v49 = vunpack.c.h.s8.bf16 %v553_v46  ;;  %v843_v60 = vunpack.c.h.s8.bf16 %v555_v47  ;;  %v573_v46 = vld [vmem:[%s8520_s2 + $0x388] sm:$0xff]  ;;  %v575_v47 = vld [vmem:[%s8520_s2 + $0x398] sm:$0xff] }
  0xa6   : > { %1216 = vmatpush1.bf16.msra.mxu0 %v800_v63  ;;  %1462 = vmatpush1.bf16.msra.mxu1 %v802_v0  ;;  %v840_v63 = vunpack.c.h.s8.bf16 %v552_v55  ;;  %v842_v0 = vunpack.c.h.s8.bf16 %v554_v56  ;;  %v572_v55 = vld [vmem:[%s8520_s2 + $0x380] sm:$0xff]  ;;  %v574_v56 = vld [vmem:[%s8520_s2 + $0x390] sm:$0xff] }
  0xa7   : > { %1217 = vmatprep.subr.bf16.mxu0 %v805_v59  ;;  %1463 = vmatprep.subr.bf16.mxu1 %v807_v1  ;;  %v845_v59 = vunpack.c.l.s8.bf16 %v557_v61  ;;  %v847_v1 = vunpack.c.l.s8.bf16 %v559_v62  ;;  %v579_v62 = vld [vmem:[%s8520_s2 + $0x3b8] sm:$0xff] }
  0xaa   : > { %1218 = vmatpush1.bf16.msra.mxu0 %v804_v4  ;;  %1464 = vmatpush1.bf16.msra.mxu1 %v806_v5  ;;  %v6915_v4 = vrot.slane %v6800_v20, %v6626_v48  ;;  %v844_v5 = vunpack.c.l.s8.bf16 %v556_v2  ;;  %v1086_v20 = vcombine.high %v6819_v34, %v6819_v34  ;;  %v562_v34 = vld [vmem:[%s8520_s2 + $0x330] sm:$0xff] }
  0xab   : > { %1219 = vmatprep.subr.bf16.mxu0 %v809_v6  ;;  %1465 = vmatprep.subr.bf16.mxu1 %v811_v7  ;;  %v846_v6 = vunpack.c.l.s8.bf16 %v558_v3  ;;  %v849_v7 = vunpack.c.h.s8.bf16 %v557_v61  ;;  %v577_v61 = vld [vmem:[%s8520_s2 + $0x3a8] sm:$0xff] }
  0xae   : > { %1220 = vmatpush1.bf16.msra.mxu0 %v808_v10  ;;  %1466 = vmatpush1.bf16.msra.mxu1 %v810_v11  ;;  %v563_v10 = vld [vmem:[%s8520_s2 + $0x338] sm:$0xff]  ;;  %v848_v11 = vunpack.c.h.s8.bf16 %v556_v2  ;;  %v576_v2 = vld [vmem:[%s8520_s2 + $0x3a0] sm:$0xff] }
  0xaf   : > { %1221 = vmatprep.subr.bf16.mxu0 %v813_v12  ;;  %1467 = vmatprep.subr.bf16.mxu1 %v815_v13  ;;  %v850_v12 = vunpack.c.h.s8.bf16 %v558_v3  ;;  %v853_v13 = vunpack.c.l.s8.bf16 %v561_v9  ;;  %v855_v14 = vunpack.c.l.s8.bf16 %v563_v10  ;;  %v578_v3 = vld [vmem:[%s8520_s2 + $0x3b0] sm:$0xff] }
  0xb2   : > { %1222 = vmatpush1.bf16.msra.mxu0 %v812_v16  ;;  %1468 = vmatpush1.bf16.msra.mxu1 %v814_v17  ;;  %v852_v16 = vunpack.c.l.s8.bf16 %v560_v15  ;;  %v854_v17 = vunpack.c.l.s8.bf16 %v562_v34 }
  0xb3   : > { %1223 = vmatprep.subr.bf16.mxu0 %v817_v18  ;;  %1469 = vmatprep.subr.bf16.mxu1 %v819_v19  ;;  %v857_v18 = vunpack.c.h.s8.bf16 %v561_v9  ;;  %v859_v19 = vunpack.c.h.s8.bf16 %v563_v10  ;;  %v581_v9 = vld [vmem:[%s8520_s2 + $0x3c8] sm:$0xff]  ;;  %v583_v10 = vld [vmem:[%s8520_s2 + $0x3d8] sm:$0xff] }
  0xb6   : > { %1224 = vmatpush1.bf16.msra.mxu0 %v816_v22  ;;  %1470 = vmatpush1.bf16.msra.mxu1 %v818_v23  ;;  %v856_v22 = vunpack.c.h.s8.bf16 %v560_v15  ;;  %v858_v23 = vunpack.c.h.s8.bf16 %v562_v34  ;;  %v582_v15 = vld [vmem:[%s8520_s2 + $0x3d0] sm:$0xff] }
  0xb7   : > { %1225 = vmatprep.subr.bf16.mxu0 %v821_v24  ;;  %1471 = vmatprep.subr.bf16.mxu1 %v823_v25  ;;  %v861_v24 = vunpack.c.l.s8.bf16 %v565_v43  ;;  %v863_v25 = vunpack.c.l.s8.bf16 %v567_v21 }
  0xba   : > { %1226 = vmatpush1.bf16.msra.mxu0 %v820_v28  ;;  %1472 = vmatpush1.bf16.msra.mxu1 %v822_v29  ;;  %v860_v28 = vunpack.c.l.s8.bf16 %v564_v26  ;;  %v862_v29 = vunpack.c.l.s8.bf16 %v566_v27 }
  0xbb   : > { %1227 = vmatprep.subr.bf16.mxu0 %v825_v30  ;;  %1473 = vmatprep.subr.bf16.mxu1 %v827_v31  ;;  %v865_v30 = vunpack.c.h.s8.bf16 %v565_v43  ;;  %v867_v31 = vunpack.c.h.s8.bf16 %v567_v21  ;;  %v587_v43 = vld [vmem:[%s8520_s2 + $0x3f8] sm:$0xff] }
  0xbe   : > { %1228 = vmatpush1.bf16.msra.mxu0 %v824_v52  ;;  %1474 = vmatpush1.bf16.msra.mxu1 %v826_v35  ;;  %v864_v52 = vunpack.c.h.s8.bf16 %v564_v26  ;;  %v866_v35 = vunpack.c.h.s8.bf16 %v566_v27  ;;  %v586_v26 = vld [vmem:[%s8520_s2 + $0x3f0] sm:$0xff] }
  0xbf   : > { %1229 = vmatprep.subr.bf16.mxu0 %v829_v36  ;;  %1475 = vmatprep.subr.bf16.mxu1 %v831_v38  ;;  %v869_v36 = vunpack.c.l.s8.bf16 %v569_v32  ;;  %v871_v38 = vunpack.c.l.s8.bf16 %v571_v33 }
  0xc2   : > { %1230 = vmatpush1.bf16.msra.mxu0 %v828_v41  ;;  %1476 = vmatpush1.bf16.msra.mxu1 %v830_v42  ;;  %v868_v41 = vunpack.c.l.s8.bf16 %v568_v39  ;;  %v870_v42 = vunpack.c.l.s8.bf16 %v570_v40 }
  0xc3   : > { %1231 = vmatprep.subr.bf16.mxu0 %v833_v44  ;;  %1477 = vmatprep.subr.bf16.mxu1 %v835_v45  ;;  %v873_v44 = vunpack.c.h.s8.bf16 %v569_v32  ;;  %v875_v45 = vunpack.c.h.s8.bf16 %v571_v33  ;;  %v591_v32 = vld [vmem:[%s8520_s2 + $0x418] sm:$0xff]  ;;  %v7014_v33 = vld.sshfl [vmem:[%s8518_s0 + $0x8] sm:$0x33 pattern:$0x75316420] }
  0xc6   : > { %1232 = vmatpush1.bf16.msra.mxu0 %v832_v50  ;;  %1478 = vmatpush1.bf16.msra.mxu1 %v834_v51  ;;  %v872_v50 = vunpack.c.h.s8.bf16 %v568_v39  ;;  %v874_v51 = vunpack.c.h.s8.bf16 %v570_v40  ;;  %v588_v39 = vld [vmem:[%s8520_s2 + $0x400] sm:$0xff]  ;;  %v590_v40 = vld [vmem:[%s8520_s2 + $0x410] sm:$0xff] }
  0xc7   : > { %1233 = vmatprep.subr.bf16.mxu0 %v837_v53  ;;  %1479 = vmatprep.subr.bf16.mxu1 %v839_v54  ;;  %v877_v53 = vunpack.c.l.s8.bf16 %v573_v46  ;;  %v879_v54 = vunpack.c.l.s8.bf16 %v575_v47 }
  0xca   : > { %1234 = vmatpush1.bf16.msra.mxu0 %v836_v57  ;;  %1480 = vmatpush1.bf16.msra.mxu1 %v838_v58  ;;  %v876_v57 = vunpack.c.l.s8.bf16 %v572_v55  ;;  %v878_v58 = vunpack.c.l.s8.bf16 %v574_v56 }
  0xcb   : > { %1235 = vmatprep.subr.bf16.mxu0 %v841_v49  ;;  %1481 = vmatprep.subr.bf16.mxu1 %v843_v60  ;;  %v881_v49 = vunpack.c.h.s8.bf16 %v573_v46  ;;  %v883_v60 = vunpack.c.h.s8.bf16 %v575_v47  ;;  %v915_v47 = vunpack.c.h.s8.bf16 %v591_v32 }
  0xce   : > { %1236 = vmatpush1.bf16.msra.mxu0 %v840_v63  ;;  %1482 = vmatpush1.bf16.msra.mxu1 %v842_v0  ;;  %v880_v63 = vunpack.c.h.s8.bf16 %v572_v55  ;;  %v882_v0 = vunpack.c.h.s8.bf16 %v574_v56 }
  0xcf   : > { %1246 = vmatprep.subr.bf16.mxu0 %v845_v59  ;;  %1492 = vmatprep.subr.bf16.mxu1 %v847_v1  ;;  %v885_v59 = vunpack.c.l.s8.bf16 %v577_v61  ;;  %v887_v1 = vunpack.c.l.s8.bf16 %v579_v62 }
  0xd1   : > { %1238 = vmatmul.mubr.bf16.vlgmr.msra.gmra.mrb[0].mxu0 %v6915_v4  ;;  %1484 = vmatmul.mubr.bf16.vlgmr.msra.gmra.mrb[0].mxu1 %v6915_v4 }
  0xd2   : > { %1247 = vmatpush1.bf16.msra.mxu0 %v844_v5  ;;  %1493 = vmatpush1.bf16.msra.mxu1 %v846_v6  ;;  %v884_v5 = vunpack.c.l.s8.bf16 %v576_v2  ;;  %v886_v6 = vunpack.c.l.s8.bf16 %v578_v3 }
  0xd3   : > { %1248 = vmatprep.subr.bf16.mxu0 %v849_v7  ;;  %1494 = vmatprep.subr.bf16.mxu1 %v851_v8  ;;  %v889_v7 = vunpack.c.h.s8.bf16 %v577_v61  ;;  %v891_v8 = vunpack.c.h.s8.bf16 %v579_v62 }
  0xd4   : > { %1278 = vmatprep.mubr.bf16.mxu0 %v1086_v20  ;;  %1524 = vmatprep.mubr.bf16.mxu1 %v1086_v20  ;;  %v888_v20 = vunpack.c.h.s8.bf16 %v576_v2 }
  0xd6   : > { %1249 = vmatpush1.bf16.msra.mxu0 %v848_v11  ;;  %1495 = vmatpush1.bf16.msra.mxu1 %v850_v12  ;;  %v890_v11 = vunpack.c.h.s8.bf16 %v578_v3  ;;  %v893_v12 = vunpack.c.l.s8.bf16 %v581_v9 }
  0xd7   : > { %1250 = vmatprep.subr.bf16.mxu0 %v853_v13  ;;  %1496 = vmatprep.subr.bf16.mxu1 %v855_v14  ;;  %v895_v13 = vunpack.c.l.s8.bf16 %v583_v10  ;;  %v580_v14 = vld [vmem:[%s8520_s2 + $0x3c0] sm:$0xff] }
  0xd8   : > { %v892_v34 = vunpack.c.l.s8.bf16 %v580_v14  ;;  %v896_v21 = vunpack.c.h.s8.bf16 %v580_v14 }
  0xda   : > { %1251 = vmatpush1.bf16.msra.mxu0 %v852_v16  ;;  %1497 = vmatpush1.bf16.msra.mxu1 %v854_v17  ;;  %v894_v16 = vunpack.c.l.s8.bf16 %v582_v15  ;;  %v897_v17 = vunpack.c.h.s8.bf16 %v581_v9 }
  0xdb   : > { %1252 = vmatprep.subr.bf16.mxu0 %v857_v18  ;;  %1498 = vmatprep.subr.bf16.mxu1 %v859_v19  ;;  %v899_v18 = vunpack.c.h.s8.bf16 %v583_v10  ;;  %v585_v19 = vld [vmem:[%s8520_s2 + $0x3e8] sm:$0xff] }
  0xde   : > { %1253 = vmatpush1.bf16.msra.mxu0 %v856_v22  ;;  %1499 = vmatpush1.bf16.msra.mxu1 %v858_v23  ;;  %v898_v22 = vunpack.c.h.s8.bf16 %v582_v15  ;;  %v901_v23 = vunpack.c.l.s8.bf16 %v585_v19 }
  0xdf   : > { %1254 = vmatprep.subr.bf16.mxu0 %v861_v24  ;;  %1500 = vmatprep.subr.bf16.mxu1 %v863_v25  ;;  %v903_v24 = vunpack.c.l.s8.bf16 %v587_v43  ;;  %v584_v25 = vld [vmem:[%s8520_s2 + $0x3e0] sm:$0xff] }
  0xe0   : > { %v900_v27 = vunpack.c.l.s8.bf16 %v584_v25 }
  0xe2   : > { %1255 = vmatpush1.bf16.msra.mxu0 %v860_v28  ;;  %1501 = vmatpush1.bf16.msra.mxu1 %v862_v29  ;;  %v902_v28 = vunpack.c.l.s8.bf16 %v586_v26  ;;  %v905_v29 = vunpack.c.h.s8.bf16 %v585_v19 }
  0xe3   : > { %1256 = vmatprep.subr.bf16.mxu0 %v865_v30  ;;  %1502 = vmatprep.subr.bf16.mxu1 %v867_v31  ;;  %v907_v30 = vunpack.c.h.s8.bf16 %v587_v43  ;;  %v589_v31 = vld [vmem:[%s8520_s2 + $0x408] sm:$0xff] }
  0xe4   : > { %v913_v46 = vunpack.c.h.s8.bf16 %v589_v31 }
  0xe6   : > { %1257 = vmatpush1.bf16.msra.mxu0 %v864_v52  ;;  %1503 = vmatpush1.bf16.msra.mxu1 %v866_v35  ;;  %v904_v52 = vunpack.c.h.s8.bf16 %v584_v25  ;;  %v906_v35 = vunpack.c.h.s8.bf16 %v586_v26 }
  0xe7   : > { %1258 = vmatprep.subr.bf16.mxu0 %v869_v36  ;;  %1504 = vmatprep.subr.bf16.mxu1 %v871_v38  ;;  %v909_v36 = vunpack.c.l.s8.bf16 %v589_v31  ;;  %v911_v38 = vunpack.c.l.s8.bf16 %v591_v32 }
  0xea   : > { %1259 = vmatpush1.bf16.msra.mxu0 %v868_v41  ;;  %1505 = vmatpush1.bf16.msra.mxu1 %v870_v42  ;;  %v1094_v41 = vcombine.high %v7014_v33, %v7014_v33  ;;  %v1084_v42 = vcombine.high %v6915_v4, %v6915_v4  ;;  %v912_v4 = vunpack.c.h.s8.bf16 %v588_v39 }
  0xeb   : > { %1260 = vmatprep.subr.bf16.mxu0 %v873_v44  ;;  %1506 = vmatprep.subr.bf16.mxu1 %v875_v45  ;;  %v908_v44 = vunpack.c.l.s8.bf16 %v588_v39  ;;  %v910_v45 = vunpack.c.l.s8.bf16 %v590_v40 }
  0xee   : > { %1261 = vmatpush1.bf16.msra.mxu0 %v872_v50  ;;  %1507 = vmatpush1.bf16.msra.mxu1 %v874_v51  ;;  %v593_v50 = vld [vmem:[%s8520_s2 + $0x428] sm:$0xff]  ;;  %v595_v51 = vld [vmem:[%s8520_s2 + $0x438] sm:$0xff] }
  0xef   : > { %1262 = vmatprep.subr.bf16.mxu0 %v877_v53  ;;  %1508 = vmatprep.subr.bf16.mxu1 %v879_v54  ;;  %v7033_v53 = vrot.slane %v1094_v41, %v6626_v48  ;;  %v914_v54 = vunpack.c.h.s8.bf16 %v590_v40  ;;  %v917_v55 = vunpack.c.l.s8.bf16 %v593_v50  ;;  %v919_v56 = vunpack.c.l.s8.bf16 %v595_v51  ;;  %v608_v41 = vld [vmem:[%s8520_s2 + $0x4a0] sm:$0xff] }
  0xf0   : > { %v921_v61 = vunpack.c.h.s8.bf16 %v593_v50  ;;  %v923_v62 = vunpack.c.h.s8.bf16 %v595_v51  ;;  %v613_v50 = vld [vmem:[%s8520_s2 + $0x4c8] sm:$0xff]  ;;  %v615_v51 = vld [vmem:[%s8520_s2 + $0x4d8] sm:$0xff] }
  0xf2   : > { %1263 = vmatpush1.bf16.msra.mxu0 %v876_v57  ;;  %1509 = vmatpush1.bf16.msra.mxu1 %v878_v58  ;;  %v592_v57 = vld [vmem:[%s8520_s2 + $0x420] sm:$0xff]  ;;  %v594_v58 = vld [vmem:[%s8520_s2 + $0x430] sm:$0xff] }
  0xf3   : > { %1264 = vmatprep.subr.bf16.mxu0 %v881_v49  ;;  %1510 = vmatprep.subr.bf16.mxu1 %v883_v60  ;;  %v916_v49 = vunpack.c.l.s8.bf16 %v592_v57  ;;  %v918_v60 = vunpack.c.l.s8.bf16 %v594_v58 }
  0xf6   : > { %1265 = vmatpush1.bf16.msra.mxu0 %v880_v63  ;;  %1511 = vmatpush1.bf16.msra.mxu1 %v882_v0  ;;  %v597_v63 = vld [vmem:[%s8520_s2 + $0x448] sm:$0xff]  ;;  %v599_v0 = vld [vmem:[%s8520_s2 + $0x458] sm:$0xff] }
  0xf7   : > { %1266 = vmatprep.subr.bf16.mxu0 %v885_v59  ;;  %1512 = vmatprep.subr.bf16.mxu1 %v887_v1  ;;  %v920_v59 = vunpack.c.h.s8.bf16 %v592_v57  ;;  %v922_v1 = vunpack.c.h.s8.bf16 %v594_v58  ;;  %v925_v2 = vunpack.c.l.s8.bf16 %v597_v63  ;;  %v927_v3 = vunpack.c.l.s8.bf16 %v599_v0  ;;  %v612_v57 = vld [vmem:[%s8520_s2 + $0x4c0] sm:$0xff]  ;;  %v614_v58 = vld [vmem:[%s8520_s2 + $0x4d0] sm:$0xff] }
  0xf8   : > { %v929_v9 = vunpack.c.h.s8.bf16 %v597_v63  ;;  %v931_v10 = vunpack.c.h.s8.bf16 %v599_v0  ;;  %v617_v63 = vld [vmem:[%s8520_s2 + $0x4e8] sm:$0xff]  ;;  %v619_v0 = vld [vmem:[%s8520_s2 + $0x4f8] sm:$0xff] }
  0xfa   : > { %1267 = vmatpush1.bf16.msra.mxu0 %v884_v5  ;;  %1513 = vmatpush1.bf16.msra.mxu1 %v886_v6  ;;  %v596_v5 = vld [vmem:[%s8520_s2 + $0x440] sm:$0xff]  ;;  %v598_v6 = vld [vmem:[%s8520_s2 + $0x450] sm:$0xff] }
  0xfb   : > { %1268 = vmatprep.subr.bf16.mxu0 %v889_v7  ;;  %1514 = vmatprep.subr.bf16.mxu1 %v891_v8  ;;  %v924_v7 = vunpack.c.l.s8.bf16 %v596_v5  ;;  %v926_v8 = vunpack.c.l.s8.bf16 %v598_v6 }
  0xfe   : > { %1269 = vmatpush1.bf16.msra.mxu0 %v888_v20  ;;  %1515 = vmatpush1.bf16.msra.mxu1 %v890_v11  ;;  %v601_v20 = vld [vmem:[%s8520_s2 + $0x468] sm:$0xff]  ;;  %v603_v11 = vld [vmem:[%s8520_s2 + $0x478] sm:$0xff] }
  0xff   : > { %1270 = vmatprep.subr.bf16.mxu0 %v893_v12  ;;  %1516 = vmatprep.subr.bf16.mxu1 %v895_v13  ;;  %v928_v12 = vunpack.c.h.s8.bf16 %v596_v5  ;;  %v930_v13 = vunpack.c.h.s8.bf16 %v598_v6  ;;  %v933_v14 = vunpack.c.l.s8.bf16 %v601_v20  ;;  %v935_v15 = vunpack.c.l.s8.bf16 %v603_v11  ;;  %v616_v5 = vld [vmem:[%s8520_s2 + $0x4e0] sm:$0xff]  ;;  %v618_v6 = vld [vmem:[%s8520_s2 + $0x4f0] sm:$0xff] }
 0x100   : > { %v937_v19 = vunpack.c.h.s8.bf16 %v601_v20  ;;  %v939_v43 = vunpack.c.h.s8.bf16 %v603_v11  ;;  %v621_v20 = vld [vmem:[%s8520_s2 + $0x508] sm:$0xff]  ;;  %v623_v11 = vld [vmem:[%s8520_s2 + $0x518] sm:$0xff] }
 0x102   : > { %1271 = vmatpush1.bf16.msra.mxu0 %v892_v34  ;;  %1517 = vmatpush1.bf16.msra.mxu1 %v894_v16  ;;  %v600_v34 = vld [vmem:[%s8520_s2 + $0x460] sm:$0xff]  ;;  %v602_v16 = vld [vmem:[%s8520_s2 + $0x470] sm:$0xff] }
 0x103   : > { %1272 = vmatprep.subr.bf16.mxu0 %v897_v17  ;;  %1518 = vmatprep.subr.bf16.mxu1 %v899_v18  ;;  %v932_v17 = vunpack.c.l.s8.bf16 %v600_v34  ;;  %v934_v18 = vunpack.c.l.s8.bf16 %v602_v16 }
 0x106   : > { %1273 = vmatpush1.bf16.msra.mxu0 %v896_v21  ;;  %1519 = vmatpush1.bf16.msra.mxu1 %v898_v22  ;;  %v605_v21 = vld [vmem:[%s8520_s2 + $0x488] sm:$0xff]  ;;  %v607_v22 = vld [vmem:[%s8520_s2 + $0x498] sm:$0xff] }
 0x107   : > { %1274 = vmatprep.subr.bf16.mxu0 %v901_v23  ;;  %1520 = vmatprep.subr.bf16.mxu1 %v903_v24  ;;  %v936_v23 = vunpack.c.h.s8.bf16 %v600_v34  ;;  %v938_v24 = vunpack.c.h.s8.bf16 %v602_v16  ;;  %v941_v25 = vunpack.c.l.s8.bf16 %v605_v21  ;;  %v943_v26 = vunpack.c.l.s8.bf16 %v607_v22  ;;  %v620_v34 = vld [vmem:[%s8520_s2 + $0x500] sm:$0xff]  ;;  %v622_v16 = vld [vmem:[%s8520_s2 + $0x510] sm:$0xff] }
 0x108   : > { %v945_v31 = vunpack.c.h.s8.bf16 %v605_v21  ;;  %v947_v32 = vunpack.c.h.s8.bf16 %v607_v22  ;;  %v979_v21 = vunpack.c.h.s8.bf16 %v623_v11  ;;  %v625_v22 = vld [vmem:[%s8520_s2 + $0x528] sm:$0xff] }
 0x10a   : > { %1275 = vmatpush1.bf16.msra.mxu0 %v900_v27  ;;  %1521 = vmatpush1.bf16.msra.mxu1 %v902_v28  ;;  %v604_v27 = vld [vmem:[%s8520_s2 + $0x480] sm:$0xff]  ;;  %v606_v28 = vld [vmem:[%s8520_s2 + $0x490] sm:$0xff] }
 0x10b   : > { %1276 = vmatprep.subr.bf16.mxu0 %v905_v29  ;;  %1522 = vmatprep.subr.bf16.mxu1 %v907_v30  ;;  %v940_v29 = vunpack.c.l.s8.bf16 %v604_v27  ;;  %v942_v30 = vunpack.c.l.s8.bf16 %v606_v28 }
 0x10e   : > { %1277 = vmatpush1.bf16.msra.mxu0 %v904_v52  ;;  %1523 = vmatpush1.bf16.msra.mxu1 %v906_v35  ;;  %v609_v52 = vld [vmem:[%s8520_s2 + $0x4a8] sm:$0xff]  ;;  %v611_v35 = vld [vmem:[%s8520_s2 + $0x4b8] sm:$0xff] }
 0x10f   : > { %1287 = vmatprep.subr.bf16.mxu0 %v909_v36  ;;  %1533 = vmatprep.subr.bf16.mxu1 %v911_v38  ;;  %v944_v36 = vunpack.c.h.s8.bf16 %v604_v27  ;;  %v946_v38 = vunpack.c.h.s8.bf16 %v606_v28  ;;  %v949_v39 = vunpack.c.l.s8.bf16 %v609_v52  ;;  %v951_v40 = vunpack.c.l.s8.bf16 %v611_v35  ;;  %v624_v27 = vld [vmem:[%s8520_s2 + $0x520] sm:$0xff] }
 0x110   : > { %v980_v28 = vunpack.c.l.s8.bf16 %v624_v27 }
 0x111   : > { %1279 = vmatmul.mubr.bf16.vlgmr.msra.gmra.mrb[0].mxu0 %v1084_v42  ;;  %1525 = vmatmul.mubr.bf16.vlgmr.msra.gmra.mrb[0].mxu1 %v1084_v42  ;;  %v610_v42 = vld [vmem:[%s8520_s2 + $0x4b0] sm:$0xff] }
 0x112   : > { %1288 = vmatpush1.bf16.msra.mxu0 %v908_v44  ;;  %1534 = vmatpush1.bf16.msra.mxu1 %v910_v45  ;;  %v948_v44 = vunpack.c.l.s8.bf16 %v608_v41  ;;  %v950_v45 = vunpack.c.l.s8.bf16 %v610_v42 }
 0x113   : > { %1289 = vmatprep.subr.bf16.mxu0 %v913_v46  ;;  %1535 = vmatprep.subr.bf16.mxu1 %v915_v47  ;;  %v953_v46 = vunpack.c.h.s8.bf16 %v609_v52  ;;  %v955_v47 = vunpack.c.h.s8.bf16 %v611_v35  ;;  %v631_v52 = vld [vmem:[%s8520_s2 + $0x558] sm:$0xff]  ;;  %v984_v35 = vunpack.c.h.s8.bf16 %v624_v27 }
 0x114   : > { %1319 = vmatprep.mubr.bf16.mxu0 %v7033_v53  ;;  %1565 = vmatprep.mubr.bf16.mxu1 %v7033_v53 }
 0x116   : > { %1290 = vmatpush1.bf16.msra.mxu0 %v912_v4  ;;  %1536 = vmatpush1.bf16.msra.mxu1 %v914_v54  ;;  %v952_v4 = vunpack.c.h.s8.bf16 %v608_v41  ;;  %v954_v54 = vunpack.c.h.s8.bf16 %v610_v42  ;;  %v630_v41 = vld [vmem:[%s8520_s2 + $0x550] sm:$0xff] }
 0x117   : > { %1291 = vmatprep.subr.bf16.mxu0 %v917_v55  ;;  %1537 = vmatprep.subr.bf16.mxu1 %v919_v56  ;;  %v957_v55 = vunpack.c.l.s8.bf16 %v613_v50  ;;  %v959_v56 = vunpack.c.l.s8.bf16 %v615_v51 }
 0x11a   : > { %1292 = vmatpush1.bf16.msra.mxu0 %v916_v49  ;;  %1538 = vmatpush1.bf16.msra.mxu1 %v918_v60  ;;  %v956_v49 = vunpack.c.l.s8.bf16 %v612_v57  ;;  %v958_v60 = vunpack.c.l.s8.bf16 %v614_v58 }
 0x11b   : > { %1293 = vmatprep.subr.bf16.mxu0 %v921_v61  ;;  %1539 = vmatprep.subr.bf16.mxu1 %v923_v62  ;;  %v961_v61 = vunpack.c.h.s8.bf16 %v613_v50  ;;  %v963_v62 = vunpack.c.h.s8.bf16 %v615_v51  ;;  %v635_v50 = vld [vmem:[%s8520_s2 + $0x578] sm:$0xff] }
 0x11e   : > { %1294 = vmatpush1.bf16.msra.mxu0 %v920_v59  ;;  %1540 = vmatpush1.bf16.msra.mxu1 %v922_v1  ;;  %v960_v59 = vunpack.c.h.s8.bf16 %v612_v57  ;;  %v962_v1 = vunpack.c.h.s8.bf16 %v614_v58  ;;  %v634_v57 = vld [vmem:[%s8520_s2 + $0x570] sm:$0xff] }
 0x11f   : > { %1295 = vmatprep.subr.bf16.mxu0 %v925_v2  ;;  %1541 = vmatprep.subr.bf16.mxu1 %v927_v3  ;;  %v965_v2 = vunpack.c.l.s8.bf16 %v617_v63  ;;  %v967_v3 = vunpack.c.l.s8.bf16 %v619_v0 }
 0x122   : > { %1296 = vmatpush1.bf16.msra.mxu0 %v924_v7  ;;  %1542 = vmatpush1.bf16.msra.mxu1 %v926_v8  ;;  %v964_v7 = vunpack.c.l.s8.bf16 %v616_v5  ;;  %v966_v8 = vunpack.c.l.s8.bf16 %v618_v6 }
 0x123   : > { %1297 = vmatprep.subr.bf16.mxu0 %v929_v9  ;;  %1543 = vmatprep.subr.bf16.mxu1 %v931_v10  ;;  %v969_v9 = vunpack.c.h.s8.bf16 %v617_v63  ;;  %v971_v10 = vunpack.c.h.s8.bf16 %v619_v0  ;;  %v639_v63 = vld [vmem:[%s8520_s2 + $0x598] sm:$0xff] }
 0x126   : > { %1298 = vmatpush1.bf16.msra.mxu0 %v928_v12  ;;  %1544 = vmatpush1.bf16.msra.mxu1 %v930_v13  ;;  %v968_v12 = vunpack.c.h.s8.bf16 %v616_v5  ;;  %v970_v13 = vunpack.c.h.s8.bf16 %v618_v6  ;;  %v638_v5 = vld [vmem:[%s8520_s2 + $0x590] sm:$0xff] }
 0x127   : > { %1299 = vmatprep.subr.bf16.mxu0 %v933_v14  ;;  %1545 = vmatprep.subr.bf16.mxu1 %v935_v15  ;;  %v973_v14 = vunpack.c.l.s8.bf16 %v621_v20  ;;  %v975_v15 = vunpack.c.l.s8.bf16 %v623_v11 }
 0x12a   : > { %1300 = vmatpush1.bf16.msra.mxu0 %v932_v17  ;;  %1546 = vmatpush1.bf16.msra.mxu1 %v934_v18  ;;  %v7129_v17 = vrot.slane %v7014_v33, %v6626_v48  ;;  %v972_v18 = vunpack.c.l.s8.bf16 %v620_v34  ;;  %v1110_v48 = vcombine.high %v7033_v53, %v7033_v53  ;;  %v976_v33 = vunpack.c.h.s8.bf16 %v620_v34  ;;  %v626_v53 = vld [vmem:[%s8520_s2 + $0x530] sm:$0xff] }
 0x12b   : > { %1301 = vmatprep.subr.bf16.mxu0 %v937_v19  ;;  %1547 = vmatprep.subr.bf16.mxu1 %v939_v43  ;;  %v974_v19 = vunpack.c.l.s8.bf16 %v622_v16  ;;  %v977_v43 = vunpack.c.h.s8.bf16 %v621_v20  ;;  %v643_v20 = vld [vmem:[%s8520_s2 + $0x5b8] sm:$0xff]  ;;  %v642_v34 = vld [vmem:[%s8520_s2 + $0x5b0] sm:$0xff] }
 0x12e   : > { %1302 = vmatpush1.bf16.msra.mxu0 %v936_v23  ;;  %1548 = vmatpush1.bf16.msra.mxu1 %v938_v24  ;;  %v627_v23 = vld [vmem:[%s8520_s2 + $0x538] sm:$0xff]  ;;  %v978_v24 = vunpack.c.h.s8.bf16 %v622_v16 }
 0x12f   : > { %1303 = vmatprep.subr.bf16.mxu0 %v941_v25  ;;  %1549 = vmatprep.subr.bf16.mxu1 %v943_v26  ;;  %v981_v25 = vunpack.c.l.s8.bf16 %v625_v22  ;;  %v983_v26 = vunpack.c.l.s8.bf16 %v627_v23 }
 0x132   : > { %1304 = vmatpush1.bf16.msra.mxu0 %v940_v29  ;;  %1550 = vmatpush1.bf16.msra.mxu1 %v942_v30  ;;  %v982_v29 = vunpack.c.l.s8.bf16 %v626_v53  ;;  %v985_v30 = vunpack.c.h.s8.bf16 %v625_v22  ;;  %v647_v22 = vld [vmem:[%s8520_s2 + $0x5d8] sm:$0xff] }
 0x133   : > { %1305 = vmatprep.subr.bf16.mxu0 %v945_v31  ;;  %1551 = vmatprep.subr.bf16.mxu1 %v947_v32  ;;  %v987_v31 = vunpack.c.h.s8.bf16 %v627_v23  ;;  %v629_v32 = vld [vmem:[%s8520_s2 + $0x548] sm:$0xff] }
 0x136   : > { %1306 = vmatpush1.bf16.msra.mxu0 %v944_v36  ;;  %1552 = vmatpush1.bf16.msra.mxu1 %v946_v38  ;;  %v986_v36 = vunpack.c.h.s8.bf16 %v626_v53  ;;  %v989_v38 = vunpack.c.l.s8.bf16 %v629_v32 }
 0x137   : > { %1307 = vmatprep.subr.bf16.mxu0 %v949_v39  ;;  %1553 = vmatprep.subr.bf16.mxu1 %v951_v40  ;;  %v991_v39 = vunpack.c.l.s8.bf16 %v631_v52  ;;  %v628_v40 = vld [vmem:[%s8520_s2 + $0x540] sm:$0xff] }
 0x138   : > { %v988_v42 = vunpack.c.l.s8.bf16 %v628_v40  ;;  %v992_v51 = vunpack.c.h.s8.bf16 %v628_v40 }
 0x13a   : > { %1308 = vmatpush1.bf16.msra.mxu0 %v948_v44  ;;  %1554 = vmatpush1.bf16.msra.mxu1 %v950_v45  ;;  %v990_v44 = vunpack.c.l.s8.bf16 %v630_v41  ;;  %v993_v45 = vunpack.c.h.s8.bf16 %v629_v32 }
 0x13b   : > { %1309 = vmatprep.subr.bf16.mxu0 %v953_v46  ;;  %1555 = vmatprep.subr.bf16.mxu1 %v955_v47  ;;  %v995_v46 = vunpack.c.h.s8.bf16 %v631_v52  ;;  %v633_v47 = vld [vmem:[%s8520_s2 + $0x568] sm:$0xff] }
 0x13e   : > { %1310 = vmatpush1.bf16.msra.mxu0 %v952_v4  ;;  %1556 = vmatpush1.bf16.msra.mxu1 %v954_v54  ;;  %v994_v4 = vunpack.c.h.s8.bf16 %v630_v41  ;;  %v997_v54 = vunpack.c.l.s8.bf16 %v633_v47 }
 0x13f   : > { %1311 = vmatprep.subr.bf16.mxu0 %v957_v55  ;;  %1557 = vmatprep.subr.bf16.mxu1 %v959_v56  ;;  %v999_v55 = vunpack.c.l.s8.bf16 %v635_v50  ;;  %v632_v56 = vld [vmem:[%s8520_s2 + $0x560] sm:$0xff] }
 0x140   : > { %v996_v58 = vunpack.c.l.s8.bf16 %v632_v56  ;;  %v1000_v0 = vunpack.c.h.s8.bf16 %v632_v56  ;;  %v6327_v56 = vld [vmem:[%s8521_s3 + $0x8] sm:$0xff]  }
 0x142   : > { %1312 = vmatpush1.bf16.msra.mxu0 %v956_v49  ;;  %1558 = vmatpush1.bf16.msra.mxu1 %v958_v60  ;;  %v998_v49 = vunpack.c.l.s8.bf16 %v634_v57  ;;  %v1001_v60 = vunpack.c.h.s8.bf16 %v633_v47  ;;  %v1109_v47 = vcombine.high %v7129_v17, %v7129_v17 }
 0x143   : > { %1313 = vmatprep.subr.bf16.mxu0 %v961_v61  ;;  %1559 = vmatprep.subr.bf16.mxu1 %v963_v62  ;;  %v1003_v61 = vunpack.c.h.s8.bf16 %v635_v50  ;;  %v637_v62 = vld [vmem:[%s8520_s2 + $0x588] sm:$0xff]  ;;  %v6321_v50 = vld [vmem:[%s8521_s3 + $0x40] sm:$0xff]  }
 0x146   : > { %1314 = vmatpush1.bf16.msra.mxu0 %v960_v59  ;;  %1560 = vmatpush1.bf16.msra.mxu1 %v962_v1  ;;  %v1002_v59 = vunpack.c.h.s8.bf16 %v634_v57  ;;  %v1005_v1 = vunpack.c.l.s8.bf16 %v637_v62  ;;  %v6328_v57 = vld [vmem:[%s8521_s3 + $0x88] sm:$0xff]  }
 0x147   : > { %1315 = vmatprep.subr.bf16.mxu0 %v965_v2  ;;  %1561 = vmatprep.subr.bf16.mxu1 %v967_v3  ;;  %v1007_v2 = vunpack.c.l.s8.bf16 %v639_v63  ;;  %v636_v3 = vld [vmem:[%s8520_s2 + $0x580] sm:$0xff] }
 0x148   : > { %v1004_v6 = vunpack.c.l.s8.bf16 %v636_v3  ;;  %v1008_v11 = vunpack.c.h.s8.bf16 %v636_v3  ;;  %v6339_v3 = vld [vmem:[%s8521_s3 + $0x20] sm:$0xff]  }
 0x14a   : > { %1316 = vmatpush1.bf16.msra.mxu0 %v964_v7  ;;  %1562 = vmatpush1.bf16.msra.mxu1 %v966_v8  ;;  %v1006_v7 = vunpack.c.l.s8.bf16 %v638_v5  ;;  %v1009_v8 = vunpack.c.h.s8.bf16 %v637_v62  ;;  %v6333_v62 = vld [vmem:[%s8521_s3 + $0x58] sm:$0xff]  }
 0x14b   : > { %1317 = vmatprep.subr.bf16.mxu0 %v969_v9  ;;  %1563 = vmatprep.subr.bf16.mxu1 %v971_v10  ;;  %v1011_v9 = vunpack.c.h.s8.bf16 %v639_v63  ;;  %v641_v10 = vld [vmem:[%s8520_s2 + $0x5a8] sm:$0xff]  ;;  %v6334_v63 = vld [vmem:[%s8521_s3 + $0xd8] sm:$0xff]  }
 0x14e   : > { %1318 = vmatpush1.bf16.msra.mxu0 %v968_v12  ;;  %1564 = vmatpush1.bf16.msra.mxu1 %v970_v13  ;;  %v1010_v12 = vunpack.c.h.s8.bf16 %v638_v5  ;;  %v1013_v13 = vunpack.c.l.s8.bf16 %v641_v10  ;;  %v6340_v5 = vld [vmem:[%s8521_s3 + $0xa0] sm:$0xff]  }
 0x14f   : > { %1328 = vmatprep.subr.bf16.mxu0 %v973_v14  ;;  %1574 = vmatprep.subr.bf16.mxu1 %v975_v15  ;;  %v1015_v14 = vunpack.c.l.s8.bf16 %v643_v20  ;;  %v640_v15 = vld [vmem:[%s8520_s2 + $0x5a0] sm:$0xff] }
 0x150   : > { %v1012_v16 = vunpack.c.l.s8.bf16 %v640_v15  ;;  %v1016_v23 = vunpack.c.h.s8.bf16 %v640_v15  ;;  %v6351_v15 = vld [vmem:[%s8521_s3 + $0x38] sm:$0xff]  }
 0x151   : > { %1320 = vmatmul.mubr.bf16.vlgmr.msra.gmra.mrb[0].mxu0 %v7129_v17  ;;  %1566 = vmatmul.mubr.bf16.vlgmr.msra.gmra.mrb[0].mxu1 %v7129_v17  ;;  %v6324_v17 = vld [vmem:[%s8521_s3 + $0x80] sm:$0xff]  }
 0x152   : > { %1329 = vmatpush1.bf16.msra.mxu0 %v972_v18  ;;  %1575 = vmatpush1.bf16.msra.mxu1 %v974_v19  ;;  %v1014_v18 = vunpack.c.l.s8.bf16 %v642_v34  ;;  %v1017_v19 = vunpack.c.h.s8.bf16 %v641_v10  ;;  %v6345_v10 = vld [vmem:[%s8521_s3 + $0x70] sm:$0xff]  }
 0x153   : > { %1330 = vmatprep.subr.bf16.mxu0 %v977_v43  ;;  %1576 = vmatprep.subr.bf16.mxu1 %v979_v21  ;;  %v1019_v43 = vunpack.c.h.s8.bf16 %v643_v20  ;;  %v645_v21 = vld [vmem:[%s8520_s2 + $0x5c8] sm:$0xff]  ;;  %v6346_v20 = vld [vmem:[%s8521_s3 + $0xf0] sm:$0xff]  }
 0x154   : > { %1360 = vmatprep.mubr.bf16.mxu0 %v1110_v48  ;;  %1606 = vmatprep.mubr.bf16.mxu1 %v1110_v48  ;;  %v1018_v48 = vunpack.c.h.s8.bf16 %v642_v34  ;;  %v6352_v34 = vld [vmem:[%s8521_s3 + $0xb8] sm:$0xff]  }
 0x156   : > { %1331 = vmatpush1.bf16.msra.mxu0 %v976_v33  ;;  %1577 = vmatpush1.bf16.msra.mxu1 %v978_v24  ;;  %v1021_v33 = vunpack.c.l.s8.bf16 %v645_v21  ;;  %v1023_v24 = vunpack.c.l.s8.bf16 %v647_v22 }
 0x157   : > { %1332 = vmatprep.subr.bf16.mxu0 %v981_v25  ;;  %1578 = vmatprep.subr.bf16.mxu1 %v983_v26  ;;  %v644_v25 = vld [vmem:[%s8520_s2 + $0x5c0] sm:$0xff]  ;;  %v646_v26 = vld [vmem:[%s8520_s2 + $0x5d0] sm:$0xff] }
 0x158   : > { %v1020_v27 = vunpack.c.l.s8.bf16 %v644_v25  ;;  %v1022_v53 = vunpack.c.l.s8.bf16 %v646_v26  ;;  %v1024_v32 = vunpack.c.h.s8.bf16 %v644_v25  ;;  %v1026_v52 = vunpack.c.h.s8.bf16 %v646_v26 }
 0x15a   : > { %1333 = vmatpush1.bf16.msra.mxu0 %v980_v28  ;;  %1579 = vmatpush1.bf16.msra.mxu1 %v982_v29  ;;  %v1025_v28 = vunpack.c.h.s8.bf16 %v645_v21  ;;  %v1027_v29 = vunpack.c.h.s8.bf16 %v647_v22  ;;  %v7330_v21 = vsub.s32 3, %v6606_v37  ;;  %v1641_v22 = vld [vmem:[%s8519_s1] sm:$0xf] }
 0x15b   : > { %1334 = vmatprep.subr.bf16.mxu0 %v985_v30  ;;  %1580 = vmatprep.subr.bf16.mxu1 %v987_v31  ;;  %v649_v30 = vld [vmem:[%s8520_s2 + $0x5e8] sm:$0xff]  ;;  %v651_v31 = vld [vmem:[%s8520_s2 + $0x5f8] sm:$0xff] }
 0x15e   : > { %1335 = vmatpush1.bf16.msra.mxu0 %v984_v35  ;;  %1581 = vmatpush1.bf16.msra.mxu1 %v986_v36  ;;  %v1029_v35 = vunpack.c.l.s8.bf16 %v649_v30  ;;  %v1031_v36 = vunpack.c.l.s8.bf16 %v651_v31 }
 0x15f   : > { %1336 = vmatprep.subr.bf16.mxu0 %v989_v38  ;;  %1582 = vmatprep.subr.bf16.mxu1 %v991_v39  ;;  %v648_v38 = vld [vmem:[%s8520_s2 + $0x5e0] sm:$0xff]  ;;  %v650_v39 = vld [vmem:[%s8520_s2 + $0x5f0] sm:$0xff] }
 0x160   : > { %v1028_v40 = vunpack.c.l.s8.bf16 %v648_v38  ;;  %v1030_v41 = vunpack.c.l.s8.bf16 %v650_v39 }
 0x162   : > { %1337 = vmatpush1.bf16.msra.mxu0 %v988_v42  ;;  %1583 = vmatpush1.bf16.msra.mxu1 %v990_v44  ;;  %v1033_v42 = vunpack.c.h.s8.bf16 %v649_v30  ;;  %v1035_v44 = vunpack.c.h.s8.bf16 %v651_v31 }
 0x163   : > { %1338 = vmatprep.subr.bf16.mxu0 %v993_v45  ;;  %1584 = vmatprep.subr.bf16.mxu1 %v995_v46  ;;  %v1032_v45 = vunpack.c.h.s8.bf16 %v648_v38  ;;  %v1034_v46 = vunpack.c.h.s8.bf16 %v650_v39 }
 0x166   : > { %1339 = vmatpush1.bf16.msra.mxu0 %v992_v51  ;;  %1585 = vmatpush1.bf16.msra.mxu1 %v994_v4  ;;  %v6322_v51 = vld [vmem:[%s8521_s3 + $0xc0] sm:$0xff]  }
 0x167   : > { %1340 = vmatprep.subr.bf16.mxu0 %v997_v54  ;;  %1586 = vmatprep.subr.bf16.mxu1 %v999_v55  ;;  %v6323_v4 = vld [vmem:[%s8521_s3] sm:$0xff]   ;;  %v6325_v54 = vld [vmem:[%s8521_s3 + $0x48] sm:$0xff]  }
 0x168   : > { %v6326_v55 = vld [vmem:[%s8521_s3 + $0xc8] sm:$0xff]  }
 0x16a   : > { %1341 = vmatpush1.bf16.msra.mxu0 %v996_v58  ;;  %1587 = vmatpush1.bf16.msra.mxu1 %v998_v49  ;;  %v6329_v58 = vld [vmem:[%s8521_s3 + $0x50] sm:$0xff]  }
 0x16b   : > { %1342 = vmatprep.subr.bf16.mxu0 %v1001_v60  ;;  %1588 = vmatprep.subr.bf16.mxu1 %v1003_v61  ;;  %v6330_v49 = vld [vmem:[%s8521_s3 + $0xd0] sm:$0xff]  }
 0x16c   : > { %v6331_v60 = vld [vmem:[%s8521_s3 + $0x10] sm:$0xff]  }
 0x16d   : > { %v6332_v61 = vld [vmem:[%s8521_s3 + $0x90] sm:$0xff]  }
 0x16e   : > { %1343 = vmatpush1.bf16.msra.mxu0 %v1000_v0  ;;  %1589 = vmatpush1.bf16.msra.mxu1 %v1002_v59  ;;  %v6335_v0 = vld [vmem:[%s8521_s3 + $0x18] sm:$0xff]  }
 0x16f   : > { %1344 = vmatprep.subr.bf16.mxu0 %v1005_v1  ;;  %1590 = vmatprep.subr.bf16.mxu1 %v1007_v2  ;;  %v6336_v59 = vld [vmem:[%s8521_s3 + $0x98] sm:$0xff]   ;;  %v6337_v1 = vld [vmem:[%s8521_s3 + $0x60] sm:$0xff]  }
 0x170   : > { %v6338_v2 = vld [vmem:[%s8521_s3 + $0xe0] sm:$0xff]  }
 0x172   : > { %1345 = vmatpush1.bf16.msra.mxu0 %v1004_v6  ;;  %1591 = vmatpush1.bf16.msra.mxu1 %v1006_v7  ;;  %v6341_v6 = vld [vmem:[%s8521_s3 + $0x68] sm:$0xff]  }
 0x173   : > { %1346 = vmatprep.subr.bf16.mxu0 %v1009_v8  ;;  %1592 = vmatprep.subr.bf16.mxu1 %v1011_v9  ;;  %v6342_v7 = vld [vmem:[%s8521_s3 + $0xe8] sm:$0xff]  }
 0x174   : > { %v6343_v8 = vld [vmem:[%s8521_s3 + $0x28] sm:$0xff]  }
 0x175   : > { %v6344_v9 = vld [vmem:[%s8521_s3 + $0xa8] sm:$0xff]  }
 0x176   : > { %1347 = vmatpush1.bf16.msra.mxu0 %v1008_v11  ;;  %1593 = vmatpush1.bf16.msra.mxu1 %v1010_v12  ;;  %v6347_v11 = vld [vmem:[%s8521_s3 + $0x30] sm:$0xff]  }
 0x177   : > { %1348 = vmatprep.subr.bf16.mxu0 %v1013_v13  ;;  %1594 = vmatprep.subr.bf16.mxu1 %v1015_v14  ;;  %v6348_v12 = vld [vmem:[%s8521_s3 + $0xb0] sm:$0xff]   ;;  %v6349_v13 = vld [vmem:[%s8521_s3 + $0x78] sm:$0xff]  }
 0x178   : > { %v6350_v14 = vld [vmem:[%s8521_s3 + $0xf8] sm:$0xff]  }
 0x17a   : > { %1349 = vmatpush1.bf16.msra.mxu0 %v1012_v16  ;;  %1595 = vmatpush1.bf16.msra.mxu1 %v1014_v18  ;;  %v7318_v16 = vsub.s32 0, %v6606_v37  ;;  %v7321_v18 = vsub.s32 2, %v6606_v37 }
 0x17b   : > { %1350 = vmatprep.subr.bf16.mxu0 %v1017_v19  ;;  %1596 = vmatprep.subr.bf16.mxu1 %v1019_v43  ;;  %v1615_v19 = vld [vmem:[%s8519_s1 + $0xc] sm:$0xf]  ;;  %v7327_v43 = vsub.s32 1, %v6606_v37 }
 0x17c   : > { %v1646_v25 = vrot.slane %v1641_v22, %v7318_v16  ;;  %v1654_v26 = vrot.slane %v1641_v22, %v7321_v18 }
 0x17d   : > { %v1650_v37 = vrot.slane %v1641_v22, %v7327_v43 }
 0x17e   : > { %1351 = vmatpush1.bf16.msra.mxu0 %v1016_v23  ;;  %1597 = vmatpush1.bf16.msra.mxu1 %v1018_v48  ;;  %v1620_v23 = vrot.slane %v1615_v19, %v7318_v16  ;;  %v1628_v48 = vrot.slane %v1615_v19, %v7321_v18 }
 0x17f   : > { %1352 = vmatprep.subr.bf16.mxu0 %v1021_v33  ;;  %1598 = vmatprep.subr.bf16.mxu1 %v1023_v24  ;;  %v1624_v33 = vrot.slane %v1615_v19, %v7327_v43  ;;  %v1632_v24 = vrot.slane %v1615_v19, %v7330_v21 }
 0x182   : > { %1353 = vmatpush1.bf16.msra.mxu0 %v1020_v27  ;;  %1599 = vmatpush1.bf16.msra.mxu1 %v1022_v53 }
 0x183   : > { %1354 = vmatprep.subr.bf16.mxu0 %v1025_v28  ;;  %1600 = vmatprep.subr.bf16.mxu1 %v1027_v29  ;;  %v1658_v28 = vrot.slane %v1641_v22, %v7330_v21 }
 0x186   : > { %1355 = vmatpush1.bf16.msra.mxu0 %v1024_v32  ;;  %1601 = vmatpush1.bf16.msra.mxu1 %v1026_v52 }
 0x187   : > { %1356 = vmatprep.subr.bf16.mxu0 %v1029_v35  ;;  %1602 = vmatprep.subr.bf16.mxu1 %v1031_v36 }
 0x18a   : > { %1357 = vmatpush1.bf16.msra.mxu0 %v1028_v40  ;;  %1603 = vmatpush1.bf16.msra.mxu1 %v1030_v41 }
 0x18b   : > { %1358 = vmatprep.subr.bf16.mxu0 %v1033_v42  ;;  %1604 = vmatprep.subr.bf16.mxu1 %v1035_v44 }
 0x18e   : > { %1359 = vmatpush1.bf16.msra.mxu0 %v1032_v45  ;;  %1605 = vmatpush1.bf16.msra.mxu1 %v1034_v46 }
 0x18f   : > { %6156 = vmatprep.subr.bf16.mxu0 %v6321_v50  ;;  %6178 = vmatprep.subr.bf16.mxu1 %v6322_v51 }
 0x191   : > { %1361 = vmatmul.mubr.bf16.vlgmr.msra.gmra.mrb[0].mxu0 %v1109_v47  ;;  %1607 = vmatmul.mubr.bf16.vlgmr.msra.gmra.mrb[0].mxu1 %v1109_v47 }
 0x192   : > { %6157 = vmatpush3.bf16.msra.mxu0 %v6323_v4  ;;  %6179 = vmatpush3.bf16.msra.mxu1 %v6324_v17 }
 0x193   : > { %6158 = vmatprep.subr.bf16.mxu0 %v6325_v54  ;;  %6180 = vmatprep.subr.bf16.mxu1 %v6326_v55 }
 0x196   : > { %6159 = vmatpush3.bf16.msra.mxu0 %v6327_v56  ;;  %6181 = vmatpush3.bf16.msra.mxu1 %v6328_v57 }
 0x197   : > { %6160 = vmatprep.subr.bf16.mxu0 %v6329_v58  ;;  %6182 = vmatprep.subr.bf16.mxu1 %v6330_v49 }
 0x19a   : > { %6161 = vmatpush3.bf16.msra.mxu0 %v6331_v60  ;;  %6183 = vmatpush3.bf16.msra.mxu1 %v6332_v61 }
 0x19b   : > { %6162 = vmatprep.subr.bf16.mxu0 %v6333_v62  ;;  %6184 = vmatprep.subr.bf16.mxu1 %v6334_v63 }
 0x19e   : > { %6163 = vmatpush3.bf16.msra.mxu0 %v6335_v0  ;;  %6185 = vmatpush3.bf16.msra.mxu1 %v6336_v59 }
 0x19f   : > { %6164 = vmatprep.subr.bf16.mxu0 %v6337_v1  ;;  %6186 = vmatprep.subr.bf16.mxu1 %v6338_v2 }
 0x1a2   : > { %6165 = vmatpush3.bf16.msra.mxu0 %v6339_v3  ;;  %6187 = vmatpush3.bf16.msra.mxu1 %v6340_v5 }
 0x1a3   : > { %6166 = vmatprep.subr.bf16.mxu0 %v6341_v6  ;;  %6188 = vmatprep.subr.bf16.mxu1 %v6342_v7 }
 0x1a6   : > { %6167 = vmatpush3.bf16.msra.mxu0 %v6343_v8  ;;  %6189 = vmatpush3.bf16.msra.mxu1 %v6344_v9 }
 0x1a7   : > { %6168 = vmatprep.subr.bf16.mxu0 %v6345_v10  ;;  %6190 = vmatprep.subr.bf16.mxu1 %v6346_v20 }
 0x1aa   : > { %6169 = vmatpush3.bf16.msra.mxu0 %v6347_v11  ;;  %6191 = vmatpush3.bf16.msra.mxu1 %v6348_v12 }
 0x1ab   : > { %6170 = vmatprep.subr.bf16.mxu0 %v6349_v13  ;;  %6192 = vmatprep.subr.bf16.mxu1 %v6350_v14 }
 0x1ae   : > { %6171 = vmatpush3.bf16.msra.mxu0 %v6351_v15  ;;  %6193 = vmatpush3.bf16.msra.mxu1 %v6352_v34 }
 0x264   : > { %v1362_v27 = vpop.f32.mrb[0].mxu0  ;;  %v1608_v53 = vpop.f32.mrb[0].mxu1 }
 0x265   : > { %v1637_v29 = vmul.f32 %v1620_v23, %v1362_v27  ;;  %v1639_v30 = vmul.f32 %v1628_v48, %v1608_v53  ;;  %v1364_v31 = vpop.f32.mrb[1].mxu0  ;;  %v1610_v32 = vpop.f32.mrb[1].mxu1 }
 0x266   : > { %v1638_v52 = vmul.f32 %v1624_v33, %v1364_v31  ;;  %v1640_v35 = vmul.f32 %v1632_v24, %v1610_v32  ;;  %v1366_v36 = vpop.f32.mrb[2].mxu0  ;;  %v1612_v38 = vpop.f32.mrb[2].mxu1 }
 0x267   : > { %v1663_v39 = vadd.f32 %v1646_v25, %v1637_v29  ;;  %v1665_v40 = vadd.f32 %v1654_v26, %v1639_v30  ;;  %v1367_v41 = vpop.f32.mrb[3].mxu0  ;;  %v1613_v42 = vpop.f32.mrb[3].mxu1 }
 0x268   : > { %v1664_v44 = vadd.f32 %v1650_v37, %v1638_v52  ;;  %v1666_v45 = vadd.f32 %v1658_v28, %v1640_v35 }
 0x269   : > { %v1668_v46 = vsel %vm1667_vm0, %v1663_v39, 0.0  ;;  %v1682_v47 = vsel %vm1667_vm0, %v1665_v40, 0.0 }
 0x26a   : > { %v1669_v50 = vrot.slane %v1668_v46, 4  ;;  %v1683_v51 = vrot.slane %v1682_v47, 4  ;;  %v1675_v4 = vsel %vm1667_vm0, %v1664_v44, 0.0  ;;  %v1689_v17 = vsel %vm1667_vm0, %v1666_v45, 0.0 }
 0x26b   : > { %v1676_v54 = vrot.slane %v1675_v4, 4  ;;  %v1690_v55 = vrot.slane %v1689_v17, 4 }
 0x26c   : > { %v1670_v56 = vadd.f32 %v1669_v50, %v1668_v46  ;;  %v1684_v57 = vadd.f32 %v1683_v51, %v1682_v47 }
 0x26d   : > { %v1677_v58 = vadd.f32 %v1676_v54, %v1675_v4  ;;  %v1691_v49 = vadd.f32 %v1690_v55, %v1689_v17 }
 0x26e   : > { %v1671_v60 = vrot.slane %v1670_v56, 2  ;;  %v1685_v61 = vrot.slane %v1684_v57, 2 }
 0x26f   : > { %v1678_v62 = vrot.slane %v1677_v58, 2  ;;  %v1692_v63 = vrot.slane %v1691_v49, 2 }
 0x270   : > { %v1672_v0 = vadd.f32 %v1671_v60, %v1670_v56  ;;  %v1686_v59 = vadd.f32 %v1685_v61, %v1684_v57 }
 0x271   : > { %v1679_v1 = vadd.f32 %v1678_v62, %v1677_v58  ;;  %v1693_v2 = vadd.f32 %v1692_v63, %v1691_v49 }
 0x272   : > { %v1673_v3 = vrot.slane %v1672_v0, 1  ;;  %v1687_v5 = vrot.slane %v1686_v59, 1 }
 0x273   : > { %v1680_v6 = vrot.slane %v1679_v1, 1  ;;  %v1694_v7 = vrot.slane %v1693_v2, 1 }
 0x274   : > { %v1674_v8 = vadd.f32 %v1673_v3, %v1672_v0  ;;  %v1688_v9 = vadd.f32 %v1687_v5, %v1686_v59  ;;  %v1741_v0 = vld [vmem:[%s8519_s1 + $0x4] sm:$0xf] }
 0x275   : > { %v1681_v10 = vadd.f32 %v1680_v6, %v1679_v1  ;;  %v1695_v20 = vadd.f32 %v1694_v7, %v1693_v2  ;;  %v1746_v59 = vrot.slane %v1741_v0, %v7318_v16  ;;  %v1754_v1 = vrot.slane %v1741_v0, %v7321_v18  ;;  %v1779_v2 = vld [vmem:[%s8519_s1 + $0x8] sm:$0xf] }
 0x276   : > { %v1697_v11 = vmul.f32 0.5, %v1674_v8  ;;  %v1699_v12 = vmul.f32 0.5, %v1688_v9  ;;  %v1750_v3 = vrot.slane %v1741_v0, %v7327_v43  ;;  %v1758_v5 = vrot.slane %v1741_v0, %v7330_v21 }
 0x277   : > { %v1698_v13 = vmul.f32 0.5, %v1681_v10  ;;  %v1700_v14 = vmul.f32 0.5, %v1695_v20  ;;  %v1784_v7 = vrot.slane %v1779_v2, %v7318_v16  ;;  %v1792_v10 = vrot.slane %v1779_v2, %v7321_v18 }
 0x278   : > { %v1701_v15 = vsub.f32 %v1663_v39, %v1697_v11  ;;  %v1703_v34 = vsub.f32 %v1665_v40, %v1699_v12 }
 0x279   : > { %v1702_v19 = vsub.f32 %v1664_v44, %v1698_v13  ;;  %v1704_v22 = vsub.f32 %v1666_v45, %v1700_v14  ;;  %v1788_v13 = vrot.slane %v1779_v2, %v7327_v43 }
 0x27a   : > { %v1705_v23 = vmul.f32 %v1701_v15, %v1701_v15  ;;  %v1707_v48 = vmul.f32 %v1703_v34, %v1703_v34  ;;  %v1763_v6 = vmul.f32 %v1746_v59, %v1701_v15  ;;  %v1765_v9 = vmul.f32 %v1754_v1, %v1703_v34 }
 0x27b   : > { %v1706_v33 = vmul.f32 %v1702_v19, %v1702_v19  ;;  %v1708_v24 = vmul.f32 %v1704_v22, %v1704_v22  ;;  %v1764_v12 = vmul.f32 %v1750_v3, %v1702_v19 }
 0x27c   : > { %v1709_v25 = vsel %vm1667_vm0, %v1705_v23, 0.0  ;;  %v1723_v26 = vsel %vm1667_vm0, %v1707_v48, 0.0  ;;  %v1766_v48 = vmul.f32 %v1758_v5, %v1704_v22  ;;  %v6466_v22 = vmov 0.0  }
 0x27d   : > { %v1710_v27 = vrot.slane %v1709_v25, 4  ;;  %v1724_v53 = vrot.slane %v1723_v26, 4  ;;  %v1716_v37 = vsel %vm1667_vm0, %v1706_v33, 0.0  ;;  %v1730_v28 = vsel %vm1667_vm0, %v1708_v24, 0.0  ;;  %6212 = vmatprep.subr.bf16.mxu0 %v6466_v22 }
 0x27e   : > { %v1717_v29 = vrot.slane %v1716_v37, 4  ;;  %v1731_v30 = vrot.slane %v1730_v28, 4  ;;  %v1796_v33 = vrot.slane %v1779_v2, %v7330_v21  ;;  %v6353_v21 = vld [vmem:[%s8522_s4] sm:$0xff]  }
 0x27f   : > { %v1711_v31 = vadd.f32 %v1710_v27, %v1709_v25  ;;  %v1725_v32 = vadd.f32 %v1724_v53, %v1723_v26 }
 0x280   : > { %v1718_v52 = vadd.f32 %v1717_v29, %v1716_v37  ;;  %v1732_v35 = vadd.f32 %v1731_v30, %v1730_v28 }
 0x281   : > { %v1712_v36 = vrot.slane %v1711_v31, 2  ;;  %v1726_v38 = vrot.slane %v1725_v32, 2 }
 0x282   : > { %v1719_v39 = vrot.slane %v1718_v52, 2  ;;  %v1733_v40 = vrot.slane %v1732_v35, 2 }
 0x283   : > { %v1713_v41 = vadd.f32 %v1712_v36, %v1711_v31  ;;  %v1727_v42 = vadd.f32 %v1726_v38, %v1725_v32  ;;  %v6354_v31 = vld [vmem:[%s8522_s4 + $0x8] sm:$0xff]   ;;  %v6355_v32 = vld [vmem:[%s8522_s4 + $0x10] sm:$0xff]  }
 0x284   : > { %v1720_v44 = vadd.f32 %v1719_v39, %v1718_v52  ;;  %v1734_v45 = vadd.f32 %v1733_v40, %v1732_v35  ;;  %v6356_v52 = vld [vmem:[%s8522_s4 + $0x18] sm:$0xff]   ;;  %v6357_v35 = vld [vmem:[%s8522_s4 + $0x20] sm:$0xff]   ;;  %v6358_v36 = vld [vmem:[%s8522_s4 + $0x28] sm:$0xff]  }
 0x285   : > { %v1714_v46 = vrot.slane %v1713_v41, 1  ;;  %v1728_v47 = vrot.slane %v1727_v42, 1  ;;  %v6359_v38 = vld [vmem:[%s8522_s4 + $0x30] sm:$0xff]   ;;  %v6360_v39 = vld [vmem:[%s8522_s4 + $0x38] sm:$0xff]  }
 0x286   : > { %v1721_v50 = vrot.slane %v1720_v44, 1  ;;  %v1735_v51 = vrot.slane %v1734_v45, 1 }
 0x287   : > { %v1715_v4 = vadd.f32 %v1714_v46, %v1713_v41  ;;  %v1729_v17 = vadd.f32 %v1728_v47, %v1727_v42  ;;  %v6047_v42 = vld [vmem:[%s8519_s1 + $0x10] ss:$0 sm:$0xff] }
 0x288   : > { %v1722_v54 = vadd.f32 %v1721_v50, %v1720_v44  ;;  %v1736_v55 = vadd.f32 %v1735_v51, %v1734_v45 }
 0x289   : > { %v1737_v56 = vmul.f32 0.5, %v1715_v4  ;;  %v1739_v57 = vmul.f32 0.5, %v1729_v17 }
 0x28a   : > { %v1738_v58 = vmul.f32 0.5, %v1722_v54  ;;  %v1740_v49 = vmul.f32 0.5, %v1736_v55 }
 0x28b   : > { %v1767_v60 = vadd.f32 1e-05, %v1737_v56  ;;  %v1769_v61 = vadd.f32 1e-05, %v1739_v57 }
 0x28c   : > { %v1768_v62 = vadd.f32 1e-05, %v1738_v58  ;;  %v1770_v63 = vadd.f32 1e-05, %v1740_v49 }
 0x28d   : > { %6361 = vrsqrt.f32 %v1767_v60 }
 0x28e   : > { %6363 = vrsqrt.f32 %v1769_v61 }
 0x28f   : > { %6365 = vrsqrt.f32 %v1768_v62 }
 0x290   : > { %6367 = vrsqrt.f32 %v1770_v63 }
 0x297   : > { %v6362_v8 = vpop.eup %6361 }
 0x298   : > { %v6364_v20 = vpop.eup %6363  ;;  %v1775_v11 = vmul.f32 %v6362_v8, %v1763_v6 }
 0x299   : > { %v6366_v14 = vpop.eup %6365  ;;  %v1777_v23 = vmul.f32 %v6364_v20, %v1765_v9  ;;  %v6080_v20 = vld [vmem:[%s8519_s1 + $0x11] ss:$0 sm:$0xff] }
 0x29a   : > { %v6368_v24 = vpop.eup %6367  ;;  %v1776_v25 = vmul.f32 %v6366_v14, %v1764_v12  ;;  %v1801_v26 = vadd.f32 %v1784_v7, %v1775_v11 }
 0x29b   : > { %v1778_v15 = vmul.f32 %v6368_v24, %v1766_v48  ;;  %v1803_v27 = vadd.f32 %v1792_v10, %v1777_v23  ;;  %v6082_v24 = vld [vmem:[%s8519_s1 + $0x13] ss:$0 sm:$0xff] }
 0x29c   : > { %v1802_v16 = vadd.f32 %v1788_v13, %v1776_v25  ;;  %v1805_v34 = vmax.f32 %v1801_v26, 0.0  ;;  %v6081_v13 = vld [vmem:[%s8519_s1 + $0x12] ss:$0 sm:$0xff] }
 0x29d   : > { %v1804_v53 = vadd.f32 %v1796_v33, %v1778_v15  ;;  %v1807_v18 = vmax.f32 %v1803_v27, 0.0 }
 0x29e   : > { %v1806_v37 = vmax.f32 %v1802_v16, 0.0  ;;  %v1809_v30 = vpack.c.bf16 %v1805_v34, %v1805_v34 }
 0x29f   : > { %v1808_v28 = vmax.f32 %v1804_v53, 0.0  ;;  %v1811_v43 = vpack.c.bf16 %v1807_v18, %v1807_v18 }
 0x2a0   : > { %v1810_v29 = vpack.c.bf16 %v1806_v37, %v1806_v37 }
 0x2a1   : > { %v1812_v19 = vpack.c.bf16 %v1808_v28, %v1808_v28 }
 0x2a2   : > { %2108 = vmatprep.mubr.bf16.mxu0 %v1810_v29 }
 0x2a3   : > { %2148 = vmatprep.mubr.bf16.mxu1 %v1812_v19  ;;  %2109 = vmatmul.mubr.bf16.vlgmr.msra.gmra.mrb[4].mxu0 %v1809_v30 }
 0x2a4   : > { %2149 = vmatmul.mubr.bf16.vlgmr.msra.gmra.mrb[4].mxu1 %v1811_v43  ;;  %6213 = vmatpush3.bf16.msra.mxu0 %v6353_v21 }
 0x2a5   : > { %6214 = vmatprep.subr.bf16.mxu0 %v6466_v22  ;;  %6228 = vmatprep.mubr.msk.bf16.mxu0 %vm6467_vm1, %v6466_v22 }
 0x2a8   : > { %6215 = vmatpush3.bf16.msra.mxu0 %v6354_v31 }
 0x2a9   : > { %6216 = vmatprep.subr.bf16.mxu0 %v6466_v22 }
 0x2ac   : > { %6217 = vmatpush3.bf16.msra.mxu0 %v6355_v32 }
 0x2ad   : > { %6218 = vmatprep.subr.bf16.mxu0 %v6466_v22 }
 0x2b0   : > { %6219 = vmatpush3.bf16.msra.mxu0 %v6356_v52 }
 0x2b1   : > { %6220 = vmatprep.subr.bf16.mxu0 %v6466_v22 }
 0x2b4   : > { %6221 = vmatpush3.bf16.msra.mxu0 %v6357_v35 }
 0x2b5   : > { %6222 = vmatprep.subr.bf16.mxu0 %v6466_v22 }
 0x2b8   : > { %6223 = vmatpush3.bf16.msra.mxu0 %v6358_v36 }
 0x2b9   : > { %6224 = vmatprep.subr.bf16.mxu0 %v6466_v22 }
 0x2bc   : > { %6225 = vmatpush3.bf16.msra.mxu0 %v6359_v38 }
 0x2bd   : > { %6226 = vmatprep.subr.bf16.mxu0 %v6466_v22 }
 0x2c0   : > { %6227 = vmatpush3.bf16.msra.mxu0 %v6360_v39 }
 0x376   : > { %v6172_v40 = vpop.f32.mrb[4].mxu0 }
 0x377   : > { %v6194_v41 = vpop.f32.mrb[4].mxu1  ;;  %v6173_v44 = vpop.f32.mrb[5].mxu0 }
 0x378   : > { %v6174_v45 = vadd.f32 %v6173_v44, %v6172_v40  ;;  %v6195_v46 = vpop.f32.mrb[5].mxu1  ;;  %v6175_v47 = vpop.f32.mrb[6].mxu0 }
 0x379   : > { %v6196_v50 = vadd.f32 %v6195_v46, %v6194_v41  ;;  %v6197_v51 = vpop.f32.mrb[6].mxu1  ;;  %v6176_v4 = vpop.f32.mrb[7].mxu0  ;;  %v6091_v41 = vld [vmem:[%s8519_s1 + $0x14] ss:$0 sm:$0xff] }
 0x37a   : > { %v2111_v17 = vadd.f32 %v6174_v45, %v6047_v42  ;;  %v6198_v54 = vpop.f32.mrb[7].mxu1  ;;  %v6092_v45 = vld [vmem:[%s8519_s1 + $0x15] ss:$0 sm:$0xff] }
 0x37c   : > { %v2151_v55 = vadd.f32 %v6196_v50, %v2111_v17 }
 0x37e   : > { %v2156_v56 = vsel %vm1667_vm0, %v2151_v55, 0.0 }
 0x37f   : > { %v2157_v57 = vrot.slane %v2156_v56, 4 }
 0x381   : > { %v2158_v58 = vadd.f32 %v2157_v57, %v2156_v56 }
 0x383   : > { %v2159_v49 = vrot.slane %v2158_v58, 2 }
 0x385   : > { %v2160_v60 = vadd.f32 %v2159_v49, %v2158_v58 }
 0x387   : > { %v2161_v61 = vrot.slane %v2160_v60, 1 }
 0x389   : > { %v2162_v62 = vadd.f32 %v2161_v61, %v2160_v60 }
 0x38b   : > { %v2163_v63 = vmul.f32 0.5, %v2162_v62 }
 0x38d   : > { %v2164_v0 = vsub.f32 %v2151_v55, %v2163_v63 }
 0x38f   : > { %v2165_v59 = vmul.f32 %v2164_v0, %v2164_v0  ;;  %v2181_v11 = vmul.f32 %v6080_v20, %v2164_v0 }
 0x391   : > { %v2166_v1 = vsel %vm1667_vm0, %v2165_v59, 0.0 }
 0x392   : > { %v2167_v2 = vrot.slane %v2166_v1, 4 }
 0x394   : > { %v2168_v3 = vadd.f32 %v2167_v2, %v2166_v1 }
 0x396   : > { %v2169_v5 = vrot.slane %v2168_v3, 2 }
 0x398   : > { %v2170_v6 = vadd.f32 %v2169_v5, %v2168_v3 }
 0x39a   : > { %v2171_v7 = vrot.slane %v2170_v6, 1 }
 0x39c   : > { %v2172_v8 = vadd.f32 %v2171_v7, %v2170_v6 }
 0x39e   : > { %v2173_v9 = vmul.f32 0.5, %v2172_v8 }
 0x3a0   : > { %v2182_v10 = vadd.f32 1e-05, %v2173_v9 }
 0x3a2   : > { %6369 = vrsqrt.f32 %v2182_v10 }
 0x3ac   : > { %v6370_v12 = vpop.eup %6369 }
 0x3ad   : > { %v2184_v14 = vmul.f32 %v6370_v12, %v2181_v11 }
 0x3af   : > { %v2192_v23 = vadd.f32 %v6081_v13, %v2184_v14 }
 0x3b1   : > { %v2193_v48 = vmax.f32 %v2192_v23, 0.0 }
 0x3b3   : > { %v2194_v33 = vpack.c.bf16 %v2193_v48, %v2193_v48 }
 0x3b5   : > { %6229 = vmatmul.mubr.bf16.vlgmr.msra.gmra.mrb[8].mxu0 %v2194_v33 }
 0x488   : > { %v2300_v25 = vpop.f32.mrb[8].mxu0 }
 0x489   : > { %v2301_v26 = vadd.f32 %v6082_v24, %v2300_v25  ;;  %v6230_v15 = vpop.f32.mrb[9].mxu0 }
 0x48a   : > { %v2303_v27 = vpop.f32.mrb[10].mxu0 }
 0x48b   : > { %v2307_v16 = vsel %vm2306_vm2, %v2301_v26, 0.0  ;;  %v6231_v53 = vpop.f32.mrb[11].mxu0 }
 0x48c   : > { %v2308_v34 = vrot.slane %v2307_v16, 4 }
 0x48e   : > { %v2309_v37 = vadd.f32 %v2308_v34, %v2307_v16 }
 0x490   : > { %v2310_v18 = vrot.slane %v2309_v37, 2 }
 0x492   : > { %v2311_v28 = vadd.f32 %v2310_v18, %v2309_v37 }
 0x494   : > { %v2312_v29 = vrot.slane %v2311_v28, 1 }
 0x496   : > { %v2313_v19 = vadd.f32 %v2312_v29, %v2311_v28 }
 0x498   : > { %v2314_v30 = vmul.f32 0.5, %v2313_v19 }
 0x49a   : > { %v2315_v43 = vsub.f32 %v2301_v26, %v2314_v30 }
 0x49c   : > { %v2316_v21 = vmul.f32 %v2315_v43, %v2315_v43  ;;  %v2332_v42 = vmul.f32 %v6091_v41, %v2315_v43 }
 0x49e   : > { %v2317_v22 = vsel %vm2306_vm2, %v2316_v21, 0.0 }
 0x49f   : > { %v2318_v31 = vrot.slane %v2317_v22, 4 }
 0x4a1   : > { %v2319_v32 = vadd.f32 %v2318_v31, %v2317_v22 }
 0x4a3   : > { %v2320_v52 = vrot.slane %v2319_v32, 2 }
 0x4a5   : > { %v2321_v35 = vadd.f32 %v2320_v52, %v2319_v32 }
 0x4a7   : > { %v2322_v36 = vrot.slane %v2321_v35, 1 }
 0x4a9   : > { %v2323_v38 = vadd.f32 %v2322_v36, %v2321_v35 }
 0x4ab   : > { %v2324_v39 = vmul.f32 0.5, %v2323_v38 }
 0x4ad   : > { %v2333_v40 = vadd.f32 1e-05, %v2324_v39 }
 0x4af   : > { %6371 = vrsqrt.f32 %v2333_v40 }
 0x4b9   : > { %v6372_v44 = vpop.eup %6371 }
 0x4ba   : > { %v2335_v46 = vmul.f32 %v6372_v44, %v2332_v42 }
 0x4bc   : > { %v2343_v47 = vadd.f32 %v6092_v45, %v2335_v46 }
 0x4be   : > { %v2344_v50 = vmax.f32 %v2343_v47, 0.0 }
 0x4c0   : > { %2345 = vst.msk [vmem:[#allocation2] sm:$0x3] %vm2306_vm2, %v2344_v50 }
 0x4c1 PF: > { %v2349_v51 = vld [vmem:[%s6557_s30 + $0x8] sm:$0xff]  ;;  %v2351_v4 = vld [vmem:[%s6557_s30 + $0x18] sm:$0xff]  ;;  %v2348_v17 = vld [vmem:[%s6557_s30] sm:$0xff]  ;;  %v6468_v49 = vmov 0   ;;  %vm2474_vm3 = vcmask 261120   ;;  %p6115_p5 = scmp.ne.s32.totalorder %s6544_s22, 3 }
 0x4c2   : > { %v2391_v54 = vunpack.c.l.s8.bf16 %v2349_v51  ;;  %v2433_v55 = vunpack.c.h.s8.bf16 %v2349_v51  ;;  %v2393_v56 = vunpack.c.l.s8.bf16 %v2351_v4  ;;  %v2435_v57 = vunpack.c.h.s8.bf16 %v2351_v4  ;;  %v2350_v58 = vld [vmem:[%s6557_s30 + $0x10] sm:$0xff]  ;;  %2510 = vmatprep.mubr.bf16.mxu0 %v6468_v49  ;;  %2551 = vmatprep.mubr.bf16.mxu1 %v6468_v49  ;;  %v2353_v62 = vld [vmem:[%s6557_s30 + $0x28] sm:$0xff]  ;;  %v2355_v63 = vld [vmem:[%s6557_s30 + $0x38] sm:$0xff] }
 0x4c3   : > { %v2390_v60 = vunpack.c.l.s8.bf16 %v2348_v17  ;;  %v2392_v61 = vunpack.c.l.s8.bf16 %v2350_v58  ;;  %v2432_v0 = vunpack.c.h.s8.bf16 %v2348_v17  ;;  %v2434_v59 = vunpack.c.h.s8.bf16 %v2350_v58  ;;  %v2352_v5 = vld [vmem:[%s6557_s30 + $0x20] sm:$0xff]  ;;  %v2354_v6 = vld [vmem:[%s6557_s30 + $0x30] sm:$0xff]  ;;  %v2357_v11 = vld [vmem:[%s6557_s30 + $0x48] sm:$0xff] }
 0x4c4   : > { %2478 = vmatprep.subr.bf16.mxu0 %v2391_v54  ;;  %2519 = vmatprep.subr.bf16.mxu1 %v2393_v56  ;;  %v2395_v2 = vunpack.c.l.s8.bf16 %v2353_v62  ;;  %v2397_v3 = vunpack.c.l.s8.bf16 %v2355_v63  ;;  %v2394_v8 = vunpack.c.l.s8.bf16 %v2352_v5  ;;  %v2396_v9 = vunpack.c.l.s8.bf16 %v2354_v6  ;;  %v2359_v12 = vld [vmem:[%s6557_s30 + $0x58] sm:$0xff]  ;;  %v2356_v33 = vld [vmem:[%s6557_s30 + $0x40] sm:$0xff]  ;;  %v2358_v24 = vld [vmem:[%s6557_s30 + $0x50] sm:$0xff] }
 0x4c5   : > { %2479 = vmatpush1.bf16.msra.mxu0 %v2390_v60  ;;  %2520 = vmatpush1.bf16.msra.mxu1 %v2392_v61  ;;  %v2437_v10 = vunpack.c.h.s8.bf16 %v2353_v62  ;;  %v2439_v20 = vunpack.c.h.s8.bf16 %v2355_v63  ;;  %v2436_v13 = vunpack.c.h.s8.bf16 %v2352_v5  ;;  %v2438_v14 = vunpack.c.h.s8.bf16 %v2354_v6  ;;  %v2361_v16 = vld [vmem:[%s6557_s30 + $0x68] sm:$0xff]  ;;  %v2363_v53 = vld [vmem:[%s6557_s30 + $0x78] sm:$0xff]  ;;  %v2360_v29 = vld [vmem:[%s6557_s30 + $0x60] sm:$0xff] }
 0x4c6   : > { %2480 = vmatprep.subr.bf16.mxu0 %v2433_v55  ;;  %2521 = vmatprep.subr.bf16.mxu1 %v2435_v57  ;;  %v2399_v23 = vunpack.c.l.s8.bf16 %v2357_v11  ;;  %v2401_v48 = vunpack.c.l.s8.bf16 %v2359_v12  ;;  %v2398_v25 = vunpack.c.l.s8.bf16 %v2356_v33  ;;  %v2400_v26 = vunpack.c.l.s8.bf16 %v2358_v24  ;;  %v2362_v19 = vld [vmem:[%s6557_s30 + $0x70] sm:$0xff]  ;;  %v2365_v31 = vld [vmem:[%s6557_s30 + $0x88] sm:$0xff]  ;;  %v2367_v32 = vld [vmem:[%s6557_s30 + $0x98] sm:$0xff] }
 0x4c7   : > { %v2346_v1 = vld [vmem:[#allocation2] sm:$0x3]  ;;  %v2441_v15 = vunpack.c.h.s8.bf16 %v2357_v11  ;;  %v2443_v27 = vunpack.c.h.s8.bf16 %v2359_v12  ;;  %v2440_v34 = vunpack.c.h.s8.bf16 %v2356_v33  ;;  %v2442_v37 = vunpack.c.h.s8.bf16 %v2358_v24  ;;  %v2366_v40 = vld [vmem:[%s6557_s30 + $0x90] sm:$0xff]  ;;  %v2369_v46 = vld [vmem:[%s6557_s30 + $0xa8] sm:$0xff] }
 0x4c8   : > { %v7422_v7 = vpack.c.bf16 %v2346_v1, %v2346_v1  ;;  %v2403_v18 = vunpack.c.l.s8.bf16 %v2361_v16  ;;  %v2405_v28 = vunpack.c.l.s8.bf16 %v2363_v53  ;;  %v2402_v30 = vunpack.c.l.s8.bf16 %v2360_v29  ;;  %v2364_v39 = vld [vmem:[%s6557_s30 + $0x80] sm:$0xff]  ;;  %v2371_v47 = vld [vmem:[%s6557_s30 + $0xb8] sm:$0xff]  ;;  %v2370_v55 = vld [vmem:[%s6557_s30 + $0xb0] sm:$0xff] }
 0x4c9   : > { %2481 = vmatpush1.bf16.msra.mxu0 %v2432_v0  ;;  %2522 = vmatpush1.bf16.msra.mxu1 %v2434_v59  ;;  %v2404_v43 = vunpack.c.l.s8.bf16 %v2362_v19  ;;  %v2445_v21 = vunpack.c.h.s8.bf16 %v2361_v16  ;;  %v2447_v22 = vunpack.c.h.s8.bf16 %v2363_v53  ;;  %v2444_v52 = vunpack.c.h.s8.bf16 %v2360_v29  ;;  %v2368_v54 = vld [vmem:[%s6557_s30 + $0xa0] sm:$0xff]  ;;  %v2373_v61 = vld [vmem:[%s6557_s30 + $0xc8] sm:$0xff]  ;;  %v2375_v62 = vld [vmem:[%s6557_s30 + $0xd8] sm:$0xff] }
 0x4ca   : > { %2560 = vmatprep.subr.bf16.mxu0 %v2395_v2  ;;  %2601 = vmatprep.subr.bf16.mxu1 %v2397_v3  ;;  %v2446_v35 = vunpack.c.h.s8.bf16 %v2362_v19  ;;  %v2407_v36 = vunpack.c.l.s8.bf16 %v2365_v31  ;;  %v2409_v38 = vunpack.c.l.s8.bf16 %v2367_v32  ;;  %v2406_v41 = vunpack.c.l.s8.bf16 %v2364_v39  ;;  %v2372_v2 = vld [vmem:[%s6557_s30 + $0xc0] sm:$0xff]  ;;  %v2374_v3 = vld [vmem:[%s6557_s30 + $0xd0] sm:$0xff] }
 0x4cb   : > { %v2408_v42 = vunpack.c.l.s8.bf16 %v2366_v40  ;;  %v2449_v44 = vunpack.c.h.s8.bf16 %v2365_v31  ;;  %v2451_v45 = vunpack.c.h.s8.bf16 %v2367_v32  ;;  %v2448_v50 = vunpack.c.h.s8.bf16 %v2364_v39 }
 0x4cc   : > { %6093 = vmatmul.mubr.msk.bf16.vlgmr.msra.gmra.mrb[0].mxu0 %vm2474_vm3, %v7422_v7  ;;  %6094 = vmatmul.mubr.msk.bf16.vlgmr.msra.gmra.mrb[0].mxu1 %vm2474_vm3, %v7422_v7  ;;  %v2450_v51 = vunpack.c.h.s8.bf16 %v2366_v40  ;;  %v2411_v4 = vunpack.c.l.s8.bf16 %v2369_v46  ;;  %v2413_v17 = vunpack.c.l.s8.bf16 %v2371_v47  ;;  %v2410_v56 = vunpack.c.l.s8.bf16 %v2368_v54 }
 0x4cd   : > { %2561 = vmatpush1.bf16.msra.mxu0 %v2394_v8  ;;  %2602 = vmatpush1.bf16.msra.mxu1 %v2396_v9  ;;  %v2412_v57 = vunpack.c.l.s8.bf16 %v2370_v55  ;;  %v2453_v58 = vunpack.c.h.s8.bf16 %v2369_v46  ;;  %v2455_v60 = vunpack.c.h.s8.bf16 %v2371_v47  ;;  %v2452_v63 = vunpack.c.h.s8.bf16 %v2368_v54 }
 0x4ce   : > { %2562 = vmatprep.subr.bf16.mxu0 %v2437_v10  ;;  %2603 = vmatprep.subr.bf16.mxu1 %v2439_v20  ;;  %v2454_v0 = vunpack.c.h.s8.bf16 %v2370_v55  ;;  %v2415_v59 = vunpack.c.l.s8.bf16 %v2373_v61  ;;  %v2417_v1 = vunpack.c.l.s8.bf16 %v2375_v62  ;;  %v2414_v5 = vunpack.c.l.s8.bf16 %v2372_v2  ;;  %v2377_v10 = vld [vmem:[%s6557_s30 + $0xe8] sm:$0xff]  ;;  %v2379_v20 = vld [vmem:[%s6557_s30 + $0xf8] sm:$0xff] }
 0x4cf   : > { %2592 = vmatprep.mubr.bf16.mxu0 %v6468_v49  ;;  %2633 = vmatprep.mubr.bf16.mxu1 %v6468_v49  ;;  %v2416_v6 = vunpack.c.l.s8.bf16 %v2374_v3  ;;  %v2457_v8 = vunpack.c.h.s8.bf16 %v2373_v61  ;;  %v2459_v9 = vunpack.c.h.s8.bf16 %v2375_v62  ;;  %v2456_v11 = vunpack.c.h.s8.bf16 %v2372_v2  ;;  %v7529_v62 = vld [vmem:[%s6562_s15] sm:$0xff] }
 0x4d0   : > { %v2458_v12 = vunpack.c.h.s8.bf16 %v2374_v3  ;;  %v3351_v54 = vlaneseq  ;;  %vm6471_vm4 = vmmov (!%p6115_p5), 0   ;;  %vm4176_vm5 = vcmask (!%p6115_p5), 1041408  }
 0x4d1   : > { %2563 = vmatpush1.bf16.msra.mxu0 %v2436_v13  ;;  %2604 = vmatpush1.bf16.msra.mxu1 %v2438_v14  ;;  %v2419_v13 = vunpack.c.l.s8.bf16 %v2377_v10  ;;  %v2421_v14 = vunpack.c.l.s8.bf16 %v2379_v20 }
 0x4d2   : > { %2642 = vmatprep.subr.bf16.mxu0 %v2399_v23  ;;  %2683 = vmatprep.subr.bf16.mxu1 %v2401_v48  ;;  %v2376_v23 = vld [vmem:[%s6557_s30 + $0xe0] sm:$0xff]  ;;  %v2378_v48 = vld [vmem:[%s6557_s30 + $0xf0] sm:$0xff]  ;;  %v3352_v55 = vshrl.u32 %v3351_v54, 7  ;;  %v3340_v54 = vld [vmem:[%s6552_s27 + $0x8] sm:$0xff] }
 0x4d3   : > { %v2418_v33 = vunpack.c.l.s8.bf16 %v2376_v23  ;;  %v2420_v24 = vunpack.c.l.s8.bf16 %v2378_v48  ;;  %v2460_v16 = vunpack.c.h.s8.bf16 %v2376_v23  ;;  %v2462_v53 = vunpack.c.h.s8.bf16 %v2378_v48 }
 0x4d4   : > { %6095 = vmatmul.mubr.msk.bf16.vlgmr.msra.gmra.mrb[4].mxu0 %vm2474_vm3, %v7422_v7  ;;  %6096 = vmatmul.mubr.msk.bf16.vlgmr.msra.gmra.mrb[4].mxu1 %vm2474_vm3, %v7422_v7  ;;  %v7526_v61 = vsub.s32 3, %v3352_v55  ;;  %v7543_v23 = vsub.s32 4, %v3352_v55  ;;  %v7545_v48 = vsub.s32 6, %v3352_v55 }
 0x4d5   : > { %2643 = vmatpush1.bf16.msra.mxu0 %v2398_v25  ;;  %2684 = vmatpush1.bf16.msra.mxu1 %v2400_v26  ;;  %v2461_v25 = vunpack.c.h.s8.bf16 %v2377_v10  ;;  %v2463_v26 = vunpack.c.h.s8.bf16 %v2379_v20 }
 0x4d6   : > { %2644 = vmatprep.subr.bf16.mxu0 %v2441_v15  ;;  %2685 = vmatprep.subr.bf16.mxu1 %v2443_v27  ;;  %v2381_v15 = vld [vmem:[%s6557_s30 + $0x108] sm:$0xff]  ;;  %v2383_v27 = vld [vmem:[%s6557_s30 + $0x118] sm:$0xff]  ;;  %v3630_v20 = vrot.slane %v7529_v62, %v7526_v61 }
 0x4d7   : > { %2674 = vmatprep.mubr.bf16.mxu0 %v6468_v49  ;;  %2715 = vmatprep.mubr.bf16.mxu1 %v6468_v49 }
 0x4d9   : > { %2645 = vmatpush1.bf16.msra.mxu0 %v2440_v34  ;;  %2686 = vmatpush1.bf16.msra.mxu1 %v2442_v37  ;;  %v2423_v34 = vunpack.c.l.s8.bf16 %v2381_v15  ;;  %v2425_v37 = vunpack.c.l.s8.bf16 %v2383_v27 }
 0x4da   : > { %2724 = vmatprep.subr.bf16.mxu0 %v2403_v18  ;;  %2765 = vmatprep.subr.bf16.mxu1 %v2405_v28  ;;  %v2380_v18 = vld [vmem:[%s6557_s30 + $0x100] sm:$0xff]  ;;  %v2382_v28 = vld [vmem:[%s6557_s30 + $0x110] sm:$0xff] }
 0x4db   : > { %v2422_v29 = vunpack.c.l.s8.bf16 %v2380_v18  ;;  %v2424_v19 = vunpack.c.l.s8.bf16 %v2382_v28  ;;  %v2464_v31 = vunpack.c.h.s8.bf16 %v2380_v18  ;;  %v2466_v32 = vunpack.c.h.s8.bf16 %v2382_v28 }
 0x4dc   : > { %6097 = vmatmul.mubr.msk.bf16.vlgmr.msra.gmra.mrb[8].mxu0 %vm2474_vm3, %v7422_v7  ;;  %6098 = vmatmul.mubr.msk.bf16.vlgmr.msra.gmra.mrb[8].mxu1 %vm2474_vm3, %v7422_v7 }
 0x4dd   : > { %2725 = vmatpush1.bf16.msra.mxu0 %v2402_v30  ;;  %2766 = vmatpush1.bf16.msra.mxu1 %v2404_v43  ;;  %v2465_v30 = vunpack.c.h.s8.bf16 %v2381_v15  ;;  %v2467_v43 = vunpack.c.h.s8.bf16 %v2383_v27  ;;  %v7547_v15 = vsub.s32 5, %v3352_v55  ;;  %v7549_v27 = vsub.s32 7, %v3352_v55 }
 0x4de   : > { %2726 = vmatprep.subr.bf16.mxu0 %v2445_v21  ;;  %2767 = vmatprep.subr.bf16.mxu1 %v2447_v22  ;;  %v2385_v21 = vld [vmem:[%s6557_s30 + $0x128] sm:$0xff]  ;;  %v2387_v22 = vld [vmem:[%s6557_s30 + $0x138] sm:$0xff] }
 0x4df   : > { %2756 = vmatprep.mubr.bf16.mxu0 %v6468_v49  ;;  %2797 = vmatprep.mubr.bf16.mxu1 %v6468_v49 }
 0x4e1   : > { %2727 = vmatpush1.bf16.msra.mxu0 %v2444_v52  ;;  %2768 = vmatpush1.bf16.msra.mxu1 %v2446_v35  ;;  %v2427_v52 = vunpack.c.l.s8.bf16 %v2385_v21  ;;  %v2429_v35 = vunpack.c.l.s8.bf16 %v2387_v22 }
 0x4e2   : > { %2806 = vmatprep.subr.bf16.mxu0 %v2407_v36  ;;  %2847 = vmatprep.subr.bf16.mxu1 %v2409_v38  ;;  %v2384_v36 = vld [vmem:[%s6557_s30 + $0x120] sm:$0xff]  ;;  %v2386_v38 = vld [vmem:[%s6557_s30 + $0x130] sm:$0xff] }
 0x4e3   : > { %v2426_v39 = vunpack.c.l.s8.bf16 %v2384_v36  ;;  %v2428_v40 = vunpack.c.l.s8.bf16 %v2386_v38  ;;  %v2470_v46 = vunpack.c.h.s8.bf16 %v2386_v38 }
 0x4e4   : > { %6099 = vmatmul.mubr.msk.bf16.vlgmr.msra.gmra.mrb[12].mxu0 %vm2474_vm3, %v7422_v7  ;;  %6100 = vmatmul.mubr.msk.bf16.vlgmr.msra.gmra.mrb[12].mxu1 %vm2474_vm3, %v7422_v7 }
 0x4e5   : > { %2807 = vmatpush1.bf16.msra.mxu0 %v2406_v41  ;;  %2848 = vmatpush1.bf16.msra.mxu1 %v2408_v42  ;;  %v2469_v41 = vunpack.c.h.s8.bf16 %v2385_v21  ;;  %v2471_v42 = vunpack.c.h.s8.bf16 %v2387_v22 }
 0x4e6   : > { %2808 = vmatprep.subr.bf16.mxu0 %v2449_v44  ;;  %2849 = vmatprep.subr.bf16.mxu1 %v2451_v45  ;;  %v2389_v44 = vld [vmem:[%s6557_s30 + $0x148] sm:$0xff]  ;;  %v2468_v45 = vunpack.c.h.s8.bf16 %v2384_v36 }
 0x4e7   : > { %2838 = vmatprep.mubr.bf16.mxu0 %v6468_v49  ;;  %2879 = vmatprep.mubr.bf16.mxu1 %v6468_v49  ;;  %v2431_v47 = vunpack.c.l.s8.bf16 %v2389_v44 }
 0x4e9   : > { %2809 = vmatpush1.bf16.msra.mxu0 %v2448_v50  ;;  %2850 = vmatpush1.bf16.msra.mxu1 %v2450_v51  ;;  %v2388_v50 = vld [vmem:[%s6557_s30 + $0x140] sm:$0xff] }
 0x4ea   : > { %2888 = vmatprep.subr.bf16.mxu0 %v2411_v4  ;;  %2929 = vmatprep.subr.bf16.mxu1 %v2413_v17  ;;  %v2430_v51 = vunpack.c.l.s8.bf16 %v2388_v50  ;;  %v2473_v4 = vunpack.c.h.s8.bf16 %v2389_v44  ;;  %v2472_v17 = vunpack.c.h.s8.bf16 %v2388_v50 }
 0x4ec   : > { %6101 = vmatmul.mubr.msk.bf16.vlgmr.msra.gmra.mrb[16].mxu0 %vm2474_vm3, %v7422_v7  ;;  %6102 = vmatmul.mubr.msk.bf16.vlgmr.msra.gmra.mrb[16].mxu1 %vm2474_vm3, %v7422_v7 }
 0x4ed   : > { %2889 = vmatpush1.bf16.msra.mxu0 %v2410_v56  ;;  %2930 = vmatpush1.bf16.msra.mxu1 %v2412_v57  ;;  %v7519_v56 = vsub.s32 0, %v3352_v55  ;;  %v7521_v57 = vsub.s32 2, %v3352_v55 }
 0x4ee   : > { %2890 = vmatprep.subr.bf16.mxu0 %v2453_v58  ;;  %2931 = vmatprep.subr.bf16.mxu1 %v2455_v60  ;;  %v3339_v58 = vld [vmem:[%s6552_s27] sm:$0xff]  ;;  %v7524_v60 = vsub.s32 1, %v3352_v55 }
 0x4ef   : > { %2920 = vmatprep.mubr.bf16.mxu0 %v6468_v49  ;;  %2961 = vmatprep.mubr.bf16.mxu1 %v6468_v49  ;;  %v3366_v2 = vrot.slane %v3339_v58, %v7526_v61  ;;  %v3618_v3 = vrot.slane %v7529_v62, %v7519_v56  ;;  %v3374_v22 = vrot.slane %v3339_v58, %v7547_v15 }
 0x4f1   : > { %2891 = vmatpush1.bf16.msra.mxu0 %v2452_v63  ;;  %2932 = vmatpush1.bf16.msra.mxu1 %v2454_v0  ;;  %v6469_v63 = vmov 1983009808   ;;  %v3354_v0 = vrot.slane %v3339_v58, %v7519_v56 }
 0x4f2   : > { %2970 = vmatprep.subr.bf16.mxu0 %v2415_v59  ;;  %3011 = vmatprep.subr.bf16.mxu1 %v2417_v1  ;;  %v3362_v59 = vrot.slane %v3339_v58, %v7521_v57  ;;  %v3358_v1 = vrot.slane %v3339_v58, %v7524_v60 }
 0x4f4   : > { %6103 = vmatmul.mubr.msk.bf16.vlgmr.msra.gmra.mrb[20].mxu0 %vm2474_vm3, %v7422_v7  ;;  %6104 = vmatmul.mubr.msk.bf16.vlgmr.msra.gmra.mrb[20].mxu1 %vm2474_vm3, %v7422_v7 }
 0x4f5   : > { %2971 = vmatpush1.bf16.msra.mxu0 %v2414_v5  ;;  %3012 = vmatpush1.bf16.msra.mxu1 %v2416_v6  ;;  %v3626_v5 = vrot.slane %v7529_v62, %v7521_v57 }
 0x4f6   : > { %2972 = vmatprep.subr.bf16.mxu0 %v2457_v8  ;;  %3013 = vmatprep.subr.bf16.mxu1 %v2459_v9  ;;  %v3622_v9 = vrot.slane %v7529_v62, %v7524_v60 }
 0x4f7   : > { %3002 = vmatprep.mubr.bf16.mxu0 %v6468_v49  ;;  %3043 = vmatprep.mubr.bf16.mxu1 %v6468_v49 }
 0x4f9   : > { %2973 = vmatpush1.bf16.msra.mxu0 %v2456_v11  ;;  %3014 = vmatpush1.bf16.msra.mxu1 %v2458_v12 }
 0x4fa   : > { %3052 = vmatprep.subr.bf16.mxu0 %v2419_v13  ;;  %3093 = vmatprep.subr.bf16.mxu1 %v2421_v14 }
 0x4fc   : > { %6105 = vmatmul.mubr.msk.bf16.vlgmr.msra.gmra.mrb[24].mxu0 %vm2474_vm3, %v7422_v7  ;;  %6106 = vmatmul.mubr.msk.bf16.vlgmr.msra.gmra.mrb[24].mxu1 %vm2474_vm3, %v7422_v7 }
 0x4fd   : > { %3053 = vmatpush1.bf16.msra.mxu0 %v2418_v33  ;;  %3094 = vmatpush1.bf16.msra.mxu1 %v2420_v24 }
 0x4fe   : > { %3054 = vmatprep.subr.bf16.mxu0 %v2461_v25  ;;  %3095 = vmatprep.subr.bf16.mxu1 %v2463_v26 }
 0x4ff   : > { %3084 = vmatprep.mubr.bf16.mxu0 %v6468_v49  ;;  %3125 = vmatprep.mubr.bf16.mxu1 %v6468_v49 }
 0x501   : > { %3055 = vmatpush1.bf16.msra.mxu0 %v2460_v16  ;;  %3096 = vmatpush1.bf16.msra.mxu1 %v2462_v53 }
 0x502   : > { %3134 = vmatprep.subr.bf16.mxu0 %v2423_v34  ;;  %3175 = vmatprep.subr.bf16.mxu1 %v2425_v37 }
 0x504   : > { %6107 = vmatmul.mubr.msk.bf16.vlgmr.msra.gmra.mrb[28].mxu0 %vm2474_vm3, %v7422_v7  ;;  %6108 = vmatmul.mubr.msk.bf16.vlgmr.msra.gmra.mrb[28].mxu1 %vm2474_vm3, %v7422_v7 }
 0x505   : > { %3135 = vmatpush1.bf16.msra.mxu0 %v2422_v29  ;;  %3176 = vmatpush1.bf16.msra.mxu1 %v2424_v19  ;;  %v3370_v19 = vrot.slane %v3339_v58, %v7543_v23 }
 0x506   : > { %3136 = vmatprep.subr.bf16.mxu0 %v2465_v30  ;;  %3177 = vmatprep.subr.bf16.mxu1 %v2467_v43  ;;  %v3378_v30 = vrot.slane %v3339_v58, %v7545_v48 }
 0x507   : > { %3166 = vmatprep.mubr.bf16.mxu0 %v6468_v49  ;;  %3207 = vmatprep.mubr.bf16.mxu1 %v6468_v49 }
 0x509   : > { %3137 = vmatpush1.bf16.msra.mxu0 %v2464_v31  ;;  %3178 = vmatpush1.bf16.msra.mxu1 %v2466_v32  ;;  %v3382_v31 = vrot.slane %v3339_v58, %v7549_v27  ;;  %v3634_v32 = vrot.slane %v7529_v62, %v7543_v23 }
 0x50a   : > { %3216 = vmatprep.subr.bf16.mxu0 %v2427_v52  ;;  %3257 = vmatprep.subr.bf16.mxu1 %v2429_v35  ;;  %v3642_v52 = vrot.slane %v7529_v62, %v7545_v48 }
 0x50c   : > { %6109 = vmatmul.mubr.msk.bf16.vlgmr.msra.gmra.mrb[32].mxu0 %vm2474_vm3, %v7422_v7  ;;  %6110 = vmatmul.mubr.msk.bf16.vlgmr.msra.gmra.mrb[32].mxu1 %vm2474_vm3, %v7422_v7 }
 0x50d   : > { %3217 = vmatpush1.bf16.msra.mxu0 %v2426_v39  ;;  %3258 = vmatpush1.bf16.msra.mxu1 %v2428_v40  ;;  %v3638_v40 = vrot.slane %v7529_v62, %v7547_v15 }
 0x50e   : > { %3218 = vmatprep.subr.bf16.mxu0 %v2469_v41  ;;  %3259 = vmatprep.subr.bf16.mxu1 %v2471_v42  ;;  %v3646_v41 = vrot.slane %v7529_v62, %v7549_v27  ;;  %v3386_v62 = vrot.slane %v3340_v54, %v7519_v56 }
 0x50f   : > { %3248 = vmatprep.mubr.bf16.mxu0 %v6468_v49  ;;  %3289 = vmatprep.mubr.bf16.mxu1 %v6468_v49 }
 0x511   : > { %3219 = vmatpush1.bf16.msra.mxu0 %v2468_v45  ;;  %3260 = vmatpush1.bf16.msra.mxu1 %v2470_v46 }
 0x512   : > { %3298 = vmatprep.subr.bf16.mxu0 %v2431_v47 }
 0x514   : > { %6111 = vmatmul.mubr.msk.bf16.vlgmr.msra.gmra.mrb[36].mxu0 %vm2474_vm3, %v7422_v7  ;;  %6112 = vmatmul.mubr.msk.bf16.vlgmr.msra.gmra.mrb[36].mxu1 %vm2474_vm3, %v7422_v7 }
 0x515   : > { %3299 = vmatpush1.bf16.msra.mxu0 %v2430_v51  ;;  %3330 = vmatprep.mubr.bf16.mxu0 %v6468_v49  ;;  %v3912_v49 = vunpack.c.l.s4 %v6469_v63 }
 0x516   : > { %3300 = vmatprep.subr.bf16.mxu0 %v2473_v4 }
 0x517   : > { %v3913_v10 = vunpack.c.0.s8 %v3912_v49 }
 0x519   : > { %3301 = vmatpush1.bf16.msra.mxu0 %v2472_v17  ;;  %v7551_v28 = vsub.s32 %v3913_v10, %v3352_v55 }
 0x51c   : > { %6113 = vmatmul.mubr.msk.bf16.vlgmr.msra.gmra.mrb[40].mxu0 %vm2474_vm3, %v7422_v7 }
 0x59f   : > { %v2512_v6 = vpop.f32.mrb[0].mxu0  ;;  %v2553_v8 = vpop.f32.mrb[0].mxu1 }
 0x5a0   : > { %v3561_v11 = vmul.f32 %v3354_v0, %v2512_v6  ;;  %v3563_v12 = vmul.f32 %v3362_v59, %v2553_v8  ;;  %v2514_v13 = vpop.f32.mrb[1].mxu0  ;;  %v2555_v14 = vpop.f32.mrb[1].mxu1  ;;  %v3390_v6 = vrot.slane %v3340_v54, %v7524_v60  ;;  %v3398_v8 = vrot.slane %v3340_v54, %v7526_v61 }
 0x5a1   : > { %v3562_v33 = vmul.f32 %v3358_v1, %v2514_v13  ;;  %v3564_v24 = vmul.f32 %v3366_v2, %v2555_v14  ;;  %v2516_v25 = vpop.f32.mrb[2].mxu0  ;;  %v2557_v26 = vpop.f32.mrb[2].mxu1  ;;  %v3604_v1 = vld [vmem:[%s6562_s15 + $0x8] sm:$0xff]  ;;  %v3394_v2 = vrot.slane %v3340_v54, %v7521_v57 }
 0x5a2   : > { %v3825_v16 = vadd.f32 %v3618_v3, %v3561_v11  ;;  %v3827_v53 = vadd.f32 %v3626_v5, %v3563_v12  ;;  %v2517_v34 = vpop.f32.mrb[3].mxu0  ;;  %v2558_v37 = vpop.f32.mrb[3].mxu1  ;;  %v3658_v10 = vrot.slane %v3604_v1, %v7521_v57  ;;  %v3654_v14 = vrot.slane %v3604_v1, %v7524_v60 }
 0x5a3   : > { %v3826_v18 = vadd.f32 %v3622_v9, %v3562_v33  ;;  %v3828_v29 = vadd.f32 %v3630_v20, %v3564_v24  ;;  %v3650_v9 = vrot.slane %v3604_v1, %v7519_v56  ;;  %v3662_v33 = vrot.slane %v3604_v1, %v7526_v61 }
 0x5a5   : > { %v3909_v43 = vcombine.low %v3825_v16, %v3826_v18  ;;  %v3910_v21 = vcombine.low %v3827_v53, %v3828_v29 }
 0x5a7   : > { %v3917_v35 = vrot.slane %v3909_v43, %v7551_v28  ;;  %v3924_v36 = vrot.slane %v3910_v21, %v7551_v28  ;;  %v2594_v38 = vpop.f32.mrb[4].mxu0  ;;  %v2635_v39 = vpop.f32.mrb[4].mxu1 }
 0x5a8   : > { %v3565_v42 = vmul.f32 %v3370_v19, %v2594_v38  ;;  %v3567_v44 = vmul.f32 %v3378_v30, %v2635_v39  ;;  %v2596_v45 = vpop.f32.mrb[5].mxu0  ;;  %v2637_v46 = vpop.f32.mrb[5].mxu1  ;;  %v3406_v38 = vrot.slane %v3340_v54, %v7547_v15  ;;  %v3414_v39 = vrot.slane %v3340_v54, %v7549_v27 }
 0x5a9   : > { %v3925_v47 = vcombine.low %v3917_v35, %v3924_v36  ;;  %v3566_v50 = vmul.f32 %v3374_v22, %v2596_v45  ;;  %v3568_v51 = vmul.f32 %v3382_v31, %v2637_v46  ;;  %v2598_v4 = vpop.f32.mrb[6].mxu0  ;;  %v2639_v17 = vpop.f32.mrb[6].mxu1 }
 0x5aa   : > { %v3829_v55 = vadd.f32 %v3634_v32, %v3565_v42  ;;  %v3831_v58 = vadd.f32 %v3642_v52, %v3567_v44  ;;  %v2599_v63 = vpop.f32.mrb[7].mxu0  ;;  %v2640_v49 = vpop.f32.mrb[7].mxu1  ;;  %v3402_v32 = vrot.slane %v3340_v54, %v7543_v23  ;;  %v3410_v52 = vrot.slane %v3340_v54, %v7545_v48 }
 0x5ab   : > { %4098 = vst [vmem:[%s6567_s19] sm:$0xff] %v3925_v47  ;;  %v3830_v0 = vadd.f32 %v3638_v40, %v3566_v50  ;;  %v3832_v59 = vadd.f32 %v3646_v41, %v3568_v51  ;;  %v3666_v40 = vrot.slane %v3604_v1, %v7543_v23  ;;  %v3674_v41 = vrot.slane %v3604_v1, %v7545_v48 }
 0x5ac   : > { %v3670_v47 = vrot.slane %v3604_v1, %v7547_v15  ;;  %v3678_v50 = vrot.slane %v3604_v1, %v7549_v27 }
 0x5ad   : > { %v3926_v3 = vcombine.low %v3829_v55, %v3830_v0  ;;  %v3927_v5 = vcombine.low %v3831_v58, %v3832_v59  ;;  %v3341_v59 = vld [vmem:[%s6552_s27 + $0x10] sm:$0xff] }
 0x5ae   : > { %v3418_v1 = vrot.slane %v3341_v59, %v7519_v56 }
 0x5af   : > { %v3934_v20 = vrot.slane %v3926_v3, %v7551_v28  ;;  %v3941_v11 = vrot.slane %v3927_v5, %v7551_v28  ;;  %v2676_v12 = vpop.f32.mrb[8].mxu0  ;;  %v2717_v13 = vpop.f32.mrb[8].mxu1 }
 0x5b0   : > { %v3569_v24 = vmul.f32 %v3386_v62, %v2676_v12  ;;  %v3571_v25 = vmul.f32 %v3394_v2, %v2717_v13  ;;  %v2678_v26 = vpop.f32.mrb[9].mxu0  ;;  %v2719_v16 = vpop.f32.mrb[9].mxu1  ;;  %v3422_v12 = vrot.slane %v3341_v59, %v7524_v60  ;;  %v3430_v13 = vrot.slane %v3341_v59, %v7526_v61 }
 0x5b1   : > { %v3942_v53 = vcombine.low %v3934_v20, %v3941_v11  ;;  %v3570_v34 = vmul.f32 %v3390_v6, %v2678_v26  ;;  %v3572_v37 = vmul.f32 %v3398_v8, %v2719_v16  ;;  %v2680_v18 = vpop.f32.mrb[10].mxu0  ;;  %v2721_v29 = vpop.f32.mrb[10].mxu1 }
 0x5b2   : > { %v3833_v19 = vadd.f32 %v3650_v9, %v3569_v24  ;;  %v3835_v30 = vadd.f32 %v3658_v10, %v3571_v25  ;;  %v2681_v43 = vpop.f32.mrb[11].mxu0  ;;  %v2722_v21 = vpop.f32.mrb[11].mxu1  ;;  %v3605_v9 = vld [vmem:[%s6562_s15 + $0x10] sm:$0xff]  ;;  %v3426_v10 = vrot.slane %v3341_v59, %v7521_v57 }
 0x5b3   : > { %4099 = vst [vmem:[%s6567_s19 + $0x8] sm:$0xff] %v3942_v53  ;;  %v3834_v22 = vadd.f32 %v3654_v14, %v3570_v34  ;;  %v3836_v31 = vadd.f32 %v3662_v33, %v3572_v37  ;;  %v3682_v14 = vrot.slane %v3605_v9, %v7519_v56  ;;  %v3690_v33 = vrot.slane %v3605_v9, %v7521_v57 }
 0x5b4   : > { %v3686_v53 = vrot.slane %v3605_v9, %v7524_v60  ;;  %v3694_v34 = vrot.slane %v3605_v9, %v7526_v61 }
 0x5b5   : > { %v3943_v35 = vcombine.low %v3833_v19, %v3834_v22  ;;  %v3944_v36 = vcombine.low %v3835_v30, %v3836_v31 }
 0x5b7   : > { %v3951_v42 = vrot.slane %v3943_v35, %v7551_v28  ;;  %v3958_v44 = vrot.slane %v3944_v36, %v7551_v28  ;;  %v2758_v45 = vpop.f32.mrb[12].mxu0  ;;  %v2799_v46 = vpop.f32.mrb[12].mxu1 }
 0x5b8   : > { %v3573_v51 = vmul.f32 %v3402_v32, %v2758_v45  ;;  %v3575_v4 = vmul.f32 %v3410_v52, %v2799_v46  ;;  %v2760_v17 = vpop.f32.mrb[13].mxu0  ;;  %v2801_v54 = vpop.f32.mrb[13].mxu1  ;;  %v3438_v45 = vrot.slane %v3341_v59, %v7547_v15  ;;  %v3446_v46 = vrot.slane %v3341_v59, %v7549_v27 }
 0x5b9   : > { %v3959_v55 = vcombine.low %v3951_v42, %v3958_v44  ;;  %v3574_v58 = vmul.f32 %v3406_v38, %v2760_v17  ;;  %v3576_v63 = vmul.f32 %v3414_v39, %v2801_v54  ;;  %v2762_v49 = vpop.f32.mrb[14].mxu0  ;;  %v2803_v0 = vpop.f32.mrb[14].mxu1 }
 0x5ba   : > { %v3837_v62 = vadd.f32 %v3666_v40, %v3573_v51  ;;  %v3839_v2 = vadd.f32 %v3674_v41, %v3575_v4  ;;  %v2763_v3 = vpop.f32.mrb[15].mxu0  ;;  %v2804_v5 = vpop.f32.mrb[15].mxu1  ;;  %v3434_v40 = vrot.slane %v3341_v59, %v7543_v23  ;;  %v3442_v41 = vrot.slane %v3341_v59, %v7545_v48 }
 0x5bb   : > { %4100 = vst [vmem:[%s6567_s19 + $0x10] sm:$0xff] %v3959_v55  ;;  %v3838_v6 = vadd.f32 %v3670_v47, %v3574_v58  ;;  %v3840_v8 = vadd.f32 %v3678_v50, %v3576_v63  ;;  %v3698_v47 = vrot.slane %v3605_v9, %v7543_v23  ;;  %v3706_v50 = vrot.slane %v3605_v9, %v7545_v48 }
 0x5bc   : > { %v3702_v55 = vrot.slane %v3605_v9, %v7547_v15  ;;  %v3710_v58 = vrot.slane %v3605_v9, %v7549_v27 }
 0x5bd   : > { %v3960_v20 = vcombine.low %v3837_v62, %v3838_v6  ;;  %v3961_v11 = vcombine.low %v3839_v2, %v3840_v8  ;;  %v3342_v8 = vld [vmem:[%s6552_s27 + $0x18] sm:$0xff] }
 0x5be   : > { %v3450_v9 = vrot.slane %v3342_v8, %v7519_v56 }
 0x5bf   : > { %v3968_v24 = vrot.slane %v3960_v20, %v7551_v28  ;;  %v3975_v25 = vrot.slane %v3961_v11, %v7551_v28  ;;  %v2840_v26 = vpop.f32.mrb[16].mxu0  ;;  %v2881_v16 = vpop.f32.mrb[16].mxu1 }
 0x5c0   : > { %v3577_v37 = vmul.f32 %v3418_v1, %v2840_v26  ;;  %v3579_v18 = vmul.f32 %v3426_v10, %v2881_v16  ;;  %v2842_v29 = vpop.f32.mrb[17].mxu0  ;;  %v2883_v19 = vpop.f32.mrb[17].mxu1  ;;  %v3454_v26 = vrot.slane %v3342_v8, %v7524_v60  ;;  %v3462_v16 = vrot.slane %v3342_v8, %v7526_v61 }
 0x5c1   : > { %v3976_v30 = vcombine.low %v3968_v24, %v3975_v25  ;;  %v3578_v43 = vmul.f32 %v3422_v12, %v2842_v29  ;;  %v3580_v21 = vmul.f32 %v3430_v13, %v2883_v19  ;;  %v2844_v22 = vpop.f32.mrb[18].mxu0  ;;  %v2885_v31 = vpop.f32.mrb[18].mxu1 }
 0x5c2   : > { %v3841_v32 = vadd.f32 %v3682_v14, %v3577_v37  ;;  %v3843_v52 = vadd.f32 %v3690_v33, %v3579_v18  ;;  %v2845_v35 = vpop.f32.mrb[19].mxu0  ;;  %v2886_v36 = vpop.f32.mrb[19].mxu1  ;;  %v3606_v14 = vld [vmem:[%s6562_s15 + $0x18] sm:$0xff]  ;;  %v3458_v33 = vrot.slane %v3342_v8, %v7521_v57 }
 0x5c3   : > { %4101 = vst [vmem:[%s6567_s19 + $0x18] sm:$0xff] %v3976_v30  ;;  %v3842_v38 = vadd.f32 %v3686_v53, %v3578_v43  ;;  %v3844_v39 = vadd.f32 %v3694_v34, %v3580_v21  ;;  %v3714_v53 = vrot.slane %v3606_v14, %v7519_v56  ;;  %v3722_v34 = vrot.slane %v3606_v14, %v7521_v57 }
 0x5c4   : > { %v3718_v30 = vrot.slane %v3606_v14, %v7524_v60  ;;  %v3726_v43 = vrot.slane %v3606_v14, %v7526_v61 }
 0x5c5   : > { %v3977_v42 = vcombine.low %v3841_v32, %v3842_v38  ;;  %v3978_v44 = vcombine.low %v3843_v52, %v3844_v39 }
 0x5c7   : > { %v3985_v51 = vrot.slane %v3977_v42, %v7551_v28  ;;  %v3992_v4 = vrot.slane %v3978_v44, %v7551_v28  ;;  %v2922_v17 = vpop.f32.mrb[20].mxu0  ;;  %v2963_v54 = vpop.f32.mrb[20].mxu1 }
 0x5c8   : > { %v3581_v63 = vmul.f32 %v3434_v40, %v2922_v17  ;;  %v3583_v49 = vmul.f32 %v3442_v41, %v2963_v54  ;;  %v2924_v0 = vpop.f32.mrb[21].mxu0  ;;  %v2965_v59 = vpop.f32.mrb[21].mxu1  ;;  %v3470_v17 = vrot.slane %v3342_v8, %v7547_v15  ;;  %v3478_v54 = vrot.slane %v3342_v8, %v7549_v27 }
 0x5c9   : > { %v3993_v62 = vcombine.low %v3985_v51, %v3992_v4  ;;  %v3582_v2 = vmul.f32 %v3438_v45, %v2924_v0  ;;  %v3584_v3 = vmul.f32 %v3446_v46, %v2965_v59  ;;  %v2926_v5 = vpop.f32.mrb[22].mxu0  ;;  %v2967_v6 = vpop.f32.mrb[22].mxu1 }
 0x5ca   : > { %v3845_v1 = vadd.f32 %v3698_v47, %v3581_v63  ;;  %v3847_v10 = vadd.f32 %v3706_v50, %v3583_v49  ;;  %v2927_v20 = vpop.f32.mrb[23].mxu0  ;;  %v2968_v11 = vpop.f32.mrb[23].mxu1  ;;  %v3466_v47 = vrot.slane %v3342_v8, %v7543_v23  ;;  %v3474_v50 = vrot.slane %v3342_v8, %v7545_v48 }
 0x5cb   : > { %4102 = vst [vmem:[%s6567_s19 + $0x20] sm:$0xff] %v3993_v62  ;;  %v3846_v12 = vadd.f32 %v3702_v55, %v3582_v2  ;;  %v3848_v13 = vadd.f32 %v3710_v58, %v3584_v3  ;;  %v3730_v55 = vrot.slane %v3606_v14, %v7543_v23  ;;  %v3738_v58 = vrot.slane %v3606_v14, %v7545_v48 }
 0x5cc   : > { %v3734_v62 = vrot.slane %v3606_v14, %v7547_v15  ;;  %v3742_v2 = vrot.slane %v3606_v14, %v7549_v27 }
 0x5cd   : > { %v3994_v24 = vcombine.low %v3845_v1, %v3846_v12  ;;  %v3995_v25 = vcombine.low %v3847_v10, %v3848_v13  ;;  %v3343_v13 = vld [vmem:[%s6552_s27 + $0x20] sm:$0xff] }
 0x5ce   : > { %v3482_v14 = vrot.slane %v3343_v13, %v7519_v56 }
 0x5cf   : > { %v4002_v37 = vrot.slane %v3994_v24, %v7551_v28  ;;  %v4009_v18 = vrot.slane %v3995_v25, %v7551_v28  ;;  %v3004_v29 = vpop.f32.mrb[24].mxu0  ;;  %v3045_v19 = vpop.f32.mrb[24].mxu1 }
 0x5d0   : > { %v3585_v21 = vmul.f32 %v3450_v9, %v3004_v29  ;;  %v3587_v22 = vmul.f32 %v3458_v33, %v3045_v19  ;;  %v3006_v31 = vpop.f32.mrb[25].mxu0  ;;  %v3047_v32 = vpop.f32.mrb[25].mxu1  ;;  %v3486_v29 = vrot.slane %v3343_v13, %v7524_v60  ;;  %v3494_v19 = vrot.slane %v3343_v13, %v7526_v61 }
 0x5d1   : > { %v4010_v52 = vcombine.low %v4002_v37, %v4009_v18  ;;  %v3586_v35 = vmul.f32 %v3454_v26, %v3006_v31  ;;  %v3588_v36 = vmul.f32 %v3462_v16, %v3047_v32  ;;  %v3008_v38 = vpop.f32.mrb[26].mxu0  ;;  %v3049_v39 = vpop.f32.mrb[26].mxu1 }
 0x5d2   : > { %v3849_v40 = vadd.f32 %v3714_v53, %v3585_v21  ;;  %v3851_v41 = vadd.f32 %v3722_v34, %v3587_v22  ;;  %v3009_v42 = vpop.f32.mrb[27].mxu0  ;;  %v3050_v44 = vpop.f32.mrb[27].mxu1  ;;  %v3607_v53 = vld [vmem:[%s6562_s15 + $0x20] sm:$0xff]  ;;  %v3490_v34 = vrot.slane %v3343_v13, %v7521_v57 }
 0x5d3   : > { %4103 = vst [vmem:[%s6567_s19 + $0x28] sm:$0xff] %v4010_v52  ;;  %v3850_v45 = vadd.f32 %v3718_v30, %v3586_v35  ;;  %v3852_v46 = vadd.f32 %v3726_v43, %v3588_v36  ;;  %v3746_v30 = vrot.slane %v3607_v53, %v7519_v56  ;;  %v3754_v43 = vrot.slane %v3607_v53, %v7521_v57 }
 0x5d4   : > { %v3750_v52 = vrot.slane %v3607_v53, %v7524_v60  ;;  %v3758_v35 = vrot.slane %v3607_v53, %v7526_v61 }
 0x5d5   : > { %v4011_v51 = vcombine.low %v3849_v40, %v3850_v45  ;;  %v4012_v4 = vcombine.low %v3851_v41, %v3852_v46 }
 0x5d7   : > { %v4019_v63 = vrot.slane %v4011_v51, %v7551_v28  ;;  %v4026_v49 = vrot.slane %v4012_v4, %v7551_v28  ;;  %v3086_v0 = vpop.f32.mrb[28].mxu0  ;;  %v3127_v59 = vpop.f32.mrb[28].mxu1 }
 0x5d8   : > { %v3589_v3 = vmul.f32 %v3466_v47, %v3086_v0  ;;  %v3591_v5 = vmul.f32 %v3474_v50, %v3127_v59  ;;  %v3088_v6 = vpop.f32.mrb[29].mxu0  ;;  %v3129_v8 = vpop.f32.mrb[29].mxu1  ;;  %v3502_v0 = vrot.slane %v3343_v13, %v7547_v15  ;;  %v3510_v59 = vrot.slane %v3343_v13, %v7549_v27 }
 0x5d9   : > { %v4027_v1 = vcombine.low %v4019_v63, %v4026_v49  ;;  %v3590_v10 = vmul.f32 %v3470_v17, %v3088_v6  ;;  %v3592_v20 = vmul.f32 %v3478_v54, %v3129_v8  ;;  %v3090_v11 = vpop.f32.mrb[30].mxu0  ;;  %v3131_v12 = vpop.f32.mrb[30].mxu1 }
 0x5da   : > { %v3853_v9 = vadd.f32 %v3730_v55, %v3589_v3  ;;  %v3855_v33 = vadd.f32 %v3738_v58, %v3591_v5  ;;  %v3091_v24 = vpop.f32.mrb[31].mxu0  ;;  %v3132_v25 = vpop.f32.mrb[31].mxu1  ;;  %v3498_v55 = vrot.slane %v3343_v13, %v7543_v23  ;;  %v3506_v58 = vrot.slane %v3343_v13, %v7545_v48 }
 0x5db   : > { %4104 = vst [vmem:[%s6567_s19 + $0x30] sm:$0xff] %v4027_v1  ;;  %v3854_v26 = vadd.f32 %v3734_v62, %v3590_v10  ;;  %v3856_v16 = vadd.f32 %v3742_v2, %v3592_v20  ;;  %v3762_v62 = vrot.slane %v3607_v53, %v7543_v23  ;;  %v3770_v2 = vrot.slane %v3607_v53, %v7545_v48 }
 0x5dc   : > { %v3766_v1 = vrot.slane %v3607_v53, %v7547_v15  ;;  %v3774_v10 = vrot.slane %v3607_v53, %v7549_v27 }
 0x5dd   : > { %v4028_v37 = vcombine.low %v3853_v9, %v3854_v26  ;;  %v4029_v18 = vcombine.low %v3855_v33, %v3856_v16  ;;  %v3344_v16 = vld [vmem:[%s6552_s27 + $0x28] sm:$0x3] }
 0x5de   : > { %v3514_v53 = vrot.slane %v3344_v16, %v7519_v56 }
 0x5df   : > { %v4036_v21 = vrot.slane %v4028_v37, %v7551_v28  ;;  %v4043_v22 = vrot.slane %v4029_v18, %v7551_v28  ;;  %v3168_v31 = vpop.f32.mrb[32].mxu0  ;;  %v3209_v32 = vpop.f32.mrb[32].mxu1 }
 0x5e0   : > { %v3593_v36 = vmul.f32 %v3482_v14, %v3168_v31  ;;  %v3595_v38 = vmul.f32 %v3490_v34, %v3209_v32  ;;  %v3170_v39 = vpop.f32.mrb[33].mxu0  ;;  %v3211_v40 = vpop.f32.mrb[33].mxu1 }
 0x5e1   : > { %v4044_v41 = vcombine.low %v4036_v21, %v4043_v22  ;;  %v3594_v42 = vmul.f32 %v3486_v29, %v3170_v39  ;;  %v3596_v44 = vmul.f32 %v3494_v19, %v3211_v40  ;;  %v3172_v45 = vpop.f32.mrb[34].mxu0  ;;  %v3213_v46 = vpop.f32.mrb[34].mxu1  ;;  %v3518_v22 = vrot.slane %v3344_v16, %v7524_v60  ;;  %v6413_v16 = vld [vmem:[%s8524_s6 + $0xc8] ss:$16 sps:$4 sm:$0xff] (!%p6115_p5)  }
 0x5e2   : > { %v3857_v47 = vadd.f32 %v3746_v30, %v3593_v36  ;;  %v3859_v50 = vadd.f32 %v3754_v43, %v3595_v38  ;;  %v3173_v51 = vpop.f32.mrb[35].mxu0  ;;  %v3214_v4 = vpop.f32.mrb[35].mxu1  ;;  %v3608_v30 = vld [vmem:[%s6562_s15 + $0x28] sm:$0x3] }
 0x5e3   : > { %4105 = vst [vmem:[%s6567_s19 + $0x38] sm:$0xff] %v4044_v41  ;;  %v3858_v17 = vadd.f32 %v3750_v52, %v3594_v42  ;;  %v3860_v54 = vadd.f32 %v3758_v35, %v3596_v44  ;;  %v3778_v31 = vrot.slane %v3608_v30, %v7519_v56  ;;  %v3782_v36 = vrot.slane %v3608_v30, %v7524_v60  ;;  %v6374_v4 = vld [vmem:[%s8523_s5 + $0x8] sm:$0xff] (!%p6115_p5)  }
 0x5e4   : > { %v6470_v51 = vmov (!%p6115_p5), 0.0   ;;  %v4658_v30 = vld [vmem:[%s8525_s7 + $0x8] sm:$0xff] (!%p6115_p5) }
 0x5e5   : > { %v4045_v63 = vcombine.low %v3857_v47, %v3858_v17  ;;  %v4046_v49 = vcombine.low %v3859_v50, %v3860_v54  ;;  %v6373_v50 = vld [vmem:[%s8523_s5] sm:$0xff] (!%p6115_p5)   ;;  %6232 = vmatprep.subr.bf16.mxu0 (!%p6115_p5), %v6470_v51  ;;  %6236 = vmatprep.mubr.msk.bf16.mxu0 (!%p6115_p5), %vm6471_vm4, %v6470_v51  ;;  %v6379_v54 = vld [vmem:[%s8524_s6 + $0xc] ss:$16 sps:$4 sm:$0xff] (!%p6115_p5)  }
 0x5e6   : > { %6233 = vmatpush3.bf16.msra.mxu0 (!%p6115_p5), %v6373_v50  ;;  %v6375_v17 = vld [vmem:[%s8524_s6 + $0x4] ss:$16 sps:$4 sm:$0xff] (!%p6115_p5)  }
 0x5e7   : > { %v4053_v3 = vrot.slane %v4045_v63, %v7551_v28  ;;  %v4060_v5 = vrot.slane %v4046_v49, %v7551_v28  ;;  %v3250_v6 = vpop.f32.mrb[36].mxu0  ;;  %v3291_v8 = vpop.f32.mrb[36].mxu1  ;;  %6234 = vmatprep.subr.bf16.mxu0 (!%p6115_p5), %v6470_v51  ;;  %4431 = vmatprep.subr.bf16.mxu1 (!%p6115_p5), %v6375_v17  ;;  %v6385_v63 = vld [vmem:[%s8524_s6 + $0x2c] ss:$16 sps:$4 sm:$0xff] (!%p6115_p5)   ;;  %v6383_v49 = vld [vmem:[%s8524_s6 + $0x28] ss:$16 sps:$4 sm:$0xff] (!%p6115_p5)  }
 0x5e8   : > { %v3597_v20 = vmul.f32 %v3498_v55, %v3250_v6  ;;  %v3599_v11 = vmul.f32 %v3506_v58, %v3291_v8  ;;  %v3252_v12 = vpop.f32.mrb[37].mxu0  ;;  %v3293_v13 = vpop.f32.mrb[37].mxu1  ;;  %v6377_v55 = vld [vmem:[%s8524_s6 + $0x8] ss:$16 sps:$4 sm:$0xff] (!%p6115_p5)   ;;  %v6380_v58 = vld [vmem:[%s8524_s6] ss:$16 sps:$4 sm:$0xff] (!%p6115_p5)  }
 0x5e9   : > { %v4061_v9 = vcombine.low %v4053_v3, %v4060_v5  ;;  %v3598_v33 = vmul.f32 %v3502_v0, %v3252_v12  ;;  %v3600_v24 = vmul.f32 %v3510_v59, %v3293_v13  ;;  %v3254_v25 = vpop.f32.mrb[38].mxu0  ;;  %v3295_v26 = vpop.f32.mrb[38].mxu1  ;;  %4432 = vmatpush1.bf16.msra.mxu1 (!%p6115_p5), %v6380_v58  ;;  %v6386_v0 = vld [vmem:[%s8524_s6 + $0x20] ss:$16 sps:$4 sm:$0xff] (!%p6115_p5)   ;;  %v6387_v59 = vld [vmem:[%s8524_s6 + $0x44] ss:$16 sps:$4 sm:$0xff] (!%p6115_p5)  }
 0x5ea   : > { %v3861_v14 = vadd.f32 %v3762_v62, %v3597_v20  ;;  %v3863_v34 = vadd.f32 %v3770_v2, %v3599_v11  ;;  %v3255_v37 = vpop.f32.mrb[39].mxu0  ;;  %v3296_v18 = vpop.f32.mrb[39].mxu1  ;;  %6235 = vmatpush3.bf16.msra.mxu0 (!%p6115_p5), %v6374_v4  ;;  %v6391_v62 = vld [vmem:[%s8524_s6 + $0x4c] ss:$16 sps:$4 sm:$0xff] (!%p6115_p5)   ;;  %v6389_v2 = vld [vmem:[%s8524_s6 + $0x48] ss:$16 sps:$4 sm:$0xff] (!%p6115_p5)  }
 0x5eb   : > { %4106 = vst [vmem:[%s6567_s19 + $0x40] sm:$0xff] %v4061_v9  ;;  %v3862_v29 = vadd.f32 %v3766_v1, %v3598_v33  ;;  %v3864_v19 = vadd.f32 %v3774_v10, %v3600_v24  ;;  %4472 = vmatprep.subr.bf16.mxu0 (!%p6115_p5), %v6379_v54  ;;  %v6392_v3 = vld [vmem:[%s8524_s6 + $0x40] ss:$16 sps:$4 sm:$0xff] (!%p6115_p5)   ;;  %v6393_v5 = vld [vmem:[%s8524_s6 + $0x64] ss:$16 sps:$4 sm:$0xff] (!%p6115_p5)  }
 0x5ec   : > { %v6397_v6 = vld [vmem:[%s8524_s6 + $0x6c] ss:$16 sps:$4 sm:$0xff] (!%p6115_p5)   ;;  %v6395_v8 = vld [vmem:[%s8524_s6 + $0x68] ss:$16 sps:$4 sm:$0xff] (!%p6115_p5)   ;;  %v6398_v1 = vld [vmem:[%s8524_s6 + $0x60] ss:$16 sps:$4 sm:$0xff] (!%p6115_p5)  }
 0x5ed   : > { %v4062_v43 = vcombine.low %v3861_v14, %v3862_v29  ;;  %v4063_v21 = vcombine.low %v3863_v34, %v3864_v19  ;;  %6237 = vmatmul.mubr.msk.bf16.vlgmr.msra.gmra.mrb[0].mxu0 (!%p6115_p5), %vm2474_vm3, %v7422_v7  ;;  %v6381_v7 = vld [vmem:[%s8524_s6 + $0x24] ss:$16 sps:$4 sm:$0xff] (!%p6115_p5)   ;;  %v6403_v20 = vld [vmem:[%s8524_s6 + $0x8c] ss:$16 sps:$4 sm:$0xff] (!%p6115_p5)   ;;  %v6401_v11 = vld [vmem:[%s8524_s6 + $0x88] ss:$16 sps:$4 sm:$0xff] (!%p6115_p5)  }
 0x5ee   : > { %4473 = vmatpush1.bf16.msra.mxu0 (!%p6115_p5), %v6377_v55  ;;  %4433 = vmatprep.subr.bf16.mxu1 (!%p6115_p5), %v6381_v7  ;;  %v6399_v10 = vld [vmem:[%s8524_s6 + $0x84] ss:$16 sps:$4 sm:$0xff] (!%p6115_p5)   ;;  %v6404_v12 = vld [vmem:[%s8524_s6 + $0x80] ss:$16 sps:$4 sm:$0xff] (!%p6115_p5)   ;;  %v6409_v9 = vld [vmem:[%s8524_s6 + $0xac] ss:$16 sps:$4 sm:$0xff] (!%p6115_p5)  }
 0x5ef   : > { %v4070_v32 = vrot.slane %v4062_v43, %v7551_v28  ;;  %v4077_v52 = vrot.slane %v4063_v21, %v7551_v28  ;;  %v3332_v35 = vpop.f32.mrb[40].mxu0  ;;  %4474 = vmatprep.subr.bf16.mxu0 (!%p6115_p5), %v6385_v63  ;;  %4434 = vmatpush1.bf16.msra.mxu1 (!%p6115_p5), %v6386_v0  ;;  %v6405_v13 = vld [vmem:[%s8524_s6 + $0xa4] ss:$16 sps:$4 sm:$0xff] (!%p6115_p5)   ;;  %v6407_v33 = vld [vmem:[%s8524_s6 + $0xa8] ss:$16 sps:$4 sm:$0xff] (!%p6115_p5)   ;;  %v6472_v19 = vmov (!%p6115_p5), 0   ;;  %v4850_v43 = vunpack.c.l.s8.bf16 (!%p6115_p5), %v4658_v30 }
 0x5f0   : > { %v3601_v38 = vmul.f32 %v3514_v53, %v3332_v35  ;;  %v3334_v39 = vpop.f32.mrb[41].mxu0  ;;  %4435 = vmatprep.subr.bf16.mxu1 (!%p6115_p5), %v6387_v59  ;;  %v6410_v24 = vld [vmem:[%s8524_s6 + $0xa0] ss:$16 sps:$4 sm:$0xff] (!%p6115_p5)   ;;  %v6411_v25 = vld [vmem:[%s8524_s6 + $0xc4] ss:$16 sps:$4 sm:$0xff] (!%p6115_p5)   ;;  %4463 = vmatprep.mubr.bf16.mxu1 (!%p6115_p5), %v6472_v19  ;;  %v4660_v53 = vld [vmem:[%s8525_s7 + $0x18] sm:$0xff] (!%p6115_p5) }
 0x5f1   : > { %v4078_v40 = vcombine.low %v4070_v32, %v4077_v52  ;;  %v3602_v41 = vmul.f32 %v3518_v22, %v3334_v39  ;;  %v3336_v42 = vpop.f32.mrb[42].mxu0  ;;  %4112 = sbr.rel (%p6115_p5) target bundleno = 2615 (0xa37), region = 72  ;;  %v6415_v26 = vld [vmem:[%s8524_s6 + $0xcc] ss:$16 sps:$4 sm:$0xff] (!%p6115_p5)   ;;  %v6416_v14 = vld [vmem:[%s8524_s6 + $0xc0] ss:$16 sps:$4 sm:$0xff] (!%p6115_p5)   ;;  %4504 = vmatprep.mubr.bf16.mxu0 (!%p6115_p5), %v6472_v19  ;;  %v4852_v21 = vunpack.c.l.s8.bf16 (!%p6115_p5), %v4660_v53 }
 0x5f2   : > { %v3865_v44 = vadd.f32 %v3778_v31, %v3601_v38  ;;  %v3337_v45 = vpop.f32.mrb[43].mxu0  ;;  %4475 = vmatpush1.bf16.msra.mxu0 (!%p6115_p5), %v6383_v49  ;;  %v6417_v34 = vld [vmem:[%s8524_s6 + $0xe4] ss:$16 sps:$4 sm:$0xff] (!%p6115_p5)   ;;  %v6421_v37 = vld [vmem:[%s8524_s6 + $0xec] ss:$16 sps:$4 sm:$0xff] (!%p6115_p5)  }
 0x5f3   : > { %4107 = vst [vmem:[%s6567_s19 + $0x48] sm:$0xff] %v4078_v40  ;;  %v3866_v46 = vadd.f32 %v3782_v36, %v3602_v41  ;;  %4476 = vmatprep.subr.bf16.mxu0 (!%p6115_p5), %v6391_v62  ;;  %4436 = vmatpush1.bf16.msra.mxu1 (!%p6115_p5), %v6392_v3  ;;  %v6419_v18 = vld [vmem:[%s8524_s6 + $0xe8] ss:$16 sps:$4 sm:$0xff] (!%p6115_p5)   ;;  %v6422_v29 = vld [vmem:[%s8524_s6 + $0xe0] ss:$16 sps:$4 sm:$0xff] (!%p6115_p5)  }
 0x5f4   : > { %4437 = vmatprep.subr.bf16.mxu1 (!%p6115_p5), %v6393_v5  ;;  %v6116_v22 = vld [vmem:[%s8519_s1 + $0x16] ss:$0 sm:$0xff] (!%p6115_p5)  ;;  %v6120_v0 = vld [vmem:[%s8519_s1 + $0x17] ss:$0 sm:$0xff] (!%p6115_p5) }
 0x5f5   : > { %v4079_v47 = vcombine.low %v3865_v44, %v3866_v46 }
 0x5f6   : > { %4477 = vmatpush1.bf16.msra.mxu0 (!%p6115_p5), %v6389_v2  ;;  %v6121_v2 = vld [vmem:[%s8519_s1 + $0x18] ss:$0 sm:$0xff] (!%p6115_p5) }
 0x5f7   : > { %6114 = vst.sshfl [vmem:[%s6567_s19 + $0x50] sm:$0x33 pattern:$0x76325410] %v4079_v47  ;;  %4478 = vmatprep.subr.bf16.mxu0 (!%p6115_p5), %v6397_v6  ;;  %4438 = vmatpush1.bf16.msra.mxu1 (!%p6115_p5), %v6398_v1  ;;  %v4657_v6 = vld [vmem:[%s8525_s7] sm:$0xff] (!%p6115_p5) }
 0x5f8   : > { %4439 = vmatprep.subr.bf16.mxu1 %v6399_v10  ;;  %v4849_v10 = vunpack.c.l.s8.bf16 %v4657_v6 }
 0x5fa   : > { %4479 = vmatpush1.bf16.msra.mxu0 %v6395_v8  ;;  %v4659_v8 = vld [vmem:[%s8525_s7 + $0x10] sm:$0xff] }
 0x5fb   : > { %4480 = vmatprep.subr.bf16.mxu0 %v6403_v20  ;;  %4440 = vmatpush1.bf16.msra.mxu1 %v6404_v12  ;;  %v4851_v20 = vunpack.c.l.s8.bf16 %v4659_v8  ;;  %v4862_v12 = vunpack.c.h.s8.bf16 %v4658_v30 }
 0x5fc   : > { %4441 = vmatprep.subr.bf16.mxu1 %v6405_v13  ;;  %v4864_v13 = vunpack.c.h.s8.bf16 %v4660_v53 }
 0x5fe   : > { %4481 = vmatpush1.bf16.msra.mxu0 %v6401_v11 }
 0x5ff   : > { %4482 = vmatprep.subr.bf16.mxu0 %v6409_v9  ;;  %4442 = vmatpush1.bf16.msra.mxu1 %v6410_v24  ;;  %v4861_v9 = vunpack.c.h.s8.bf16 %v4657_v6  ;;  %v4670_v24 = vld [vmem:[%s8525_s7 + $0x68] sm:$0xff] }
 0x600   : > { %4443 = vmatprep.subr.bf16.mxu1 %v6411_v25  ;;  %v4672_v25 = vld [vmem:[%s8525_s7 + $0x78] sm:$0xff] }
 0x601   : > { %v4888_v19 = vunpack.c.h.s8.bf16 %v4672_v25 }
 0x602   : > { %4483 = vmatpush1.bf16.msra.mxu0 %v6407_v33  ;;  %v4863_v33 = vunpack.c.h.s8.bf16 %v4659_v8 }
 0x603   : > { %4484 = vmatprep.subr.bf16.mxu0 %v6415_v26  ;;  %4444 = vmatpush1.bf16.msra.mxu1 %v6416_v14  ;;  %v4874_v26 = vunpack.c.l.s8.bf16 %v4670_v24  ;;  %v4669_v14 = vld [vmem:[%s8525_s7 + $0x60] sm:$0xff] }
 0x604   : > { %4445 = vmatprep.subr.bf16.mxu1 %v6417_v34  ;;  %v4671_v34 = vld [vmem:[%s8525_s7 + $0x70] sm:$0xff]  ;;  %v4885_v30 = vunpack.c.h.s8.bf16 %v4669_v14 }
 0x605   : > { %v4887_v53 = vunpack.c.h.s8.bf16 %v4671_v34 }
 0x606   : > { %4485 = vmatpush1.bf16.msra.mxu0 %v6413_v16  ;;  %v4876_v16 = vunpack.c.l.s8.bf16 %v4672_v25 }
 0x607   : > { %4486 = vmatprep.subr.bf16.mxu0 %v6421_v37  ;;  %4446 = vmatpush1.bf16.msra.mxu1 %v6422_v29  ;;  %v4873_v37 = vunpack.c.l.s8.bf16 %v4669_v14  ;;  %v4886_v29 = vunpack.c.h.s8.bf16 %v4670_v24 }
 0x608   : > { %5233 = vmatprep.subr.bf16.mxu1 %v4850_v43  ;;  %v4682_v43 = vld [vmem:[%s8525_s7 + $0xc8] sm:$0xff] }
 0x60a   : > { %4487 = vmatpush1.bf16.msra.mxu0 %v6419_v18  ;;  %v4875_v18 = vunpack.c.l.s8.bf16 %v4671_v34  ;;  %v4730_v34 = vld [vmem:[%s8525_s7 + $0x248] sm:$0xff] }
 0x60b   : > { %5315 = vmatprep.subr.bf16.mxu0 %v4852_v21  ;;  %v4684_v21 = vld [vmem:[%s8525_s7 + $0xd8] sm:$0xff] }
 0x6c0   : > { %v4170_v31 = vpop.f32.mrb[0].mxu0 }
 0x6c1   : > { %v4171_v32 = vadd.f32 %v6116_v22, %v4170_v31  ;;  %v6238_v52 = vpop.f32.mrb[1].mxu0  ;;  %v4898_v22 = vunpack.c.l.s8.bf16 %v4682_v43  ;;  %v4900_v31 = vunpack.c.l.s8.bf16 %v4684_v21 }
 0x6c2   : > { %v4173_v35 = vpop.f32.mrb[2].mxu0  ;;  %v4683_v52 = vld [vmem:[%s8525_s7 + $0xd0] sm:$0xff] }
 0x6c3   : > { %v4177_v36 = vsel %vm4176_vm5, %v4171_v32, 0.0  ;;  %v6239_v38 = vpop.f32.mrb[3].mxu0 }
 0x6c4   : > { %v4178_v39 = vrot.slane %v4177_v36, 4  ;;  %v4910_v38 = vunpack.c.h.s8.bf16 %v4682_v43 }
 0x6c6   : > { %v4179_v40 = vadd.f32 %v4178_v39, %v4177_v36  ;;  %v4899_v36 = vunpack.c.l.s8.bf16 %v4683_v52  ;;  %v4912_v39 = vunpack.c.h.s8.bf16 %v4684_v21  ;;  %v5006_v21 = vunpack.c.h.s8.bf16 %v4730_v34 }
 0x6c8   : > { %v4180_v41 = vrot.slane %v4179_v40, 2 }
 0x6ca   : > { %v4181_v42 = vadd.f32 %v4180_v41, %v4179_v40  ;;  %v4911_v41 = vunpack.c.h.s8.bf16 %v4683_v52  ;;  %v4742_v52 = vld [vmem:[%s8525_s7 + $0x2a8] sm:$0xff] }
 0x6cc   : > { %v4182_v44 = vrot.slane %v4181_v42, 1 }
 0x6ce   : > { %v4183_v45 = vadd.f32 %v4182_v44, %v4181_v42  ;;  %v4694_v42 = vld [vmem:[%s8525_s7 + $0x128] sm:$0xff]  ;;  %v4696_v44 = vld [vmem:[%s8525_s7 + $0x138] sm:$0xff] }
 0x6d0   : > { %v4185_v46 = vmul.f32 0.5, %v4183_v45  ;;  %v4922_v45 = vunpack.c.l.s8.bf16 %v4694_v42 }
 0x6d2   : > { %v4186_v47 = vsub.f32 %v4171_v32, %v4185_v46  ;;  %v4681_v32 = vld [vmem:[%s8525_s7 + $0xc0] sm:$0xff]  ;;  %v4924_v46 = vunpack.c.l.s8.bf16 %v4696_v44 }
 0x6d3   : > { %v4897_v35 = vunpack.c.l.s8.bf16 %v4681_v32  ;;  %v4909_v40 = vunpack.c.h.s8.bf16 %v4681_v32 }
 0x6d4   : > { %v4187_v50 = vmul.f32 %v4186_v47, %v4186_v47  ;;  %v4203_v59 = vmul.f32 %v6120_v0, %v4186_v47  ;;  %v4693_v47 = vld [vmem:[%s8525_s7 + $0x120] sm:$0xff] }
 0x6d6   : > { %v4188_v51 = vsel %vm4176_vm5, %v4187_v50, 0.0  ;;  %v4695_v50 = vld [vmem:[%s8525_s7 + $0x130] sm:$0xff] }
 0x6d7   : > { %v4189_v4 = vrot.slane %v4188_v51, 4 }
 0x6d9   : > { %v4190_v17 = vadd.f32 %v4189_v4, %v4188_v51  ;;  %v4921_v51 = vunpack.c.l.s8.bf16 %v4693_v47  ;;  %v4923_v4 = vunpack.c.l.s8.bf16 %v4695_v50 }
 0x6db   : > { %v4191_v54 = vrot.slane %v4190_v17, 2 }
 0x6dd   : > { %v4192_v55 = vadd.f32 %v4191_v54, %v4190_v17  ;;  %v4934_v17 = vunpack.c.h.s8.bf16 %v4694_v42  ;;  %v4936_v54 = vunpack.c.h.s8.bf16 %v4696_v44  ;;  %v5030_v44 = vunpack.c.h.s8.bf16 %v4742_v52 }
 0x6df   : > { %v4193_v58 = vrot.slane %v4192_v55, 1 }
 0x6e1   : > { %v4194_v7 = vadd.f32 %v4193_v58, %v4192_v55  ;;  %v4933_v55 = vunpack.c.h.s8.bf16 %v4693_v47  ;;  %v4935_v58 = vunpack.c.h.s8.bf16 %v4695_v50  ;;  %v7889_v50 = vld [vmem:[%s8525_s7 + $0x308] sm:$0xff] }
 0x6e3   : > { %v4195_v63 = vmul.f32 0.5, %v4194_v7  ;;  %v4706_v7 = vld [vmem:[%s8525_s7 + $0x188] sm:$0xff] }
 0x6e5   : > { %v4204_v49 = vadd.f32 1e-05, %v4195_v63  ;;  %v4708_v63 = vld [vmem:[%s8525_s7 + $0x198] sm:$0xff] }
 0x6e6   : > { %v4948_v0 = vunpack.c.l.s8.bf16 %v4708_v63  ;;  %v4960_v6 = vunpack.c.h.s8.bf16 %v4708_v63 }
 0x6e7   : > { %6423 = vrsqrt.f32 %v4204_v49  ;;  %v4946_v49 = vunpack.c.l.s8.bf16 %v4706_v7 }
 0x6f1   : > { %v6424_v62 = vpop.eup %6423 }
 0x6f2   : > { %v4206_v3 = vmul.f32 %v6424_v62, %v4203_v59  ;;  %v4705_v59 = vld [vmem:[%s8525_s7 + $0x180] sm:$0xff]  ;;  %v4707_v62 = vld [vmem:[%s8525_s7 + $0x190] sm:$0xff] }
 0x6f3   : > { %v4957_v8 = vunpack.c.h.s8.bf16 %v4705_v59 }
 0x6f4   : > { %v4214_v5 = vadd.f32 %v6121_v2, %v4206_v3  ;;  %v4945_v2 = vunpack.c.l.s8.bf16 %v4705_v59  ;;  %v4947_v3 = vunpack.c.l.s8.bf16 %v4707_v62 }
 0x6f6   : > { %v4215_v1 = vmax.f32 %v4214_v5, 0.0  ;;  %v4958_v5 = vunpack.c.h.s8.bf16 %v4706_v7 }
 0x6f8   : > { %v4216_v11 = vpack.c.bf16 %v4215_v1, %v4215_v1  ;;  %v4959_v1 = vunpack.c.h.s8.bf16 %v4707_v62 }
 0x6fa   : > { %4464 = vmatmul.mubr.bf16.vlgmr.msra.gmra.mrb[0].mxu1 %v4216_v11  ;;  %4505 = vmatmul.mubr.bf16.vlgmr.msra.gmra.mrb[4].mxu0 %v4216_v11 }
 0x6fb   : > { %5234 = vmatpush1.bf16.msra.mxu1 %v4849_v10  ;;  %5316 = vmatpush1.bf16.msra.mxu0 %v4851_v20  ;;  %v4718_v10 = vld [vmem:[%s8525_s7 + $0x1e8] sm:$0xff]  ;;  %v4720_v20 = vld [vmem:[%s8525_s7 + $0x1f8] sm:$0xff] }
 0x6fc   : > { %5235 = vmatprep.subr.bf16.mxu1 %v4862_v12  ;;  %5317 = vmatprep.subr.bf16.mxu0 %v4864_v13  ;;  %v4970_v11 = vunpack.c.l.s8.bf16 %v4718_v10  ;;  %v4972_v12 = vunpack.c.l.s8.bf16 %v4720_v20  ;;  %v4717_v13 = vld [vmem:[%s8525_s7 + $0x1e0] sm:$0xff]  ;;  %v4982_v25 = vunpack.c.h.s8.bf16 %v4718_v10 }
 0x6ff   : > { %5236 = vmatpush1.bf16.msra.mxu1 %v4861_v9  ;;  %5318 = vmatpush1.bf16.msra.mxu0 %v4863_v33  ;;  %v4719_v9 = vld [vmem:[%s8525_s7 + $0x1f0] sm:$0xff]  ;;  %v4969_v33 = vunpack.c.l.s8.bf16 %v4717_v13 }
 0x700   : > { %5237 = vmatprep.subr.bf16.mxu1 %v4874_v26  ;;  %5319 = vmatprep.subr.bf16.mxu0 %v4876_v16  ;;  %v4971_v24 = vunpack.c.l.s8.bf16 %v4719_v9  ;;  %v4984_v26 = vunpack.c.h.s8.bf16 %v4720_v20  ;;  %v4981_v16 = vunpack.c.h.s8.bf16 %v4717_v13  ;;  %v4983_v14 = vunpack.c.h.s8.bf16 %v4719_v9 }
 0x703   : > { %5238 = vmatpush1.bf16.msra.mxu1 %v4873_v37  ;;  %5320 = vmatpush1.bf16.msra.mxu0 %v4875_v18  ;;  %v4732_v37 = vld [vmem:[%s8525_s7 + $0x258] sm:$0xff]  ;;  %v4994_v18 = vunpack.c.l.s8.bf16 %v4730_v34 }
 0x704   : > { %5239 = vmatprep.subr.bf16.mxu1 %v4886_v29  ;;  %5321 = vmatprep.subr.bf16.mxu0 %v4888_v19  ;;  %v4996_v29 = vunpack.c.l.s8.bf16 %v4732_v37  ;;  %v4729_v19 = vld [vmem:[%s8525_s7 + $0x240] sm:$0xff] }
 0x707   : > { %5240 = vmatpush1.bf16.msra.mxu1 %v4885_v30  ;;  %5322 = vmatpush1.bf16.msra.mxu0 %v4887_v53  ;;  %v4731_v30 = vld [vmem:[%s8525_s7 + $0x250] sm:$0xff]  ;;  %v4993_v53 = vunpack.c.l.s8.bf16 %v4729_v19 }
 0x708   : > { %5241 = vmatprep.subr.bf16.mxu1 %v4898_v22  ;;  %5323 = vmatprep.subr.bf16.mxu0 %v4900_v31  ;;  %v4995_v43 = vunpack.c.l.s8.bf16 %v4731_v30  ;;  %v5008_v22 = vunpack.c.h.s8.bf16 %v4732_v37  ;;  %v5005_v31 = vunpack.c.h.s8.bf16 %v4729_v19  ;;  %v5007_v32 = vunpack.c.h.s8.bf16 %v4731_v30 }
 0x70b   : > { %5242 = vmatpush1.bf16.msra.mxu1 %v4897_v35  ;;  %5324 = vmatpush1.bf16.msra.mxu0 %v4899_v36  ;;  %v4744_v35 = vld [vmem:[%s8525_s7 + $0x2b8] sm:$0xff]  ;;  %v5018_v36 = vunpack.c.l.s8.bf16 %v4742_v52 }
 0x70c   : > { %5243 = vmatprep.subr.bf16.mxu1 %v4910_v38  ;;  %5325 = vmatprep.subr.bf16.mxu0 %v4912_v39  ;;  %v5020_v38 = vunpack.c.l.s8.bf16 %v4744_v35  ;;  %v4741_v39 = vld [vmem:[%s8525_s7 + $0x2a0] sm:$0xff] }
 0x70d   : > { %v7912_v52 = vld [vmem:[%s8519_s1 + $0x1d] sm:$0xf] }
 0x70f   : > { %5244 = vmatpush1.bf16.msra.mxu1 %v4909_v40  ;;  %5326 = vmatpush1.bf16.msra.mxu0 %v4911_v41  ;;  %v4743_v40 = vld [vmem:[%s8525_s7 + $0x2b0] sm:$0xff]  ;;  %v5017_v41 = vunpack.c.l.s8.bf16 %v4741_v39 }
 0x710   : > { %5245 = vmatprep.subr.bf16.mxu1 %v4922_v45  ;;  %5327 = vmatprep.subr.bf16.mxu0 %v4924_v46  ;;  %v5019_v42 = vunpack.c.l.s8.bf16 %v4743_v40  ;;  %v5032_v45 = vunpack.c.h.s8.bf16 %v4744_v35  ;;  %v5029_v46 = vunpack.c.h.s8.bf16 %v4741_v39  ;;  %v5031_v47 = vunpack.c.h.s8.bf16 %v4743_v40 }
 0x713   : > { %5246 = vmatpush1.bf16.msra.mxu1 %v4921_v51  ;;  %5328 = vmatpush1.bf16.msra.mxu0 %v4923_v4  ;;  %v7894_v51 = vld [vmem:[%s8525_s7 + $0x318] sm:$0xff]  ;;  %v5042_v4 = vunpack.c.l.s8.bf16 %v7889_v50 }
 0x714   : > { %5247 = vmatprep.subr.bf16.mxu1 %v4934_v17  ;;  %5329 = vmatprep.subr.bf16.mxu0 %v4936_v54  ;;  %v5044_v17 = vunpack.c.l.s8.bf16 %v7894_v51  ;;  %v4249_v54 = vld [vmem:[%s8519_s1 + $0x19] sm:$0xf] }
 0x715   : > { %v4258_v7 = vrot.slane %v4249_v54, %v7524_v60  ;;  %v4266_v63 = vrot.slane %v4249_v54, %v7526_v61 }
 0x717   : > { %5248 = vmatpush1.bf16.msra.mxu1 %v4933_v55  ;;  %5330 = vmatpush1.bf16.msra.mxu0 %v4935_v58  ;;  %v4254_v55 = vrot.slane %v4249_v54, %v7519_v56  ;;  %v4262_v58 = vrot.slane %v4249_v54, %v7521_v57 }
 0x718   : > { %5249 = vmatprep.subr.bf16.mxu1 %v4946_v49  ;;  %5331 = vmatprep.subr.bf16.mxu0 %v4948_v0 }
 0x71b   : > { %5250 = vmatpush1.bf16.msra.mxu1 %v4945_v2  ;;  %5332 = vmatpush1.bf16.msra.mxu0 %v4947_v3 }
 0x71c   : > { %5251 = vmatprep.subr.bf16.mxu1 %v4958_v5  ;;  %5333 = vmatprep.subr.bf16.mxu0 %v4960_v6 }
 0x71f   : > { %5252 = vmatpush1.bf16.msra.mxu1 %v4957_v8  ;;  %5334 = vmatpush1.bf16.msra.mxu0 %v4959_v1 }
 0x720   : > { %5253 = vmatprep.subr.bf16.mxu1 %v4970_v11  ;;  %5335 = vmatprep.subr.bf16.mxu0 %v4972_v12 }
 0x723   : > { %5254 = vmatpush1.bf16.msra.mxu1 %v4969_v33  ;;  %5336 = vmatpush1.bf16.msra.mxu0 %v4971_v24 }
 0x724   : > { %5255 = vmatprep.subr.bf16.mxu1 %v4982_v25  ;;  %5337 = vmatprep.subr.bf16.mxu0 %v4984_v26 }
 0x727   : > { %5256 = vmatpush1.bf16.msra.mxu1 %v4981_v16  ;;  %5338 = vmatpush1.bf16.msra.mxu0 %v4983_v14 }
 0x728   : > { %5257 = vmatprep.subr.bf16.mxu1 %v4994_v18  ;;  %5339 = vmatprep.subr.bf16.mxu0 %v4996_v29 }
 0x72b   : > { %5258 = vmatpush1.bf16.msra.mxu1 %v4993_v53  ;;  %5340 = vmatpush1.bf16.msra.mxu0 %v4995_v43 }
 0x72c   : > { %5259 = vmatprep.subr.bf16.mxu1 %v5006_v21  ;;  %5341 = vmatprep.subr.bf16.mxu0 %v5008_v22 }
 0x72f   : > { %5260 = vmatpush1.bf16.msra.mxu1 %v5005_v31  ;;  %5342 = vmatpush1.bf16.msra.mxu0 %v5007_v32 }
 0x730   : > { %5261 = vmatprep.subr.bf16.mxu1 %v5018_v36  ;;  %5343 = vmatprep.subr.bf16.mxu0 %v5020_v38 }
 0x733   : > { %5262 = vmatpush1.bf16.msra.mxu1 %v5017_v41  ;;  %5344 = vmatpush1.bf16.msra.mxu0 %v5019_v42 }
 0x734   : > { %5263 = vmatprep.subr.bf16.mxu1 %v5030_v44  ;;  %5345 = vmatprep.subr.bf16.mxu0 %v5032_v45  ;;  %v4598_v45 = vrot.slane %v7912_v52, %v7521_v57 }
 0x737   : > { %5264 = vmatpush1.bf16.msra.mxu1 %v5029_v46  ;;  %5346 = vmatpush1.bf16.msra.mxu0 %v5031_v47 }
 0x738   : > { %5274 = vmatprep.subr.bf16.mxu1 %v5042_v4  ;;  %5356 = vmatprep.subr.bf16.mxu0 %v5044_v17 }
 0x7cd   : > { %v4465_v49 = vpop.f32.mrb[0].mxu1  ;;  %v4506_v0 = vpop.f32.mrb[4].mxu0 }
 0x7ce   : > { %v4466_v59 = vadd.f32 %v4465_v49, %v4254_v55  ;;  %v4507_v62 = vadd.f32 %v4506_v0, %v4262_v58  ;;  %v4467_v2 = vpop.f32.mrb[1].mxu1  ;;  %v4508_v3 = vpop.f32.mrb[5].mxu0 }
 0x7cf   : > { %v4468_v5 = vadd.f32 %v4467_v2, %v4258_v7  ;;  %v4509_v6 = vadd.f32 %v4508_v3, %v4266_v63  ;;  %v4469_v8 = vpop.f32.mrb[2].mxu1  ;;  %v4510_v1 = vpop.f32.mrb[6].mxu0 }
 0x7d0   : > { %v4513_v10 = vsel %vm4176_vm5, %v4466_v59, 0.0  ;;  %v4527_v20 = vsel %vm4176_vm5, %v4507_v62, 0.0  ;;  %v4470_v11 = vpop.f32.mrb[3].mxu1  ;;  %v4511_v12 = vpop.f32.mrb[7].mxu0 }
 0x7d1   : > { %v4514_v13 = vrot.slane %v4513_v10, 4  ;;  %v4528_v9 = vrot.slane %v4527_v20, 4  ;;  %v4520_v33 = vsel %vm4176_vm5, %v4468_v5, 0.0  ;;  %v4534_v24 = vsel %vm4176_vm5, %v4509_v6, 0.0 }
 0x7d2   : > { %v4521_v25 = vrot.slane %v4520_v33, 4  ;;  %v4535_v26 = vrot.slane %v4534_v24, 4 }
 0x7d3   : > { %v4515_v16 = vadd.f32 %v4514_v13, %v4513_v10  ;;  %v4529_v14 = vadd.f32 %v4528_v9, %v4527_v20 }
 0x7d4   : > { %v4522_v34 = vadd.f32 %v4521_v25, %v4520_v33  ;;  %v4536_v37 = vadd.f32 %v4535_v26, %v4534_v24 }
 0x7d5   : > { %v4516_v18 = vrot.slane %v4515_v16, 2  ;;  %v4530_v29 = vrot.slane %v4529_v14, 2 }
 0x7d6   : > { %v4523_v19 = vrot.slane %v4522_v34, 2  ;;  %v4537_v30 = vrot.slane %v4536_v37, 2 }
 0x7d7   : > { %v4517_v53 = vadd.f32 %v4516_v18, %v4515_v16  ;;  %v4531_v43 = vadd.f32 %v4530_v29, %v4529_v14 }
 0x7d8   : > { %v4524_v21 = vadd.f32 %v4523_v19, %v4522_v34  ;;  %v4538_v22 = vadd.f32 %v4537_v30, %v4536_v37 }
 0x7d9   : > { %v4518_v31 = vrot.slane %v4517_v53, 1  ;;  %v4532_v32 = vrot.slane %v4531_v43, 1 }
 0x7da   : > { %v4525_v35 = vrot.slane %v4524_v21, 1  ;;  %v4539_v36 = vrot.slane %v4538_v22, 1 }
 0x7db   : > { %v4519_v38 = vadd.f32 %v4518_v31, %v4517_v53  ;;  %v4533_v39 = vadd.f32 %v4532_v32, %v4531_v43 }
 0x7dc   : > { %v4526_v40 = vadd.f32 %v4525_v35, %v4524_v21  ;;  %v4540_v41 = vadd.f32 %v4539_v36, %v4538_v22 }
 0x7dd   : > { %v4541_v42 = vmul.f32 0.5, %v4519_v38  ;;  %v4543_v44 = vmul.f32 0.5, %v4533_v39 }
 0x7de   : > { %v4542_v46 = vmul.f32 0.5, %v4526_v40  ;;  %v4544_v47 = vmul.f32 0.5, %v4540_v41  ;;  %v4590_v40 = vrot.slane %v7912_v52, %v7519_v56  ;;  %v4623_v41 = vld [vmem:[%s8519_s1 + $0x21] sm:$0xf] }
 0x7df   : > { %v4545_v4 = vsub.f32 %v4466_v59, %v4541_v42  ;;  %v4547_v17 = vsub.f32 %v4507_v62, %v4543_v44  ;;  %v4594_v42 = vrot.slane %v7912_v52, %v7524_v60  ;;  %v4602_v44 = vrot.slane %v7912_v52, %v7526_v61 }
 0x7e0   : > { %v4546_v54 = vsub.f32 %v4468_v5, %v4542_v46  ;;  %v4548_v55 = vsub.f32 %v4509_v6, %v4544_v47  ;;  %v4628_v46 = vrot.slane %v4623_v41, %v7519_v56 }
 0x7e1   : > { %v4549_v58 = vmul.f32 %v4545_v4, %v4545_v4  ;;  %v4551_v7 = vmul.f32 %v4547_v17, %v4547_v17  ;;  %v4609_v63 = vmul.f32 %v4598_v45, %v4547_v17  ;;  %v4607_v45 = vmul.f32 %v4590_v40, %v4545_v4 }
 0x7e2   : > { %v4550_v49 = vmul.f32 %v4546_v54, %v4546_v54  ;;  %v4552_v0 = vmul.f32 %v4548_v55, %v4548_v55  ;;  %v4636_v17 = vrot.slane %v4623_v41, %v7521_v57 }
 0x7e3   : > { %v4553_v2 = vsel %vm4176_vm5, %v4549_v58, 0.0  ;;  %v4567_v3 = vsel %vm4176_vm5, %v4551_v7, 0.0 }
 0x7e4   : > { %v4554_v8 = vrot.slane %v4553_v2, 4  ;;  %v4568_v1 = vrot.slane %v4567_v3, 4  ;;  %v4560_v10 = vsel %vm4176_vm5, %v4550_v49, 0.0  ;;  %v4574_v20 = vsel %vm4176_vm5, %v4552_v0, 0.0 }
 0x7e5   : > { %v4561_v11 = vrot.slane %v4560_v10, 4  ;;  %v4575_v59 = vrot.slane %v4574_v20, 4  ;;  %v4608_v49 = vmul.f32 %v4594_v42, %v4546_v54  ;;  %v4632_v0 = vrot.slane %v4623_v41, %v7524_v60  ;;  %v4753_v54 = vld [vmem:[%s8525_s7 + $0x300] sm:$0xff] }
 0x7e6   : > { %v4555_v62 = vadd.f32 %v4554_v8, %v4553_v2  ;;  %v4569_v5 = vadd.f32 %v4568_v1, %v4567_v3  ;;  %v4610_v8 = vmul.f32 %v4602_v44, %v4548_v55  ;;  %v4640_v1 = vrot.slane %v4623_v41, %v7526_v61 }
 0x7e7   : > { %v4562_v6 = vadd.f32 %v4561_v11, %v4560_v10  ;;  %v4576_v12 = vadd.f32 %v4575_v59, %v4574_v20 }
 0x7e8   : > { %v4556_v13 = vrot.slane %v4555_v62, 2  ;;  %v4570_v9 = vrot.slane %v4569_v5, 2 }
 0x7e9   : > { %v4563_v33 = vrot.slane %v4562_v6, 2  ;;  %v4577_v24 = vrot.slane %v4576_v12, 2 }
 0x7ea   : > { %v4557_v25 = vadd.f32 %v4556_v13, %v4555_v62  ;;  %v4571_v26 = vadd.f32 %v4570_v9, %v4569_v5  ;;  %v5041_v13 = vunpack.c.l.s8.bf16 %v4753_v54 }
 0x7eb   : > { %v4564_v16 = vadd.f32 %v4563_v33, %v4562_v6  ;;  %v4578_v14 = vadd.f32 %v4577_v24, %v4576_v12  ;;  %v5054_v24 = vunpack.c.h.s8.bf16 %v7889_v50 }
 0x7ec   : > { %v4558_v34 = vrot.slane %v4557_v25, 1  ;;  %v4572_v37 = vrot.slane %v4571_v26, 1 }
 0x7ed   : > { %v4565_v18 = vrot.slane %v4564_v16, 1  ;;  %v4579_v29 = vrot.slane %v4578_v14, 1 }
 0x7ee   : > { %v4559_v19 = vadd.f32 %v4558_v34, %v4557_v25  ;;  %v4573_v30 = vadd.f32 %v4572_v37, %v4571_v26  ;;  %v5056_v25 = vunpack.c.h.s8.bf16 %v7894_v51  ;;  %v4766_v26 = vld [vmem:[%s8525_s7 + $0x368] sm:$0xff]  ;;  %v5053_v34 = vunpack.c.h.s8.bf16 %v4753_v54  ;;  %v4803_v54 = vld [vmem:[%s8525_s7 + $0x490] sm:$0xff] }
 0x7ef   : > { %v4566_v53 = vadd.f32 %v4565_v18, %v4564_v16  ;;  %v4580_v43 = vadd.f32 %v4579_v29, %v4578_v14  ;;  %v4768_v16 = vld [vmem:[%s8525_s7 + $0x378] sm:$0xff]  ;;  %v5066_v51 = vunpack.c.l.s8.bf16 %v4766_v26  ;;  %v4765_v18 = vld [vmem:[%s8525_s7 + $0x360] sm:$0xff]  ;;  %v4767_v29 = vld [vmem:[%s8525_s7 + $0x370] sm:$0xff] }
 0x7f0   : > { %v4581_v21 = vmul.f32 0.5, %v4559_v19  ;;  %v4583_v22 = vmul.f32 0.5, %v4573_v30  ;;  %v5068_v37 = vunpack.c.l.s8.bf16 %v4768_v16  ;;  %v5065_v19 = vunpack.c.l.s8.bf16 %v4765_v18 }
 0x7f1   : > { %v4582_v31 = vmul.f32 0.5, %v4566_v53  ;;  %v4584_v32 = vmul.f32 0.5, %v4580_v43  ;;  %v5067_v30 = vunpack.c.l.s8.bf16 %v4767_v29  ;;  %v5078_v53 = vunpack.c.h.s8.bf16 %v4766_v26 }
 0x7f2   : > { %v4611_v35 = vadd.f32 1e-05, %v4581_v21  ;;  %v4613_v36 = vadd.f32 1e-05, %v4583_v22  ;;  %v5080_v43 = vunpack.c.h.s8.bf16 %v4768_v16  ;;  %v4778_v21 = vld [vmem:[%s8525_s7 + $0x3c8] sm:$0xff]  ;;  %v4780_v22 = vld [vmem:[%s8525_s7 + $0x3d8] sm:$0xff]  ;;  %v5151_v26 = vunpack.c.h.s8.bf16 %v4803_v54 }
 0x7f3   : > { %v4612_v38 = vadd.f32 1e-05, %v4582_v31  ;;  %v4614_v39 = vadd.f32 1e-05, %v4584_v32  ;;  %v5077_v31 = vunpack.c.h.s8.bf16 %v4765_v18  ;;  %v5079_v32 = vunpack.c.h.s8.bf16 %v4767_v29 }
 0x7f4   : > { %6425 = vrsqrt.f32 %v4611_v35  ;;  %v5090_v35 = vunpack.c.l.s8.bf16 %v4778_v21  ;;  %v5102_v42 = vunpack.c.h.s8.bf16 %v4778_v21  ;;  %v5104_v44 = vunpack.c.h.s8.bf16 %v4780_v22 }
 0x7f5   : > { %6427 = vrsqrt.f32 %v4613_v36  ;;  %v5092_v36 = vunpack.c.l.s8.bf16 %v4780_v22 }
 0x7f6   : > { %6429 = vrsqrt.f32 %v4612_v38  ;;  %v4777_v38 = vld [vmem:[%s8525_s7 + $0x3c0] sm:$0xff] }
 0x7f7   : > { %6431 = vrsqrt.f32 %v4614_v39  ;;  %v4779_v39 = vld [vmem:[%s8525_s7 + $0x3d0] sm:$0xff]  ;;  %v5089_v40 = vunpack.c.l.s8.bf16 %v4777_v38 }
 0x7f8   : > { %v5091_v41 = vunpack.c.l.s8.bf16 %v4779_v39 }
 0x7fe   : > { %v6426_v47 = vpop.eup %6425 }
 0x7ff   : > { %v6428_v58 = vpop.eup %6427  ;;  %v4619_v7 = vmul.f32 %v6426_v47, %v4607_v45  ;;  %v4790_v45 = vld [vmem:[%s8525_s7 + $0x428] sm:$0xff]  ;;  %v5101_v47 = vunpack.c.h.s8.bf16 %v4777_v38 }
 0x800   : > { %v6430_v2 = vpop.eup %6429  ;;  %v4621_v3 = vmul.f32 %v6428_v58, %v4609_v63  ;;  %v4755_v63 = vld [vmem:[%s8525_s7 + $0x310] sm:$0xff]  ;;  %v5114_v58 = vunpack.c.l.s8.bf16 %v4790_v45 }
 0x801   : > { %v6432_v10 = vpop.eup %6431  ;;  %v4645_v20 = vadd.f32 %v4628_v46, %v4619_v7  ;;  %v4620_v11 = vmul.f32 %v6430_v2, %v4608_v49  ;;  %v5043_v9 = vunpack.c.l.s8.bf16 %v4755_v63  ;;  %v5055_v50 = vunpack.c.h.s8.bf16 %v4755_v63  ;;  %v4792_v46 = vld [vmem:[%s8525_s7 + $0x438] sm:$0xff]  ;;  %v4789_v49 = vld [vmem:[%s8525_s7 + $0x420] sm:$0xff] }
 0x802   : > { %v7933_v52 = vadd.f32 %v4636_v17, %v4621_v3  ;;  %v4622_v4 = vmul.f32 %v6432_v10, %v4610_v8  ;;  %v5103_v17 = vunpack.c.h.s8.bf16 %v4779_v39  ;;  %v5116_v7 = vunpack.c.l.s8.bf16 %v4792_v46  ;;  %v4802_v10 = vld [vmem:[%s8525_s7 + $0x488] sm:$0xff] }
 0x803   : > { %v4646_v59 = vadd.f32 %v4632_v0, %v4620_v11  ;;  %v4649_v62 = vmax.f32 %v4645_v20, 0.0  ;;  %v4791_v0 = vld [vmem:[%s8525_s7 + $0x430] sm:$0xff]  ;;  %v5113_v2 = vunpack.c.l.s8.bf16 %v4789_v49  ;;  %v5126_v8 = vunpack.c.h.s8.bf16 %v4790_v45  ;;  %v4804_v20 = vld [vmem:[%s8525_s7 + $0x498] sm:$0xff] }
 0x804   : > { %v4648_v5 = vadd.f32 %v4640_v1, %v4622_v4  ;;  %v5115_v3 = vunpack.c.l.s8.bf16 %v4791_v0  ;;  %v5128_v1 = vunpack.c.h.s8.bf16 %v4792_v46  ;;  %v5125_v11 = vunpack.c.h.s8.bf16 %v4789_v49 }
 0x805   : > { %v4650_v55 = vmax.f32 %v4646_v59, 0.0  ;;  %v7943_v33 = vpack.c.bf16 %v4649_v62, %v4649_v62  ;;  %v5127_v4 = vunpack.c.h.s8.bf16 %v4791_v0  ;;  %v5138_v59 = vunpack.c.l.s8.bf16 %v4802_v10 }
 0x806   : > { %v4652_v6 = vmax.f32 %v4648_v5, 0.0  ;;  %v5140_v62 = vunpack.c.l.s8.bf16 %v4804_v20  ;;  %v4801_v5 = vld [vmem:[%s8525_s7 + $0x480] sm:$0xff] }
 0x807   : > { %v7941_v12 = vpack.c.bf16 %v4650_v55, %v4650_v55  ;;  %v5137_v63 = vunpack.c.l.s8.bf16 %v4801_v5  ;;  %v5139_v55 = vunpack.c.l.s8.bf16 %v4803_v54 }
 0x808   : > { %v7955_v14 = vpack.c.bf16 %v4652_v6, %v4652_v6  ;;  %v5150_v6 = vunpack.c.h.s8.bf16 %v4802_v10 }
 0x809   : > { %5265 = vmatprep.mubr.bf16.mxu1 %v7941_v12  ;;  %5347 = vmatprep.mubr.bf16.mxu0 %v7941_v12 }
 0x80a   : > { %5266 = vmatmul.mubr.bf16.vlgmr.msra.gmra.mrb[4].mxu1 %v7943_v33  ;;  %5348 = vmatmul.mubr.bf16.vlgmr.msra.gmra.mrb[8].mxu0 %v7943_v33 }
 0x80b   : > { %5275 = vmatpush1.bf16.msra.mxu1 %v5041_v13  ;;  %5357 = vmatpush1.bf16.msra.mxu0 %v5043_v9  ;;  %v5152_v13 = vunpack.c.h.s8.bf16 %v4804_v20  ;;  %v4814_v9 = vld [vmem:[%s8525_s7 + $0x4e8] sm:$0xff]  ;;  %v4651_v20 = vmax.f32 %v7933_v52, 0.0 }
 0x80c   : > { %5306 = vmatprep.mubr.bf16.mxu1 %v7955_v14  ;;  %5388 = vmatprep.mubr.bf16.mxu0 %v7955_v14  ;;  %v5162_v16 = vunpack.c.l.s8.bf16 %v4814_v9  ;;  %v5174_v29 = vunpack.c.h.s8.bf16 %v4814_v9 }
 0x80d   : > { %5276 = vmatprep.subr.bf16.mxu1 %v5054_v24  ;;  %5358 = vmatprep.subr.bf16.mxu0 %v5056_v25  ;;  %v4816_v24 = vld [vmem:[%s8525_s7 + $0x4f8] sm:$0xff]  ;;  %v5149_v25 = vunpack.c.h.s8.bf16 %v4801_v5  ;;  %v8052_v54 = vpack.c.bf16 %v4651_v20, %v4651_v20 }
 0x80f   : > { %5277 = vmatpush1.bf16.msra.mxu1 %v5053_v34  ;;  %5359 = vmatpush1.bf16.msra.mxu0 %v5055_v50  ;;  %v5164_v34 = vunpack.c.l.s8.bf16 %v4816_v24  ;;  %v4813_v50 = vld [vmem:[%s8525_s7 + $0x4e0] sm:$0xff] }
 0x810   : > { %5278 = vmatprep.subr.bf16.mxu1 %v5066_v51  ;;  %5360 = vmatprep.subr.bf16.mxu0 %v5068_v37  ;;  %v4815_v51 = vld [vmem:[%s8525_s7 + $0x4f0] sm:$0xff]  ;;  %v5161_v37 = vunpack.c.l.s8.bf16 %v4813_v50 }
 0x811   : > { %v5163_v18 = vunpack.c.l.s8.bf16 %v4815_v51  ;;  %v5175_v21 = vunpack.c.h.s8.bf16 %v4815_v51 }
 0x813   : > { %5279 = vmatpush1.bf16.msra.mxu1 %v5065_v19  ;;  %5361 = vmatpush1.bf16.msra.mxu0 %v5067_v30  ;;  %v5176_v19 = vunpack.c.h.s8.bf16 %v4816_v24  ;;  %v4826_v30 = vld [vmem:[%s8525_s7 + $0x548] sm:$0xff] }
 0x814   : > { %5280 = vmatprep.subr.bf16.mxu1 %v5078_v53  ;;  %5362 = vmatprep.subr.bf16.mxu0 %v5080_v43  ;;  %v4828_v53 = vld [vmem:[%s8525_s7 + $0x558] sm:$0xff]  ;;  %v5173_v43 = vunpack.c.h.s8.bf16 %v4813_v50  ;;  %v5186_v22 = vunpack.c.l.s8.bf16 %v4826_v30  ;;  %v5198_v39 = vunpack.c.h.s8.bf16 %v4826_v30 }
 0x817   : > { %5281 = vmatpush1.bf16.msra.mxu1 %v5077_v31  ;;  %5363 = vmatpush1.bf16.msra.mxu0 %v5079_v32  ;;  %v5188_v31 = vunpack.c.l.s8.bf16 %v4828_v53  ;;  %v4825_v32 = vld [vmem:[%s8525_s7 + $0x540] sm:$0xff] }
 0x818   : > { %5282 = vmatprep.subr.bf16.mxu1 %v5090_v35  ;;  %5364 = vmatprep.subr.bf16.mxu0 %v5092_v36  ;;  %v4827_v35 = vld [vmem:[%s8525_s7 + $0x550] sm:$0xff]  ;;  %v5185_v36 = vunpack.c.l.s8.bf16 %v4825_v32 }
 0x819   : > { %v5187_v38 = vunpack.c.l.s8.bf16 %v4827_v35  ;;  %v5199_v45 = vunpack.c.h.s8.bf16 %v4827_v35 }
 0x81b   : > { %5283 = vmatpush1.bf16.msra.mxu1 %v5089_v40  ;;  %5365 = vmatpush1.bf16.msra.mxu0 %v5091_v41  ;;  %v5200_v40 = vunpack.c.h.s8.bf16 %v4828_v53  ;;  %v4838_v41 = vld [vmem:[%s8525_s7 + $0x5a8] sm:$0xff] }
 0x81c   : > { %5284 = vmatprep.subr.bf16.mxu1 %v5102_v42  ;;  %5366 = vmatprep.subr.bf16.mxu0 %v5104_v44  ;;  %v4840_v42 = vld [vmem:[%s8525_s7 + $0x5b8] sm:$0xff]  ;;  %v5197_v44 = vunpack.c.h.s8.bf16 %v4825_v32  ;;  %v5210_v46 = vunpack.c.l.s8.bf16 %v4838_v41  ;;  %v5222_v0 = vunpack.c.h.s8.bf16 %v4838_v41 }
 0x81f   : > { %5285 = vmatpush1.bf16.msra.mxu1 %v5101_v47  ;;  %5367 = vmatpush1.bf16.msra.mxu0 %v5103_v17  ;;  %v5212_v47 = vunpack.c.l.s8.bf16 %v4840_v42  ;;  %v4837_v17 = vld [vmem:[%s8525_s7 + $0x5a0] sm:$0xff] }
 0x820   : > { %5286 = vmatprep.subr.bf16.mxu1 %v5114_v58  ;;  %5368 = vmatprep.subr.bf16.mxu0 %v5116_v7  ;;  %v4839_v58 = vld [vmem:[%s8525_s7 + $0x5b0] sm:$0xff]  ;;  %v5209_v7 = vunpack.c.l.s8.bf16 %v4837_v17 }
 0x821   : > { %v5211_v49 = vunpack.c.l.s8.bf16 %v4839_v58  ;;  %v5223_v10 = vunpack.c.h.s8.bf16 %v4839_v58 }
 0x823   : > { %5287 = vmatpush1.bf16.msra.mxu1 %v5113_v2  ;;  %5369 = vmatpush1.bf16.msra.mxu0 %v5115_v3  ;;  %v5224_v2 = vunpack.c.h.s8.bf16 %v4840_v42  ;;  %v4662_v3 = vld [vmem:[%s8525_s7 + $0x28] sm:$0xff] }
 0x824   : > { %5288 = vmatprep.subr.bf16.mxu1 %v5126_v8  ;;  %5370 = vmatprep.subr.bf16.mxu0 %v5128_v1  ;;  %v4664_v8 = vld [vmem:[%s8525_s7 + $0x38] sm:$0xff]  ;;  %v5221_v1 = vunpack.c.h.s8.bf16 %v4837_v17 }
 0x827   : > { %5289 = vmatpush1.bf16.msra.mxu1 %v5125_v11  ;;  %5371 = vmatpush1.bf16.msra.mxu0 %v5127_v4  ;;  %v4854_v11 = vunpack.c.l.s8.bf16 %v4662_v3  ;;  %v4856_v4 = vunpack.c.l.s8.bf16 %v4664_v8 }
 0x828   : > { %5290 = vmatprep.subr.bf16.mxu1 %v5138_v59  ;;  %5372 = vmatprep.subr.bf16.mxu0 %v5140_v62  ;;  %v4661_v59 = vld [vmem:[%s8525_s7 + $0x20] sm:$0xff]  ;;  %v4663_v62 = vld [vmem:[%s8525_s7 + $0x30] sm:$0xff] }
 0x829   : > { %v4853_v5 = vunpack.c.l.s8.bf16 %v4661_v59  ;;  %v4855_v52 = vunpack.c.l.s8.bf16 %v4663_v62  ;;  %v4865_v9 = vunpack.c.h.s8.bf16 %v4661_v59  ;;  %v4867_v24 = vunpack.c.h.s8.bf16 %v4663_v62 }
 0x82b   : > { %5291 = vmatpush1.bf16.msra.mxu1 %v5137_v63  ;;  %5373 = vmatpush1.bf16.msra.mxu0 %v5139_v55  ;;  %v4866_v63 = vunpack.c.h.s8.bf16 %v4662_v3  ;;  %v4868_v55 = vunpack.c.h.s8.bf16 %v4664_v8 }
 0x82c   : > { %5292 = vmatprep.subr.bf16.mxu1 %v5150_v6  ;;  %5374 = vmatprep.subr.bf16.mxu0 %v5152_v13  ;;  %v4674_v6 = vld [vmem:[%s8525_s7 + $0x88] sm:$0xff]  ;;  %v4676_v13 = vld [vmem:[%s8525_s7 + $0x98] sm:$0xff] }
 0x82f   : > { %5293 = vmatpush1.bf16.msra.mxu1 %v5149_v25  ;;  %5375 = vmatpush1.bf16.msra.mxu0 %v5151_v26  ;;  %v4878_v25 = vunpack.c.l.s8.bf16 %v4674_v6  ;;  %v4673_v26 = vld [vmem:[%s8525_s7 + $0x80] sm:$0xff] }
 0x830   : > { %5294 = vmatprep.subr.bf16.mxu1 %v5162_v16  ;;  %5376 = vmatprep.subr.bf16.mxu0 %v5164_v34  ;;  %v4880_v16 = vunpack.c.l.s8.bf16 %v4676_v13  ;;  %v4675_v34 = vld [vmem:[%s8525_s7 + $0x90] sm:$0xff]  ;;  %v4877_v50 = vunpack.c.l.s8.bf16 %v4673_v26  ;;  %v4889_v30 = vunpack.c.h.s8.bf16 %v4673_v26 }
 0x831   : > { %v4879_v51 = vunpack.c.l.s8.bf16 %v4675_v34  ;;  %v4891_v53 = vunpack.c.h.s8.bf16 %v4675_v34 }
 0x833   : > { %5295 = vmatpush1.bf16.msra.mxu1 %v5161_v37  ;;  %5377 = vmatpush1.bf16.msra.mxu0 %v5163_v18  ;;  %v4890_v37 = vunpack.c.h.s8.bf16 %v4674_v6  ;;  %v4892_v18 = vunpack.c.h.s8.bf16 %v4676_v13 }
 0x834   : > { %5296 = vmatprep.subr.bf16.mxu1 %v5174_v29  ;;  %5378 = vmatprep.subr.bf16.mxu0 %v5176_v19  ;;  %v4686_v29 = vld [vmem:[%s8525_s7 + $0xe8] sm:$0xff]  ;;  %v4688_v19 = vld [vmem:[%s8525_s7 + $0xf8] sm:$0xff] }
 0x837   : > { %5297 = vmatpush1.bf16.msra.mxu1 %v5173_v43  ;;  %5379 = vmatpush1.bf16.msra.mxu0 %v5175_v21  ;;  %v4902_v43 = vunpack.c.l.s8.bf16 %v4686_v29  ;;  %v4685_v21 = vld [vmem:[%s8525_s7 + $0xe0] sm:$0xff] }
 0x838   : > { %5298 = vmatprep.subr.bf16.mxu1 %v5186_v22  ;;  %5380 = vmatprep.subr.bf16.mxu0 %v5188_v31  ;;  %v4904_v22 = vunpack.c.l.s8.bf16 %v4688_v19  ;;  %v4687_v31 = vld [vmem:[%s8525_s7 + $0xf0] sm:$0xff]  ;;  %v4901_v32 = vunpack.c.l.s8.bf16 %v4685_v21  ;;  %v4913_v41 = vunpack.c.h.s8.bf16 %v4685_v21 }
 0x839   : > { %v4903_v35 = vunpack.c.l.s8.bf16 %v4687_v31  ;;  %v4915_v42 = vunpack.c.h.s8.bf16 %v4687_v31 }
 0x83b   : > { %5299 = vmatpush1.bf16.msra.mxu1 %v5185_v36  ;;  %5381 = vmatpush1.bf16.msra.mxu0 %v5187_v38  ;;  %v4914_v36 = vunpack.c.h.s8.bf16 %v4686_v29  ;;  %v4916_v38 = vunpack.c.h.s8.bf16 %v4688_v19 }
 0x83c   : > { %5300 = vmatprep.subr.bf16.mxu1 %v5198_v39  ;;  %5382 = vmatprep.subr.bf16.mxu0 %v5200_v40  ;;  %v4698_v39 = vld [vmem:[%s8525_s7 + $0x148] sm:$0xff]  ;;  %v4700_v40 = vld [vmem:[%s8525_s7 + $0x158] sm:$0xff] }
 0x83f   : > { %5301 = vmatpush1.bf16.msra.mxu1 %v5197_v44  ;;  %5383 = vmatpush1.bf16.msra.mxu0 %v5199_v45  ;;  %v4926_v44 = vunpack.c.l.s8.bf16 %v4698_v39  ;;  %v4697_v45 = vld [vmem:[%s8525_s7 + $0x140] sm:$0xff] }
 0x840   : > { %5302 = vmatprep.subr.bf16.mxu1 %v5210_v46  ;;  %5384 = vmatprep.subr.bf16.mxu0 %v5212_v47  ;;  %v4928_v46 = vunpack.c.l.s8.bf16 %v4700_v40  ;;  %v4699_v47 = vld [vmem:[%s8525_s7 + $0x150] sm:$0xff]  ;;  %v4925_v17 = vunpack.c.l.s8.bf16 %v4697_v45  ;;  %v4937_v3 = vunpack.c.h.s8.bf16 %v4697_v45 }
 0x841   : > { %v4927_v58 = vunpack.c.l.s8.bf16 %v4699_v47  ;;  %v4939_v8 = vunpack.c.h.s8.bf16 %v4699_v47 }
 0x843   : > { %5303 = vmatpush1.bf16.msra.mxu1 %v5209_v7  ;;  %5385 = vmatpush1.bf16.msra.mxu0 %v5211_v49  ;;  %v4938_v7 = vunpack.c.h.s8.bf16 %v4698_v39  ;;  %v4940_v49 = vunpack.c.h.s8.bf16 %v4700_v40 }
 0x844   : > { %5304 = vmatprep.subr.bf16.mxu1 %v5222_v0  ;;  %5386 = vmatprep.subr.bf16.mxu0 %v5224_v2  ;;  %v4710_v0 = vld [vmem:[%s8525_s7 + $0x1a8] sm:$0xff]  ;;  %v4712_v2 = vld [vmem:[%s8525_s7 + $0x1b8] sm:$0xff] }
 0x845   : > { %v4952_v20 = vunpack.c.l.s8.bf16 %v4712_v2  ;;  %v4962_v62 = vunpack.c.h.s8.bf16 %v4710_v0 }
 0x847   : > { %5305 = vmatpush1.bf16.msra.mxu1 %v5221_v1  ;;  %5387 = vmatpush1.bf16.msra.mxu0 %v5223_v10  ;;  %v4950_v1 = vunpack.c.l.s8.bf16 %v4710_v0  ;;  %v4709_v10 = vld [vmem:[%s8525_s7 + $0x1a0] sm:$0xff] }
 0x848   : > { %5397 = vmatprep.subr.bf16.mxu1 %v4854_v11  ;;  %5479 = vmatprep.subr.bf16.mxu0 %v4856_v4  ;;  %v4711_v11 = vld [vmem:[%s8525_s7 + $0x1b0] sm:$0xff]  ;;  %v4949_v4 = vunpack.c.l.s8.bf16 %v4709_v10 }
 0x849   : > { %v4951_v59 = vunpack.c.l.s8.bf16 %v4711_v11  ;;  %v4963_v6 = vunpack.c.h.s8.bf16 %v4711_v11 }
 0x84a   : > { %5307 = vmatmul.mubr.bf16.vlgmr.msra.gmra.mrb[4].mxu1 %v8052_v54  ;;  %5389 = vmatmul.mubr.bf16.vlgmr.msra.gmra.mrb[8].mxu0 %v8052_v54 }
 0x84b   : > { %5398 = vmatpush1.bf16.msra.mxu1 %v4853_v5  ;;  %5429 = vmatprep.mubr.bf16.mxu1 %v7941_v12  ;;  %v4964_v5 = vunpack.c.h.s8.bf16 %v4712_v2 }
 0x84c   : > { %5480 = vmatpush1.bf16.msra.mxu0 %v4855_v52  ;;  %5511 = vmatprep.mubr.bf16.mxu0 %v7941_v12  ;;  %v4722_v52 = vld [vmem:[%s8525_s7 + $0x208] sm:$0xff] }
 0x84d   : > { %5399 = vmatprep.subr.bf16.mxu1 %v4866_v63  ;;  %5481 = vmatprep.subr.bf16.mxu0 %v4868_v55  ;;  %v4724_v63 = vld [vmem:[%s8525_s7 + $0x218] sm:$0xff]  ;;  %v4961_v55 = vunpack.c.h.s8.bf16 %v4709_v10  ;;  %v4974_v13 = vunpack.c.l.s8.bf16 %v4722_v52  ;;  %v4986_v34 = vunpack.c.h.s8.bf16 %v4722_v52 }
 0x84f   : > { %5400 = vmatpush1.bf16.msra.mxu1 %v4865_v9  ;;  %v4721_v9 = vld [vmem:[%s8525_s7 + $0x200] sm:$0xff] }
 0x850   : > { %5482 = vmatpush1.bf16.msra.mxu0 %v4867_v24  ;;  %5401 = vmatprep.subr.bf16.mxu1 %v4878_v25  ;;  %v4976_v24 = vunpack.c.l.s8.bf16 %v4724_v63  ;;  %v4723_v25 = vld [vmem:[%s8525_s7 + $0x210] sm:$0xff]  ;;  %v4973_v26 = vunpack.c.l.s8.bf16 %v4721_v9 }
 0x851   : > { %5483 = vmatprep.subr.bf16.mxu0 %v4880_v16  ;;  %v4975_v16 = vunpack.c.l.s8.bf16 %v4723_v25  ;;  %v4987_v29 = vunpack.c.h.s8.bf16 %v4723_v25 }
 0x853   : > { %5402 = vmatpush1.bf16.msra.mxu1 %v4877_v50  ;;  %v4988_v50 = vunpack.c.h.s8.bf16 %v4724_v63 }
 0x854   : > { %5484 = vmatpush1.bf16.msra.mxu0 %v4879_v51  ;;  %5403 = vmatprep.subr.bf16.mxu1 %v4890_v37  ;;  %v4734_v51 = vld [vmem:[%s8525_s7 + $0x268] sm:$0xff]  ;;  %v4736_v37 = vld [vmem:[%s8525_s7 + $0x278] sm:$0xff] }
 0x855   : > { %5485 = vmatprep.subr.bf16.mxu0 %v4892_v18  ;;  %v4985_v18 = vunpack.c.h.s8.bf16 %v4721_v9  ;;  %v4998_v19 = vunpack.c.l.s8.bf16 %v4734_v51  ;;  %v5010_v31 = vunpack.c.h.s8.bf16 %v4734_v51 }
 0x857   : > { %5404 = vmatpush1.bf16.msra.mxu1 %v4889_v30  ;;  %v4733_v30 = vld [vmem:[%s8525_s7 + $0x260] sm:$0xff] }
 0x858   : > { %5486 = vmatpush1.bf16.msra.mxu0 %v4891_v53  ;;  %5405 = vmatprep.subr.bf16.mxu1 %v4902_v43  ;;  %v5000_v53 = vunpack.c.l.s8.bf16 %v4736_v37  ;;  %v4735_v43 = vld [vmem:[%s8525_s7 + $0x270] sm:$0xff]  ;;  %v4997_v21 = vunpack.c.l.s8.bf16 %v4733_v30 }
 0x859   : > { %5487 = vmatprep.subr.bf16.mxu0 %v4904_v22  ;;  %v4999_v22 = vunpack.c.l.s8.bf16 %v4735_v43  ;;  %v5011_v39 = vunpack.c.h.s8.bf16 %v4735_v43 }
 0x85b   : > { %5406 = vmatpush1.bf16.msra.mxu1 %v4901_v32  ;;  %v5012_v32 = vunpack.c.h.s8.bf16 %v4736_v37 }
 0x85c   : > { %5488 = vmatpush1.bf16.msra.mxu0 %v4903_v35  ;;  %5407 = vmatprep.subr.bf16.mxu1 %v4914_v36  ;;  %v4746_v35 = vld [vmem:[%s8525_s7 + $0x2c8] sm:$0xff]  ;;  %v4748_v36 = vld [vmem:[%s8525_s7 + $0x2d8] sm:$0xff] }
 0x85d   : > { %5489 = vmatprep.subr.bf16.mxu0 %v4916_v38  ;;  %v5009_v38 = vunpack.c.h.s8.bf16 %v4733_v30  ;;  %v5022_v40 = vunpack.c.l.s8.bf16 %v4746_v35  ;;  %v5034_v47 = vunpack.c.h.s8.bf16 %v4746_v35 }
 0x85f   : > { %5408 = vmatpush1.bf16.msra.mxu1 %v4913_v41  ;;  %v4745_v41 = vld [vmem:[%s8525_s7 + $0x2c0] sm:$0xff] }
 0x860   : > { %5490 = vmatpush1.bf16.msra.mxu0 %v4915_v42  ;;  %5409 = vmatprep.subr.bf16.mxu1 %v4926_v44  ;;  %v5024_v42 = vunpack.c.l.s8.bf16 %v4748_v36  ;;  %v4747_v44 = vld [vmem:[%s8525_s7 + $0x2d0] sm:$0xff]  ;;  %v5021_v45 = vunpack.c.l.s8.bf16 %v4745_v41 }
 0x861   : > { %5491 = vmatprep.subr.bf16.mxu0 %v4928_v46  ;;  %v5023_v46 = vunpack.c.l.s8.bf16 %v4747_v44  ;;  %v5035_v0 = vunpack.c.h.s8.bf16 %v4747_v44 }
 0x863   : > { %5410 = vmatpush1.bf16.msra.mxu1 %v4925_v17  ;;  %v5036_v17 = vunpack.c.h.s8.bf16 %v4748_v36 }
 0x864   : > { %5492 = vmatpush1.bf16.msra.mxu0 %v4927_v58  ;;  %5411 = vmatprep.subr.bf16.mxu1 %v4938_v7  ;;  %v4758_v58 = vld [vmem:[%s8525_s7 + $0x328] sm:$0xff]  ;;  %v4760_v7 = vld [vmem:[%s8525_s7 + $0x338] sm:$0xff] }
 0x865   : > { %5493 = vmatprep.subr.bf16.mxu0 %v4940_v49  ;;  %v5033_v49 = vunpack.c.h.s8.bf16 %v4745_v41  ;;  %v5046_v2 = vunpack.c.l.s8.bf16 %v4758_v58  ;;  %v5058_v11 = vunpack.c.h.s8.bf16 %v4758_v58 }
 0x867   : > { %5412 = vmatpush1.bf16.msra.mxu1 %v4937_v3  ;;  %v4757_v3 = vld [vmem:[%s8525_s7 + $0x320] sm:$0xff] }
 0x868   : > { %5494 = vmatpush1.bf16.msra.mxu0 %v4939_v8  ;;  %5413 = vmatprep.subr.bf16.mxu1 %v4950_v1  ;;  %v5048_v8 = vunpack.c.l.s8.bf16 %v4760_v7  ;;  %v4759_v1 = vld [vmem:[%s8525_s7 + $0x330] sm:$0xff]  ;;  %v5045_v10 = vunpack.c.l.s8.bf16 %v4757_v3 }
 0x869   : > { %5495 = vmatprep.subr.bf16.mxu0 %v4952_v20  ;;  %v5047_v20 = vunpack.c.l.s8.bf16 %v4759_v1  ;;  %v5059_v52 = vunpack.c.h.s8.bf16 %v4759_v1 }
 0x86b   : > { %5414 = vmatpush1.bf16.msra.mxu1 %v4949_v4  ;;  %v4770_v4 = vld [vmem:[%s8525_s7 + $0x388] sm:$0xff] }
 0x86c   : > { %5496 = vmatpush1.bf16.msra.mxu0 %v4951_v59  ;;  %5415 = vmatprep.subr.bf16.mxu1 %v4962_v62  ;;  %v5060_v59 = vunpack.c.h.s8.bf16 %v4760_v7  ;;  %v4772_v62 = vld [vmem:[%s8525_s7 + $0x398] sm:$0xff]  ;;  %v5070_v63 = vunpack.c.l.s8.bf16 %v4770_v4  ;;  %v5082_v25 = vunpack.c.h.s8.bf16 %v4770_v4 }
 0x86d   : > { %5497 = vmatprep.subr.bf16.mxu0 %v4964_v5  ;;  %v5057_v5 = vunpack.c.h.s8.bf16 %v4757_v3 }
 0x86f   : > { %5416 = vmatpush1.bf16.msra.mxu1 %v4961_v55  ;;  %v4769_v55 = vld [vmem:[%s8525_s7 + $0x380] sm:$0xff] }
 0x870   : > { %5498 = vmatpush1.bf16.msra.mxu0 %v4963_v6  ;;  %5417 = vmatprep.subr.bf16.mxu1 %v4974_v13  ;;  %v5072_v6 = vunpack.c.l.s8.bf16 %v4772_v62  ;;  %v4771_v13 = vld [vmem:[%s8525_s7 + $0x390] sm:$0xff]  ;;  %v5069_v9 = vunpack.c.l.s8.bf16 %v4769_v55 }
 0x871   : > { %5499 = vmatprep.subr.bf16.mxu0 %v4976_v24  ;;  %v5071_v24 = vunpack.c.l.s8.bf16 %v4771_v13  ;;  %v5083_v51 = vunpack.c.h.s8.bf16 %v4771_v13 }
 0x873   : > { %5418 = vmatpush1.bf16.msra.mxu1 %v4973_v26  ;;  %v5084_v26 = vunpack.c.h.s8.bf16 %v4772_v62 }
 0x874   : > { %5500 = vmatpush1.bf16.msra.mxu0 %v4975_v16  ;;  %5419 = vmatprep.subr.bf16.mxu1 %v4986_v34  ;;  %v4782_v16 = vld [vmem:[%s8525_s7 + $0x3e8] sm:$0xff]  ;;  %v4784_v34 = vld [vmem:[%s8525_s7 + $0x3f8] sm:$0xff] }
 0x875   : > { %5501 = vmatprep.subr.bf16.mxu0 %v4988_v50  ;;  %v5081_v50 = vunpack.c.h.s8.bf16 %v4769_v55  ;;  %v5094_v37 = vunpack.c.l.s8.bf16 %v4782_v16  ;;  %v5106_v43 = vunpack.c.h.s8.bf16 %v4782_v16 }
 0x877   : > { %5420 = vmatpush1.bf16.msra.mxu1 %v4985_v18  ;;  %v4781_v18 = vld [vmem:[%s8525_s7 + $0x3e0] sm:$0xff] }
 0x878   : > { %5502 = vmatpush1.bf16.msra.mxu0 %v4987_v29  ;;  %5421 = vmatprep.subr.bf16.mxu1 %v4998_v19  ;;  %v5096_v29 = vunpack.c.l.s8.bf16 %v4784_v34  ;;  %v4783_v19 = vld [vmem:[%s8525_s7 + $0x3f0] sm:$0xff]  ;;  %v5093_v30 = vunpack.c.l.s8.bf16 %v4781_v18 }
 0x879   : > { %5503 = vmatprep.subr.bf16.mxu0 %v5000_v53  ;;  %v5095_v53 = vunpack.c.l.s8.bf16 %v4783_v19  ;;  %v5107_v35 = vunpack.c.h.s8.bf16 %v4783_v19 }
 0x87b   : > { %5422 = vmatpush1.bf16.msra.mxu1 %v4997_v21  ;;  %v5108_v21 = vunpack.c.h.s8.bf16 %v4784_v34 }
 0x87c   : > { %5504 = vmatpush1.bf16.msra.mxu0 %v4999_v22  ;;  %5423 = vmatprep.subr.bf16.mxu1 %v5010_v31  ;;  %v4794_v22 = vld [vmem:[%s8525_s7 + $0x448] sm:$0xff]  ;;  %v4796_v31 = vld [vmem:[%s8525_s7 + $0x458] sm:$0xff] }
 0x87d   : > { %5505 = vmatprep.subr.bf16.mxu0 %v5012_v32  ;;  %v5105_v32 = vunpack.c.h.s8.bf16 %v4781_v18  ;;  %v5118_v36 = vunpack.c.l.s8.bf16 %v4794_v22  ;;  %v5130_v44 = vunpack.c.h.s8.bf16 %v4794_v22 }
 0x87f   : > { %5424 = vmatpush1.bf16.msra.mxu1 %v5009_v38  ;;  %v4793_v38 = vld [vmem:[%s8525_s7 + $0x440] sm:$0xff] }
 0x880   : > { %5506 = vmatpush1.bf16.msra.mxu0 %v5011_v39  ;;  %5425 = vmatprep.subr.bf16.mxu1 %v5022_v40  ;;  %v5120_v39 = vunpack.c.l.s8.bf16 %v4796_v31  ;;  %v4795_v40 = vld [vmem:[%s8525_s7 + $0x450] sm:$0xff]  ;;  %v5117_v41 = vunpack.c.l.s8.bf16 %v4793_v38 }
 0x881   : > { %5507 = vmatprep.subr.bf16.mxu0 %v5024_v42  ;;  %v5119_v42 = vunpack.c.l.s8.bf16 %v4795_v40  ;;  %v5131_v58 = vunpack.c.h.s8.bf16 %v4795_v40 }
 0x883   : > { %5426 = vmatpush1.bf16.msra.mxu1 %v5021_v45  ;;  %v5132_v45 = vunpack.c.h.s8.bf16 %v4796_v31 }
 0x884   : > { %5508 = vmatpush1.bf16.msra.mxu0 %v5023_v46  ;;  %5427 = vmatprep.subr.bf16.mxu1 %v5034_v47  ;;  %v4806_v46 = vld [vmem:[%s8525_s7 + $0x4a8] sm:$0xff]  ;;  %v4808_v47 = vld [vmem:[%s8525_s7 + $0x4b8] sm:$0xff] }
 0x885   : > { %5509 = vmatprep.subr.bf16.mxu0 %v5036_v17  ;;  %v5129_v17 = vunpack.c.h.s8.bf16 %v4793_v38  ;;  %v5142_v7 = vunpack.c.l.s8.bf16 %v4806_v46  ;;  %v5154_v1 = vunpack.c.h.s8.bf16 %v4806_v46 }
 0x887   : > { %5428 = vmatpush1.bf16.msra.mxu1 %v5033_v49  ;;  %v4805_v49 = vld [vmem:[%s8525_s7 + $0x4a0] sm:$0xff] }
 0x888   : > { %5510 = vmatpush1.bf16.msra.mxu0 %v5035_v0  ;;  %5438 = vmatprep.subr.bf16.mxu1 %v5046_v2  ;;  %v5144_v0 = vunpack.c.l.s8.bf16 %v4808_v47  ;;  %v4807_v2 = vld [vmem:[%s8525_s7 + $0x4b0] sm:$0xff]  ;;  %v5141_v3 = vunpack.c.l.s8.bf16 %v4805_v49  ;;  %v5153_v4 = vunpack.c.h.s8.bf16 %v4805_v49 }
 0x889   : > { %5520 = vmatprep.subr.bf16.mxu0 %v5048_v8  ;;  %v5143_v8 = vunpack.c.l.s8.bf16 %v4807_v2 }
 0x88a   : > { %5430 = vmatmul.mubr.bf16.vlgmr.msra.gmra.mrb[8].mxu1 %v7943_v33 }
 0x88b   : > { %5512 = vmatmul.mubr.bf16.vlgmr.msra.gmra.mrb[12].mxu0 %v7943_v33  ;;  %5439 = vmatpush1.bf16.msra.mxu1 %v5045_v10  ;;  %v5156_v10 = vunpack.c.h.s8.bf16 %v4808_v47 }
 0x88c   : > { %5470 = vmatprep.mubr.bf16.mxu1 %v7955_v14  ;;  %5521 = vmatpush1.bf16.msra.mxu0 %v5047_v20  ;;  %v4818_v20 = vld [vmem:[%s8525_s7 + $0x508] sm:$0xff] }
 0x88d   : > { %5552 = vmatprep.mubr.bf16.mxu0 %v7955_v14  ;;  %5440 = vmatprep.subr.bf16.mxu1 %v5058_v11  ;;  %v4820_v11 = vld [vmem:[%s8525_s7 + $0x518] sm:$0xff]  ;;  %v5166_v62 = vunpack.c.l.s8.bf16 %v4818_v20  ;;  %v5178_v13 = vunpack.c.h.s8.bf16 %v4818_v20 }
 0x88e   : > { %5522 = vmatprep.subr.bf16.mxu0 %v5060_v59  ;;  %v5155_v59 = vunpack.c.h.s8.bf16 %v4807_v2 }
 0x88f   : > { %5441 = vmatpush1.bf16.msra.mxu1 %v5057_v5  ;;  %v4817_v5 = vld [vmem:[%s8525_s7 + $0x500] sm:$0xff] }
 0x890   : > { %5523 = vmatpush1.bf16.msra.mxu0 %v5059_v52  ;;  %5442 = vmatprep.subr.bf16.mxu1 %v5070_v63  ;;  %v5168_v52 = vunpack.c.l.s8.bf16 %v4820_v11  ;;  %v4819_v63 = vld [vmem:[%s8525_s7 + $0x510] sm:$0xff]  ;;  %v5165_v55 = vunpack.c.l.s8.bf16 %v4817_v5 }
 0x891   : > { %5524 = vmatprep.subr.bf16.mxu0 %v5072_v6  ;;  %v5167_v6 = vunpack.c.l.s8.bf16 %v4819_v63  ;;  %v5179_v16 = vunpack.c.h.s8.bf16 %v4819_v63 }
 0x893   : > { %5443 = vmatpush1.bf16.msra.mxu1 %v5069_v9  ;;  %v5180_v9 = vunpack.c.h.s8.bf16 %v4820_v11 }
 0x894   : > { %5525 = vmatpush1.bf16.msra.mxu0 %v5071_v24  ;;  %5444 = vmatprep.subr.bf16.mxu1 %v5082_v25  ;;  %v4830_v24 = vld [vmem:[%s8525_s7 + $0x568] sm:$0xff]  ;;  %v4832_v25 = vld [vmem:[%s8525_s7 + $0x578] sm:$0xff] }
 0x895   : > { %5526 = vmatprep.subr.bf16.mxu0 %v5084_v26  ;;  %v5177_v26 = vunpack.c.h.s8.bf16 %v4817_v5  ;;  %v5190_v34 = vunpack.c.l.s8.bf16 %v4830_v24  ;;  %v5202_v19 = vunpack.c.h.s8.bf16 %v4830_v24 }
 0x897   : > { %5445 = vmatpush1.bf16.msra.mxu1 %v5081_v50  ;;  %v4829_v50 = vld [vmem:[%s8525_s7 + $0x560] sm:$0xff] }
 0x898   : > { %5527 = vmatpush1.bf16.msra.mxu0 %v5083_v51  ;;  %5446 = vmatprep.subr.bf16.mxu1 %v5094_v37  ;;  %v5192_v51 = vunpack.c.l.s8.bf16 %v4832_v25  ;;  %v4831_v37 = vld [vmem:[%s8525_s7 + $0x570] sm:$0xff]  ;;  %v5189_v18 = vunpack.c.l.s8.bf16 %v4829_v50 }
 0x899   : > { %5528 = vmatprep.subr.bf16.mxu0 %v5096_v29  ;;  %v5191_v29 = vunpack.c.l.s8.bf16 %v4831_v37  ;;  %v5203_v22 = vunpack.c.h.s8.bf16 %v4831_v37 }
 0x89b   : > { %5447 = vmatpush1.bf16.msra.mxu1 %v5093_v30  ;;  %v5204_v30 = vunpack.c.h.s8.bf16 %v4832_v25  ;;  %v4689_v25 = vld [vmem:[%s8525_s7 + $0x100] sm:$0xff] }
 0x89c   : > { %5529 = vmatpush1.bf16.msra.mxu0 %v5095_v53  ;;  %5448 = vmatprep.subr.bf16.mxu1 %v5106_v43  ;;  %v4842_v53 = vld [vmem:[%s8525_s7 + $0x5c8] sm:$0xff]  ;;  %v4844_v43 = vld [vmem:[%s8525_s7 + $0x5d8] sm:$0xff] }
 0x89d   : > { %5530 = vmatprep.subr.bf16.mxu0 %v5108_v21  ;;  %v5201_v21 = vunpack.c.h.s8.bf16 %v4829_v50  ;;  %v5214_v31 = vunpack.c.l.s8.bf16 %v4842_v53  ;;  %v5226_v40 = vunpack.c.h.s8.bf16 %v4842_v53 }
 0x89f   : > { %5449 = vmatpush1.bf16.msra.mxu1 %v5105_v32  ;;  %v4841_v32 = vld [vmem:[%s8525_s7 + $0x5c0] sm:$0xff] }
 0x8a0   : > { %5531 = vmatpush1.bf16.msra.mxu0 %v5107_v35  ;;  %5450 = vmatprep.subr.bf16.mxu1 %v5118_v36  ;;  %v5216_v35 = vunpack.c.l.s8.bf16 %v4844_v43  ;;  %v4843_v36 = vld [vmem:[%s8525_s7 + $0x5d0] sm:$0xff]  ;;  %v5213_v38 = vunpack.c.l.s8.bf16 %v4841_v32 }
 0x8a1   : > { %5532 = vmatprep.subr.bf16.mxu0 %v5120_v39  ;;  %v5215_v39 = vunpack.c.l.s8.bf16 %v4843_v36  ;;  %v5227_v46 = vunpack.c.h.s8.bf16 %v4843_v36 }
 0x8a3   : > { %5451 = vmatpush1.bf16.msra.mxu1 %v5117_v41  ;;  %v5228_v41 = vunpack.c.h.s8.bf16 %v4844_v43  ;;  %v4701_v43 = vld [vmem:[%s8525_s7 + $0x160] sm:$0xff] }
 0x8a4   : > { %5533 = vmatpush1.bf16.msra.mxu0 %v5119_v42  ;;  %5452 = vmatprep.subr.bf16.mxu1 %v5130_v44  ;;  %v4666_v42 = vld [vmem:[%s8525_s7 + $0x48] sm:$0xff]  ;;  %v4668_v44 = vld [vmem:[%s8525_s7 + $0x58] sm:$0xff] }
 0x8a5   : > { %5534 = vmatprep.subr.bf16.mxu0 %v5132_v45  ;;  %v5225_v45 = vunpack.c.h.s8.bf16 %v4841_v32  ;;  %v4858_v47 = vunpack.c.l.s8.bf16 %v4666_v42  ;;  %v4870_v2 = vunpack.c.h.s8.bf16 %v4666_v42 }
 0x8a7   : > { %5453 = vmatpush1.bf16.msra.mxu1 %v5129_v17  ;;  %v4665_v17 = vld [vmem:[%s8525_s7 + $0x40] sm:$0xff] }
 0x8a8   : > { %5535 = vmatpush1.bf16.msra.mxu0 %v5131_v58  ;;  %5454 = vmatprep.subr.bf16.mxu1 %v5142_v7  ;;  %v4860_v58 = vunpack.c.l.s8.bf16 %v4668_v44  ;;  %v4667_v7 = vld [vmem:[%s8525_s7 + $0x50] sm:$0xff]  ;;  %v4857_v49 = vunpack.c.l.s8.bf16 %v4665_v17 }
 0x8a9   : > { %5536 = vmatprep.subr.bf16.mxu0 %v5144_v0  ;;  %v4859_v0 = vunpack.c.l.s8.bf16 %v4667_v7  ;;  %v4871_v20 = vunpack.c.h.s8.bf16 %v4667_v7 }
 0x8ab   : > { %5455 = vmatpush1.bf16.msra.mxu1 %v5141_v3  ;;  %v4678_v3 = vld [vmem:[%s8525_s7 + $0xa8] sm:$0xff] }
 0x8ac   : > { %5537 = vmatpush1.bf16.msra.mxu0 %v5143_v8  ;;  %5456 = vmatprep.subr.bf16.mxu1 %v5154_v1  ;;  %v4872_v8 = vunpack.c.h.s8.bf16 %v4668_v44  ;;  %v4680_v1 = vld [vmem:[%s8525_s7 + $0xb8] sm:$0xff]  ;;  %v4882_v11 = vunpack.c.l.s8.bf16 %v4678_v3  ;;  %v4894_v63 = vunpack.c.h.s8.bf16 %v4678_v3  ;;  %v4713_v44 = vld [vmem:[%s8525_s7 + $0x1c0] sm:$0xff] }
 0x8ad   : > { %5538 = vmatprep.subr.bf16.mxu0 %v5156_v10  ;;  %v4869_v10 = vunpack.c.h.s8.bf16 %v4665_v17 }
 0x8af   : > { %5457 = vmatpush1.bf16.msra.mxu1 %v5153_v4  ;;  %v4677_v4 = vld [vmem:[%s8525_s7 + $0xa0] sm:$0xff] }
 0x8b0   : > { %5539 = vmatpush1.bf16.msra.mxu0 %v5155_v59  ;;  %5458 = vmatprep.subr.bf16.mxu1 %v5166_v62  ;;  %v4884_v59 = vunpack.c.l.s8.bf16 %v4680_v1  ;;  %v4679_v62 = vld [vmem:[%s8525_s7 + $0xb0] sm:$0xff]  ;;  %v4881_v5 = vunpack.c.l.s8.bf16 %v4677_v4 }
 0x8b1   : > { %5540 = vmatprep.subr.bf16.mxu0 %v5168_v52  ;;  %v4883_v52 = vunpack.c.l.s8.bf16 %v4679_v62 }
 0x8b3   : > { %5459 = vmatpush1.bf16.msra.mxu1 %v5165_v55  ;;  %v4896_v55 = vunpack.c.h.s8.bf16 %v4680_v1  ;;  %v4725_v1 = vld [vmem:[%s8525_s7 + $0x220] sm:$0xff] }
 0x8b4   : > { %5541 = vmatpush1.bf16.msra.mxu0 %v5167_v6  ;;  %5460 = vmatprep.subr.bf16.mxu1 %v5178_v13  ;;  %v4690_v6 = vld [vmem:[%s8525_s7 + $0x108] sm:$0xff]  ;;  %v4893_v13 = vunpack.c.h.s8.bf16 %v4677_v4 }
 0x8b5   : > { %5542 = vmatprep.subr.bf16.mxu0 %v5180_v9  ;;  %v4895_v9 = vunpack.c.h.s8.bf16 %v4679_v62  ;;  %v4906_v24 = vunpack.c.l.s8.bf16 %v4690_v6 }
 0x8b7   : > { %5461 = vmatpush1.bf16.msra.mxu1 %v5177_v26 }
 0x8b8   : > { %5543 = vmatpush1.bf16.msra.mxu0 %v5179_v16  ;;  %5462 = vmatprep.subr.bf16.mxu1 %v5190_v34  ;;  %v4691_v16 = vld [vmem:[%s8525_s7 + $0x110] sm:$0xff]  ;;  %v4905_v34 = vunpack.c.l.s8.bf16 %v4689_v25 }
 0x8b9   : > { %5544 = vmatprep.subr.bf16.mxu0 %v5192_v51  ;;  %v4907_v50 = vunpack.c.l.s8.bf16 %v4691_v16  ;;  %v4918_v51 = vunpack.c.h.s8.bf16 %v4690_v6 }
 0x8bb   : > { %5463 = vmatpush1.bf16.msra.mxu1 %v5189_v18  ;;  %v4702_v18 = vld [vmem:[%s8525_s7 + $0x168] sm:$0xff] }
 0x8bc   : > { %5545 = vmatpush1.bf16.msra.mxu0 %v5191_v29  ;;  %5464 = vmatprep.subr.bf16.mxu1 %v5202_v19  ;;  %v4704_v29 = vld [vmem:[%s8525_s7 + $0x178] sm:$0xff]  ;;  %v4917_v19 = vunpack.c.h.s8.bf16 %v4689_v25  ;;  %v4930_v53 = vunpack.c.l.s8.bf16 %v4702_v18 }
 0x8bd   : > { %5546 = vmatprep.subr.bf16.mxu0 %v5204_v30  ;;  %v4919_v30 = vunpack.c.h.s8.bf16 %v4691_v16  ;;  %v4944_v36 = vunpack.c.h.s8.bf16 %v4704_v29 }
 0x8bf   : > { %5465 = vmatpush1.bf16.msra.mxu1 %v5201_v21  ;;  %v4932_v21 = vunpack.c.l.s8.bf16 %v4704_v29  ;;  %v4749_v29 = vld [vmem:[%s8525_s7 + $0x2e0] sm:$0xff] }
 0x8c0   : > { %5547 = vmatpush1.bf16.msra.mxu0 %v5203_v22  ;;  %5466 = vmatprep.subr.bf16.mxu1 %v5214_v31  ;;  %v4703_v22 = vld [vmem:[%s8525_s7 + $0x170] sm:$0xff]  ;;  %v4929_v31 = vunpack.c.l.s8.bf16 %v4701_v43 }
 0x8c1   : > { %5548 = vmatprep.subr.bf16.mxu0 %v5216_v35  ;;  %v4931_v32 = vunpack.c.l.s8.bf16 %v4703_v22  ;;  %v4942_v35 = vunpack.c.h.s8.bf16 %v4702_v18 }
 0x8c3   : > { %5467 = vmatpush1.bf16.msra.mxu1 %v5213_v38  ;;  %v4714_v38 = vld [vmem:[%s8525_s7 + $0x1c8] sm:$0xff] }
 0x8c4   : > { %5549 = vmatpush1.bf16.msra.mxu0 %v5215_v39  ;;  %5468 = vmatprep.subr.bf16.mxu1 %v5226_v40  ;;  %v4716_v39 = vld [vmem:[%s8525_s7 + $0x1d8] sm:$0xff]  ;;  %v4941_v40 = vunpack.c.h.s8.bf16 %v4701_v43  ;;  %v4954_v42 = vunpack.c.l.s8.bf16 %v4714_v38 }
 0x8c5   : > { %5550 = vmatprep.subr.bf16.mxu0 %v5228_v41  ;;  %v4943_v41 = vunpack.c.h.s8.bf16 %v4703_v22  ;;  %v4968_v7 = vunpack.c.h.s8.bf16 %v4716_v39 }
 0x8c7   : > { %5469 = vmatpush1.bf16.msra.mxu1 %v5225_v45  ;;  %v4956_v45 = vunpack.c.l.s8.bf16 %v4716_v39  ;;  %v4761_v39 = vld [vmem:[%s8525_s7 + $0x340] sm:$0xff] }
 0x8c8   : > { %5551 = vmatpush1.bf16.msra.mxu0 %v5227_v46  ;;  %5561 = vmatprep.subr.bf16.mxu1 %v4858_v47  ;;  %v4715_v46 = vld [vmem:[%s8525_s7 + $0x1d0] sm:$0xff]  ;;  %v4953_v47 = vunpack.c.l.s8.bf16 %v4713_v44 }
 0x8c9   : > { %5643 = vmatprep.subr.bf16.mxu0 %v4860_v58  ;;  %v4955_v17 = vunpack.c.l.s8.bf16 %v4715_v46  ;;  %v4966_v58 = vunpack.c.h.s8.bf16 %v4714_v38  ;;  %v4967_v3 = vunpack.c.h.s8.bf16 %v4715_v46  ;;  %v4774_v46 = vld [vmem:[%s8525_s7 + $0x3a8] sm:$0xff] }
 0x8ca   : > { %5471 = vmatmul.mubr.bf16.vlgmr.msra.gmra.mrb[8].mxu1 %v8052_v54 }
 0x8cb   : > { %5553 = vmatmul.mubr.bf16.vlgmr.msra.gmra.mrb[12].mxu0 %v8052_v54  ;;  %5562 = vmatpush1.bf16.msra.mxu1 %v4857_v49  ;;  %v4726_v49 = vld [vmem:[%s8525_s7 + $0x228] sm:$0xff] }
 0x8cc   : > { %5593 = vmatprep.mubr.bf16.mxu1 %v7941_v12  ;;  %5644 = vmatpush1.bf16.msra.mxu0 %v4859_v0  ;;  %v4728_v0 = vld [vmem:[%s8525_s7 + $0x238] sm:$0xff] }
 0x8cd   : > { %5675 = vmatprep.mubr.bf16.mxu0 %v7941_v12  ;;  %5563 = vmatprep.subr.bf16.mxu1 %v4870_v2  ;;  %v4692_v12 = vld [vmem:[%s8525_s7 + $0x118] sm:$0xff]  ;;  %v4965_v2 = vunpack.c.h.s8.bf16 %v4713_v44  ;;  %v4992_v62 = vunpack.c.h.s8.bf16 %v4728_v0 }
 0x8ce   : > { %5645 = vmatprep.subr.bf16.mxu0 %v4872_v8  ;;  %v4908_v26 = vunpack.c.l.s8.bf16 %v4692_v12  ;;  %v4920_v37 = vunpack.c.h.s8.bf16 %v4692_v12  ;;  %v4978_v8 = vunpack.c.l.s8.bf16 %v4726_v49  ;;  %v4737_v12 = vld [vmem:[%s8525_s7 + $0x280] sm:$0xff] }
 0x8cf   : > { %5564 = vmatpush1.bf16.msra.mxu1 %v4869_v10  ;;  %v4980_v10 = vunpack.c.l.s8.bf16 %v4728_v0  ;;  %v4773_v0 = vld [vmem:[%s8525_s7 + $0x3a0] sm:$0xff] }
 0x8d0   : > { %5646 = vmatpush1.bf16.msra.mxu0 %v4871_v20  ;;  %5565 = vmatprep.subr.bf16.mxu1 %v4882_v11  ;;  %v4727_v20 = vld [vmem:[%s8525_s7 + $0x230] sm:$0xff]  ;;  %v4977_v11 = vunpack.c.l.s8.bf16 %v4725_v1 }
 0x8d1   : > { %5647 = vmatprep.subr.bf16.mxu0 %v4884_v59  ;;  %v4979_v4 = vunpack.c.l.s8.bf16 %v4727_v20  ;;  %v4990_v59 = vunpack.c.h.s8.bf16 %v4726_v49  ;;  %v5074_v49 = vunpack.c.l.s8.bf16 %v4774_v46 }
 0x8d3   : > { %5566 = vmatpush1.bf16.msra.mxu1 %v4881_v5  ;;  %v4738_v5 = vld [vmem:[%s8525_s7 + $0x288] sm:$0xff] }
 0x8d4   : > { %5648 = vmatpush1.bf16.msra.mxu0 %v4883_v52  ;;  %5567 = vmatprep.subr.bf16.mxu1 %v4894_v63  ;;  %v4740_v52 = vld [vmem:[%s8525_s7 + $0x298] sm:$0xff]  ;;  %v4989_v63 = vunpack.c.h.s8.bf16 %v4725_v1  ;;  %v5002_v6 = vunpack.c.l.s8.bf16 %v4738_v5  ;;  %v5086_v1 = vunpack.c.h.s8.bf16 %v4774_v46 }
 0x8d5   : > { %5649 = vmatprep.subr.bf16.mxu0 %v4896_v55  ;;  %v4991_v55 = vunpack.c.h.s8.bf16 %v4727_v20  ;;  %v5016_v16 = vunpack.c.h.s8.bf16 %v4740_v52  ;;  %v4786_v20 = vld [vmem:[%s8525_s7 + $0x408] sm:$0xff] }
 0x8d7   : > { %5568 = vmatpush1.bf16.msra.mxu1 %v4893_v13  ;;  %v5004_v13 = vunpack.c.l.s8.bf16 %v4740_v52  ;;  %v4787_v52 = vld [vmem:[%s8525_s7 + $0x410] sm:$0xff] }
 0x8d8   : > { %5650 = vmatpush1.bf16.msra.mxu0 %v4895_v9  ;;  %5569 = vmatprep.subr.bf16.mxu1 %v4906_v24  ;;  %v4739_v9 = vld [vmem:[%s8525_s7 + $0x290] sm:$0xff]  ;;  %v5001_v24 = vunpack.c.l.s8.bf16 %v4737_v12 }
 0x8d9   : > { %5651 = vmatprep.subr.bf16.mxu0 %v4908_v26  ;;  %v5003_v25 = vunpack.c.l.s8.bf16 %v4739_v9  ;;  %v5014_v26 = vunpack.c.h.s8.bf16 %v4738_v5 }
 0x8db   : > { %5570 = vmatpush1.bf16.msra.mxu1 %v4905_v34  ;;  %v4750_v34 = vld [vmem:[%s8525_s7 + $0x2e8] sm:$0xff] }
 0x8dc   : > { %5652 = vmatpush1.bf16.msra.mxu0 %v4907_v50  ;;  %5571 = vmatprep.subr.bf16.mxu1 %v4918_v51  ;;  %v4752_v50 = vld [vmem:[%s8525_s7 + $0x2f8] sm:$0xff]  ;;  %v5013_v51 = vunpack.c.h.s8.bf16 %v4737_v12  ;;  %v5026_v18 = vunpack.c.l.s8.bf16 %v4750_v34  ;;  %v5110_v12 = vunpack.c.h.s8.bf16 %v4786_v20 }
 0x8dd   : > { %5653 = vmatprep.subr.bf16.mxu0 %v4920_v37  ;;  %v5015_v37 = vunpack.c.h.s8.bf16 %v4739_v9  ;;  %v5040_v22 = vunpack.c.h.s8.bf16 %v4752_v50 }
 0x8df   : > { %5572 = vmatpush1.bf16.msra.mxu1 %v4917_v19  ;;  %v5028_v19 = vunpack.c.l.s8.bf16 %v4752_v50 }
 0x8e0   : > { %5654 = vmatpush1.bf16.msra.mxu0 %v4919_v30  ;;  %5573 = vmatprep.subr.bf16.mxu1 %v4930_v53  ;;  %v4751_v30 = vld [vmem:[%s8525_s7 + $0x2f0] sm:$0xff]  ;;  %v5025_v53 = vunpack.c.l.s8.bf16 %v4749_v29 }
 0x8e1   : > { %5655 = vmatprep.subr.bf16.mxu0 %v4932_v21  ;;  %v5027_v43 = vunpack.c.l.s8.bf16 %v4751_v30  ;;  %v5038_v21 = vunpack.c.h.s8.bf16 %v4750_v34 }
 0x8e3   : > { %5574 = vmatpush1.bf16.msra.mxu1 %v4929_v31  ;;  %v4762_v31 = vld [vmem:[%s8525_s7 + $0x348] sm:$0xff] }
 0x8e4   : > { %5656 = vmatpush1.bf16.msra.mxu0 %v4931_v32  ;;  %5575 = vmatprep.subr.bf16.mxu1 %v4942_v35  ;;  %v4764_v32 = vld [vmem:[%s8525_s7 + $0x358] sm:$0xff]  ;;  %v5037_v35 = vunpack.c.h.s8.bf16 %v4749_v29  ;;  %v5050_v38 = vunpack.c.l.s8.bf16 %v4762_v31  ;;  %v5111_v29 = vunpack.c.h.s8.bf16 %v4787_v52 }
 0x8e5   : > { %5657 = vmatprep.subr.bf16.mxu0 %v4944_v36  ;;  %v5039_v36 = vunpack.c.h.s8.bf16 %v4751_v30  ;;  %v4797_v30 = vld [vmem:[%s8525_s7 + $0x460] sm:$0xff] }
 0x8e7   : > { %5576 = vmatpush1.bf16.msra.mxu1 %v4941_v40  ;;  %v5052_v40 = vunpack.c.l.s8.bf16 %v4764_v32 }
 0x8e8   : > { %5658 = vmatpush1.bf16.msra.mxu0 %v4943_v41  ;;  %5577 = vmatprep.subr.bf16.mxu1 %v4954_v42  ;;  %v4763_v41 = vld [vmem:[%s8525_s7 + $0x350] sm:$0xff]  ;;  %v5049_v42 = vunpack.c.l.s8.bf16 %v4761_v39 }
 0x8e9   : > { %5659 = vmatprep.subr.bf16.mxu0 %v4956_v45  ;;  %v5051_v44 = vunpack.c.l.s8.bf16 %v4763_v41  ;;  %v5062_v45 = vunpack.c.h.s8.bf16 %v4762_v31 }
 0x8eb   : > { %5578 = vmatpush1.bf16.msra.mxu1 %v4953_v47  ;;  %v5064_v47 = vunpack.c.h.s8.bf16 %v4764_v32  ;;  %v4799_v32 = vld [vmem:[%s8525_s7 + $0x470] sm:$0xff] }
 0x8ec   : > { %5660 = vmatpush1.bf16.msra.mxu0 %v4955_v17  ;;  %5579 = vmatprep.subr.bf16.mxu1 %v4966_v58  ;;  %v4776_v17 = vld [vmem:[%s8525_s7 + $0x3b8] sm:$0xff]  ;;  %v5061_v58 = vunpack.c.h.s8.bf16 %v4761_v39 }
 0x8ed   : > { %5661 = vmatprep.subr.bf16.mxu0 %v4968_v7  ;;  %v5063_v7 = vunpack.c.h.s8.bf16 %v4763_v41 }
 0x8ef   : > { %5580 = vmatpush1.bf16.msra.mxu1 %v4965_v2  ;;  %v5076_v2 = vunpack.c.l.s8.bf16 %v4776_v17 }
 0x8f0   : > { %5662 = vmatpush1.bf16.msra.mxu0 %v4967_v3  ;;  %5581 = vmatprep.subr.bf16.mxu1 %v4978_v8  ;;  %v4775_v3 = vld [vmem:[%s8525_s7 + $0x3b0] sm:$0xff] }
 0x8f1   : > { %5663 = vmatprep.subr.bf16.mxu0 %v4980_v10  ;;  %v5075_v8 = vunpack.c.l.s8.bf16 %v4775_v3  ;;  %v5088_v10 = vunpack.c.h.s8.bf16 %v4776_v17 }
 0x8f3   : > { %5582 = vmatpush1.bf16.msra.mxu1 %v4977_v11  ;;  %v5085_v11 = vunpack.c.h.s8.bf16 %v4773_v0 }
 0x8f4   : > { %5664 = vmatpush1.bf16.msra.mxu0 %v4979_v4  ;;  %5583 = vmatprep.subr.bf16.mxu1 %v4990_v59  ;;  %v5087_v4 = vunpack.c.h.s8.bf16 %v4775_v3  ;;  %v5098_v59 = vunpack.c.l.s8.bf16 %v4786_v20 }
 0x8f5   : > { %5665 = vmatprep.subr.bf16.mxu0 %v4992_v62  ;;  %v4785_v62 = vld [vmem:[%s8525_s7 + $0x400] sm:$0xff] }
 0x8f7   : > { %5584 = vmatpush1.bf16.msra.mxu1 %v4989_v63  ;;  %v5097_v63 = vunpack.c.l.s8.bf16 %v4785_v62 }
 0x8f8   : > { %5666 = vmatpush1.bf16.msra.mxu0 %v4991_v55  ;;  %5585 = vmatprep.subr.bf16.mxu1 %v5002_v6  ;;  %v8385_v55 = vld [vmem:[%s8519_s1 + $0x31] sm:$0xff]  ;;  %v5099_v6 = vunpack.c.l.s8.bf16 %v4787_v52 }
 0x8f9   : > { %5667 = vmatprep.subr.bf16.mxu0 %v5004_v13  ;;  %v8390_v13 = vld [vmem:[%s8519_s1 + $0x25] sm:$0xff]  ;;  %v5736_v34 = vrot.slane %v8385_v55, %v7524_v60  ;;  %v5744_v50 = vrot.slane %v8385_v55, %v7526_v61 }
 0x8fb   : > { %5586 = vmatpush1.bf16.msra.mxu1 %v5001_v24  ;;  %v4798_v24 = vld [vmem:[%s8525_s7 + $0x468] sm:$0xff] }
 0x8fc   : > { %5668 = vmatpush1.bf16.msra.mxu0 %v5003_v25  ;;  %5587 = vmatprep.subr.bf16.mxu1 %v5014_v26  ;;  %v5732_v25 = vrot.slane %v8385_v55, %v7519_v56  ;;  %v5740_v26 = vrot.slane %v8385_v55, %v7521_v57 }
 0x8fd   : > { %5669 = vmatprep.subr.bf16.mxu0 %v5016_v16  ;;  %v4800_v16 = vld [vmem:[%s8525_s7 + $0x478] sm:$0xff] }
 0x8fe   : > { %v5124_v31 = vunpack.c.l.s8.bf16 %v4800_v16  ;;  %v5136_v3 = vunpack.c.h.s8.bf16 %v4800_v16 }
 0x8ff   : > { %5588 = vmatpush1.bf16.msra.mxu1 %v5013_v51  ;;  %v5109_v51 = vunpack.c.h.s8.bf16 %v4785_v62 }
 0x900   : > { %5670 = vmatpush1.bf16.msra.mxu0 %v5015_v37  ;;  %5589 = vmatprep.subr.bf16.mxu1 %v5026_v18  ;;  %v5808_v37 = vrot.slane %v8390_v13, %v7519_v56  ;;  %v5816_v18 = vrot.slane %v8390_v13, %v7521_v57 }
 0x901   : > { %5671 = vmatprep.subr.bf16.mxu0 %v5028_v19  ;;  %v5122_v19 = vunpack.c.l.s8.bf16 %v4798_v24 }
 0x903   : > { %5590 = vmatpush1.bf16.msra.mxu1 %v5025_v53 }
 0x904   : > { %5672 = vmatpush1.bf16.msra.mxu0 %v5027_v43  ;;  %5591 = vmatprep.subr.bf16.mxu1 %v5038_v21  ;;  %v5812_v21 = vrot.slane %v8390_v13, %v7524_v60 }
 0x905   : > { %5673 = vmatprep.subr.bf16.mxu0 %v5040_v22  ;;  %v5820_v22 = vrot.slane %v8390_v13, %v7526_v61 }
 0x907   : > { %5592 = vmatpush1.bf16.msra.mxu1 %v5037_v35 }
 0x908   : > { %5674 = vmatpush1.bf16.msra.mxu0 %v5039_v36  ;;  %5602 = vmatprep.subr.bf16.mxu1 %v5050_v38 }
 0x909   : > { %5684 = vmatprep.subr.bf16.mxu0 %v5052_v40 }
 0x90a   : > { %5594 = vmatmul.mubr.bf16.vlgmr.msra.gmra.mrb[12].mxu1 %v7943_v33 }
 0x90b   : > { %5676 = vmatmul.mubr.bf16.vlgmr.msra.gmra.mrb[16].mxu0 %v7943_v33  ;;  %5603 = vmatpush1.bf16.msra.mxu1 %v5049_v42  ;;  %v5073_v33 = vunpack.c.l.s8.bf16 %v4773_v0 }
 0x90c   : > { %5634 = vmatprep.mubr.bf16.mxu1 %v7955_v14  ;;  %5685 = vmatpush1.bf16.msra.mxu0 %v5051_v44 }
 0x90d   : > { %5716 = vmatprep.mubr.bf16.mxu0 %v7955_v14  ;;  %5604 = vmatprep.subr.bf16.mxu1 %v5062_v45  ;;  %v4788_v14 = vld [vmem:[%s8525_s7 + $0x418] sm:$0xff]  ;;  %v5121_v45 = vunpack.c.l.s8.bf16 %v4797_v30 }
 0x90e   : > { %5686 = vmatprep.subr.bf16.mxu0 %v5064_v47  ;;  %v5100_v5 = vunpack.c.l.s8.bf16 %v4788_v14  ;;  %v5112_v9 = vunpack.c.h.s8.bf16 %v4788_v14  ;;  %v4809_v14 = vld [vmem:[%s8525_s7 + $0x4c0] sm:$0xff] }
 0x90f   : > { %5605 = vmatpush1.bf16.msra.mxu1 %v5061_v58 }
 0x910   : > { %5687 = vmatpush1.bf16.msra.mxu0 %v5063_v7  ;;  %5606 = vmatprep.subr.bf16.mxu1 %v5074_v49  ;;  %v5123_v7 = vunpack.c.l.s8.bf16 %v4799_v32  ;;  %v5134_v49 = vunpack.c.h.s8.bf16 %v4798_v24 }
 0x911   : > { %5688 = vmatprep.subr.bf16.mxu0 %v5076_v2 }
 0x913   : > { %5607 = vmatpush1.bf16.msra.mxu1 %v5073_v33  ;;  %v4810_v33 = vld [vmem:[%s8525_s7 + $0x4c8] sm:$0xff] }
 0x914   : > { %5689 = vmatpush1.bf16.msra.mxu0 %v5075_v8  ;;  %5608 = vmatprep.subr.bf16.mxu1 %v5086_v1  ;;  %v4812_v8 = vld [vmem:[%s8525_s7 + $0x4d8] sm:$0xff]  ;;  %v5133_v1 = vunpack.c.h.s8.bf16 %v4797_v30  ;;  %v5146_v20 = vunpack.c.l.s8.bf16 %v4810_v33 }
 0x915   : > { %5690 = vmatprep.subr.bf16.mxu0 %v5088_v10  ;;  %v5135_v10 = vunpack.c.h.s8.bf16 %v4799_v32  ;;  %v5160_v52 = vunpack.c.h.s8.bf16 %v4812_v8  ;;  %v4836_v32 = vld [vmem:[%s8525_s7 + $0x598] sm:$0xff] }
 0x917   : > { %5609 = vmatpush1.bf16.msra.mxu1 %v5085_v11  ;;  %v5148_v11 = vunpack.c.l.s8.bf16 %v4812_v8 }
 0x918   : > { %5691 = vmatpush1.bf16.msra.mxu0 %v5087_v4  ;;  %5610 = vmatprep.subr.bf16.mxu1 %v5098_v59  ;;  %v4811_v4 = vld [vmem:[%s8525_s7 + $0x4d0] sm:$0xff]  ;;  %v5145_v59 = vunpack.c.l.s8.bf16 %v4809_v14 }
 0x919   : > { %5692 = vmatprep.subr.bf16.mxu0 %v5100_v5  ;;  %v5147_v62 = vunpack.c.l.s8.bf16 %v4811_v4  ;;  %v5158_v5 = vunpack.c.h.s8.bf16 %v4810_v33  ;;  %v5159_v24 = vunpack.c.h.s8.bf16 %v4811_v4  ;;  %v4847_v33 = vld [vmem:[%s8525_s7 + $0x5f0] sm:$0xff]  ;;  %v5748_v4 = vrot.slane %v8385_v55, %v7543_v23 }
 0x91b   : > { %5611 = vmatpush1.bf16.msra.mxu1 %v5097_v63  ;;  %v4822_v63 = vld [vmem:[%s8525_s7 + $0x528] sm:$0xff] }
 0x91c   : > { %5693 = vmatpush1.bf16.msra.mxu0 %v5099_v6  ;;  %5612 = vmatprep.subr.bf16.mxu1 %v5110_v12  ;;  %v4824_v6 = vld [vmem:[%s8525_s7 + $0x538] sm:$0xff]  ;;  %v5157_v12 = vunpack.c.h.s8.bf16 %v4809_v14 }
 0x91d   : > { %v5308_v53 = vpop.f32.mrb[4].mxu1  ;;  %v5390_v43 = vpop.f32.mrb[8].mxu0  ;;  %5694 = vmatprep.subr.bf16.mxu0 %v5112_v9 }
 0x91e   : > { %v5789_v35 = vmul.f32 %v5732_v25, %v5308_v53  ;;  %v5791_v36 = vmul.f32 %v5740_v26, %v5390_v43  ;;  %v5310_v38 = vpop.f32.mrb[5].mxu1  ;;  %v5392_v39 = vpop.f32.mrb[9].mxu0  ;;  %v5170_v25 = vunpack.c.l.s8.bf16 %v4822_v63  ;;  %v4821_v26 = vld [vmem:[%s8525_s7 + $0x520] sm:$0xff]  ;;  %v5182_v53 = vunpack.c.h.s8.bf16 %v4822_v63 }
 0x91f   : > { %v5790_v40 = vmul.f32 %v5736_v34, %v5310_v38  ;;  %v5792_v41 = vmul.f32 %v5744_v50, %v5392_v39  ;;  %v5312_v42 = vpop.f32.mrb[6].mxu1  ;;  %v5394_v44 = vpop.f32.mrb[10].mxu0  ;;  %5613 = vmatpush1.bf16.msra.mxu1 %v5109_v51  ;;  %v5172_v34 = vunpack.c.l.s8.bf16 %v4824_v6  ;;  %v4823_v50 = vld [vmem:[%s8525_s7 + $0x530] sm:$0xff] }
 0x920   : > { %v5865_v46 = vadd.f32 %v5808_v37, %v5789_v35  ;;  %v5867_v47 = vadd.f32 %v5816_v18, %v5791_v36  ;;  %5695 = vmatpush1.bf16.msra.mxu0 %v5111_v29  ;;  %v5313_v17 = vpop.f32.mrb[7].mxu1  ;;  %v5395_v58 = vpop.f32.mrb[11].mxu0  ;;  %5614 = vmatprep.subr.bf16.mxu1 %v5122_v19  ;;  %v5169_v29 = vunpack.c.l.s8.bf16 %v4821_v26  ;;  %v5171_v30 = vunpack.c.l.s8.bf16 %v4823_v50  ;;  %v4835_v42 = vld [vmem:[%s8525_s7 + $0x590] sm:$0xff] }
 0x921   : > { %v5866_v0 = vadd.f32 %v5812_v21, %v5790_v40  ;;  %v5868_v2 = vadd.f32 %v5820_v22, %v5792_v41  ;;  %5696 = vmatprep.subr.bf16.mxu0 %v5124_v31  ;;  %v5184_v21 = vunpack.c.h.s8.bf16 %v4824_v6  ;;  %v4834_v22 = vld [vmem:[%s8525_s7 + $0x588] sm:$0xff]  ;;  %v5181_v35 = vunpack.c.h.s8.bf16 %v4821_v26  ;;  %v4833_v40 = vld [vmem:[%s8525_s7 + $0x580] sm:$0xff]  ;;  %v4848_v58 = vld [vmem:[%s8525_s7 + $0x5f8] sm:$0xff] }
 0x922   : > { %6433 = vtanh.f32 %v5865_v46  ;;  %v5183_v38 = vunpack.c.h.s8.bf16 %v4823_v50  ;;  %v5194_v39 = vunpack.c.l.s8.bf16 %v4834_v22  ;;  %v5196_v41 = vunpack.c.l.s8.bf16 %v4836_v32  ;;  %v4846_v17 = vld [vmem:[%s8525_s7 + $0x5e8] sm:$0xff] }
 0x923   : > { %6435 = vtanh.f32 %v5867_v47  ;;  %5615 = vmatpush1.bf16.msra.mxu1 %v5121_v45  ;;  %v5193_v44 = vunpack.c.l.s8.bf16 %v4833_v40  ;;  %v5195_v45 = vunpack.c.l.s8.bf16 %v4835_v42  ;;  %v5206_v46 = vunpack.c.h.s8.bf16 %v4834_v22 }
 0x924   : > { %6437 = vtanh.f32 %v5866_v0  ;;  %5697 = vmatpush1.bf16.msra.mxu0 %v5123_v7  ;;  %5616 = vmatprep.subr.bf16.mxu1 %v5134_v49  ;;  %v5208_v47 = vunpack.c.h.s8.bf16 %v4836_v32  ;;  %v5205_v7 = vunpack.c.h.s8.bf16 %v4833_v40  ;;  %v5207_v49 = vunpack.c.h.s8.bf16 %v4835_v42  ;;  %v5726_v32 = vld [vmem:[%s8519_s1 + $0x39] sm:$0xf] }
 0x925   : > { %6439 = vtanh.f32 %v5868_v2  ;;  %5698 = vmatprep.subr.bf16.mxu0 %v5136_v3  ;;  %v5218_v0 = vunpack.c.l.s8.bf16 %v4846_v17  ;;  %v4845_v2 = vld [vmem:[%s8525_s7 + $0x5e0] sm:$0xff]  ;;  %v5220_v3 = vunpack.c.l.s8.bf16 %v4848_v58  ;;  %v5832_v6 = vrot.slane %v8390_v13, %v7545_v48 }
 0x926   : > { %v5217_v8 = vunpack.c.l.s8.bf16 %v4845_v2  ;;  %v5229_v14 = vunpack.c.h.s8.bf16 %v4845_v2 }
 0x927   : > { %5617 = vmatpush1.bf16.msra.mxu1 %v5133_v1  ;;  %v5219_v1 = vunpack.c.l.s8.bf16 %v4847_v33 }
 0x928   : > { %5699 = vmatpush1.bf16.msra.mxu0 %v5135_v10  ;;  %5618 = vmatprep.subr.bf16.mxu1 %v5146_v20  ;;  %v5230_v10 = vunpack.c.h.s8.bf16 %v4846_v17  ;;  %v5232_v20 = vunpack.c.h.s8.bf16 %v4848_v58 }
 0x929   : > { %5700 = vmatprep.subr.bf16.mxu0 %v5148_v11  ;;  %v5231_v11 = vunpack.c.h.s8.bf16 %v4847_v33 }
 0x92b   : > { %5619 = vmatpush1.bf16.msra.mxu1 %v5145_v59  ;;  %v5756_v59 = vrot.slane %v8385_v55, %v7545_v48 }
 0x92c   : > { %v6434_v9 = vpop.eup %6433  ;;  %5701 = vmatpush1.bf16.msra.mxu0 %v5147_v62  ;;  %5620 = vmatprep.subr.bf16.mxu1 %v5158_v5  ;;  %v5752_v62 = vrot.slane %v8385_v55, %v7547_v15  ;;  %v5824_v5 = vrot.slane %v8390_v13, %v7543_v23 }
 0x92d   : > { %v6436_v16 = vpop.eup %6435  ;;  %5702 = vmatprep.subr.bf16.mxu0 %v5160_v52  ;;  %v5760_v52 = vrot.slane %v8385_v55, %v7549_v27 }
 0x92e   : > { %v6438_v51 = vpop.eup %6437 }
 0x92f   : > { %v6440_v37 = vpop.eup %6439  ;;  %v5901_v18 = vcombine.low %v6434_v9, %v6438_v51  ;;  %5621 = vmatpush1.bf16.msra.mxu1 %v5157_v12 }
 0x930   : > { %v5902_v19 = vcombine.low %v6436_v16, %v6440_v37  ;;  %5703 = vmatpush1.bf16.msra.mxu0 %v5159_v24  ;;  %5622 = vmatprep.subr.bf16.mxu1 %v5170_v25  ;;  %v5836_v25 = vrot.slane %v8390_v13, %v7549_v27 }
 0x931   : > { %v5909_v43 = vrot.slane %v5901_v18, %v7551_v28  ;;  %5704 = vmatprep.subr.bf16.mxu0 %v5172_v34 }
 0x932   : > { %v5916_v31 = vrot.slane %v5902_v19, %v7551_v28 }
 0x933   : > { %5623 = vmatpush1.bf16.msra.mxu1 %v5169_v29 }
 0x934   : > { %v5917_v36 = vcombine.low %v5909_v43, %v5916_v31  ;;  %5705 = vmatpush1.bf16.msra.mxu0 %v5171_v30  ;;  %5624 = vmatprep.subr.bf16.mxu1 %v5182_v53 }
 0x935   : > { %5706 = vmatprep.subr.bf16.mxu0 %v5184_v21 }
 0x936   : > { %5955 = vst [vmem:[%s8529_s11] sm:$0xff] %v5917_v36  ;;  %v5764_v36 = vrot.slane %v5726_v32, %v7519_v56 }
 0x937   : > { %5625 = vmatpush1.bf16.msra.mxu1 %v5181_v35  ;;  %v5802_v35 = vld [vmem:[%s8519_s1 + $0x2d] sm:$0xf] }
 0x938   : > { %5707 = vmatpush1.bf16.msra.mxu0 %v5183_v38  ;;  %5626 = vmatprep.subr.bf16.mxu1 %v5194_v39  ;;  %v5772_v38 = vrot.slane %v5726_v32, %v7521_v57  ;;  %v5768_v39 = vrot.slane %v5726_v32, %v7524_v60  ;;  %v5840_v40 = vrot.slane %v5802_v35, %v7519_v56 }
 0x939   : > { %5708 = vmatprep.subr.bf16.mxu0 %v5196_v41  ;;  %v5776_v41 = vrot.slane %v5726_v32, %v7526_v61  ;;  %v5852_v58 = vrot.slane %v5802_v35, %v7526_v61 }
 0x93b   : > { %5627 = vmatpush1.bf16.msra.mxu1 %v5193_v44  ;;  %v5848_v44 = vrot.slane %v5802_v35, %v7521_v57 }
 0x93c   : > { %5709 = vmatpush1.bf16.msra.mxu0 %v5195_v45  ;;  %5628 = vmatprep.subr.bf16.mxu1 %v5206_v46  ;;  %v5844_v45 = vrot.slane %v5802_v35, %v7524_v60 }
 0x93d   : > { %5710 = vmatprep.subr.bf16.mxu0 %v5208_v47 }
 0x93f   : > { %5629 = vmatpush1.bf16.msra.mxu1 %v5205_v7 }
 0x940   : > { %5711 = vmatpush1.bf16.msra.mxu0 %v5207_v49  ;;  %5630 = vmatprep.subr.bf16.mxu1 %v5218_v0 }
 0x941   : > { %5712 = vmatprep.subr.bf16.mxu0 %v5220_v3 }
 0x943   : > { %5631 = vmatpush1.bf16.msra.mxu1 %v5217_v8 }
 0x944   : > { %5713 = vmatpush1.bf16.msra.mxu0 %v5219_v1  ;;  %5632 = vmatprep.subr.bf16.mxu1 %v5230_v10 }
 0x945   : > { %5714 = vmatprep.subr.bf16.mxu0 %v5232_v20 }
 0x947   : > { %5633 = vmatpush1.bf16.msra.mxu1 %v5229_v14 }
 0x948   : > { %5715 = vmatpush1.bf16.msra.mxu0 %v5231_v11 }
 0x94a   : > { %5635 = vmatmul.mubr.bf16.vlgmr.msra.gmra.mrb[12].mxu1 %v8052_v54 }
 0x94b   : > { %5717 = vmatmul.mubr.bf16.vlgmr.msra.gmra.mrb[16].mxu0 %v8052_v54  ;;  %v5828_v54 = vrot.slane %v8390_v13, %v7547_v15 }
 0x99d   : > { %v5472_v63 = vpop.f32.mrb[8].mxu1 }
 0x99e   : > { %v5793_v12 = vmul.f32 %v5748_v4, %v5472_v63  ;;  %v5554_v9 = vpop.f32.mrb[12].mxu0  ;;  %v5474_v24 = vpop.f32.mrb[9].mxu1 }
 0x99f   : > { %v5795_v26 = vmul.f32 %v5756_v59, %v5554_v9  ;;  %v5794_v16 = vmul.f32 %v5752_v62, %v5474_v24  ;;  %v5556_v34 = vpop.f32.mrb[13].mxu0  ;;  %v5476_v23 = vpop.f32.mrb[10].mxu1 }
 0x9a0   : > { %v5869_v50 = vadd.f32 %v5824_v5, %v5793_v12  ;;  %v5796_v51 = vmul.f32 %v5760_v52, %v5556_v34  ;;  %v5558_v55 = vpop.f32.mrb[14].mxu0  ;;  %v5477_v37 = vpop.f32.mrb[11].mxu1 }
 0x9a1   : > { %v5871_v18 = vadd.f32 %v5832_v6, %v5795_v26  ;;  %v5870_v29 = vadd.f32 %v5828_v54, %v5794_v16  ;;  %v5559_v48 = vpop.f32.mrb[15].mxu0 }
 0x9a2   : > { %6441 = vtanh.f32 %v5869_v50  ;;  %v5872_v19 = vadd.f32 %v5836_v25, %v5796_v51 }
 0x9a3   : > { %6443 = vtanh.f32 %v5871_v18 }
 0x9a4   : > { %6445 = vtanh.f32 %v5870_v29 }
 0x9a5   : > { %6447 = vtanh.f32 %v5872_v19 }
 0x9ac   : > { %v6442_v15 = vpop.eup %6441 }
 0x9ad   : > { %v6444_v30 = vpop.eup %6443 }
 0x9ae   : > { %v6446_v53 = vpop.eup %6445 }
 0x9af   : > { %v6448_v27 = vpop.eup %6447  ;;  %v5918_v13 = vcombine.low %v6442_v15, %v6446_v53 }
 0x9b0   : > { %v5919_v43 = vcombine.low %v6444_v30, %v6448_v27 }
 0x9b1   : > { %v5926_v21 = vrot.slane %v5918_v13, %v7551_v28 }
 0x9b2   : > { %v5933_v22 = vrot.slane %v5919_v43, %v7551_v28 }
 0x9b4   : > { %v5934_v31 = vcombine.low %v5926_v21, %v5933_v22 }
 0x9b6   : > { %5956 = vst [vmem:[%s8529_s11 + $0x8] sm:$0xff] %v5934_v31 }
 0xa1d   : > { %v5636_v42 = vpop.f32.mrb[12].mxu1 }
 0xa1e   : > { %v5797_v46 = vmul.f32 %v5764_v36, %v5636_v42  ;;  %v5718_v47 = vpop.f32.mrb[16].mxu0  ;;  %v5638_v17 = vpop.f32.mrb[13].mxu1 }
 0xa1f   : > { %v5799_v7 = vmul.f32 %v5772_v38, %v5718_v47  ;;  %v5798_v49 = vmul.f32 %v5768_v39, %v5638_v17  ;;  %v5720_v0 = vpop.f32.mrb[17].mxu0  ;;  %v5640_v2 = vpop.f32.mrb[14].mxu1 }
 0xa20   : > { %v5873_v3 = vadd.f32 %v5840_v40, %v5797_v46  ;;  %v5800_v33 = vmul.f32 %v5776_v41, %v5720_v0  ;;  %v5722_v8 = vpop.f32.mrb[18].mxu0  ;;  %v5641_v56 = vpop.f32.mrb[15].mxu1 }
 0xa21   : > { %v5875_v1 = vadd.f32 %v5848_v44, %v5799_v7  ;;  %v5874_v10 = vadd.f32 %v5844_v45, %v5798_v49  ;;  %v5723_v20 = vpop.f32.mrb[19].mxu0 }
 0xa22   : > { %6449 = vtanh.f32 %v5873_v3  ;;  %v5876_v57 = vadd.f32 %v5852_v58, %v5800_v33 }
 0xa23   : > { %6451 = vtanh.f32 %v5875_v1 }
 0xa24   : > { %6453 = vtanh.f32 %v5874_v10 }
 0xa25   : > { %6455 = vtanh.f32 %v5876_v57 }
 0xa2c   : > { %v6450_v60 = vpop.eup %6449 }
 0xa2d   : > { %v6452_v14 = vpop.eup %6451 }
 0xa2e   : > { %v6454_v11 = vpop.eup %6453 }
 0xa2f   : > { %v6456_v61 = vpop.eup %6455  ;;  %v5935_v4 = vcombine.low %v6450_v60, %v6454_v11 }
 0xa30   : > { %v5936_v59 = vcombine.low %v6452_v14, %v6456_v61 }
 0xa31   : > { %v5943_v62 = vrot.slane %v5935_v4, %v7551_v28 }
 0xa32   : > { %v5950_v5 = vrot.slane %v5936_v59, %v7551_v28 }
 0xa34   : > { %v5951_v52 = vcombine.low %v5943_v62, %v5950_v5 }
 0xa36   : > { %5957 = vst [vmem:[%s8529_s11 + $0x10] sm:$0xff] %v5951_v52 }
 0xa37 PF: > { %s23_s21 = sadd.s32 1, %s6463_s21  }
 0xa38   : > { %p20_p6 = scmp.ge.s32.totalorder %s23_s21, 6  }
 0xa3a   :  { %22 = sbr.rel (!%p20_p6) target bundleno = 1 (0x1), region = 116 }

</bundles_post_ra>
